<compile_context>
chip_gen: v7x
topology: tpu7x:2x2x1
jax: 0.10.0
libtpu: 0.0.40
codegen_flags: <defaults>
</compile_context>

<pallas_src>
import functools

import jax
import jax.numpy as jnp
from jax import lax
from jax.experimental import pallas as pl
from jax.experimental.pallas import tpu as pltpu

_BN_EPS = 1e-5
_TM_MAX = 1024


def _round_up(x, m):
    return ((x + m - 1) // m) * m


@functools.lru_cache(maxsize=1)
def _vmem_limit():
    """Per-generation scoped-VMEM limit: ~75% of physical, capped at 100 MiB
    (≈96 MiB on v5e/v6e, ≈48 MiB on v7x)."""
    try:
        cap = int(pltpu.get_tpu_info().vmem_capacity_bytes)
    except Exception:
        cap = 64 * 1024 * 1024          # safe fallback (fits every generation)
    return int(min(cap * 3 // 4, 100 * 1024 * 1024))


# ---------------------------------------------------------------------------
# Pass 1: conv as tiled im2col matmul (bf16 x bf16 -> f32 acc) emitting the
#         bf16 conv output + per-(M-tile, N-tile) BN partial sums in f32.
# ---------------------------------------------------------------------------
def _conv_stats_kernel(a_ref, w_ref, y_ref, st_ref, acc_ref):
    k = pl.program_id(2)

    @pl.when(k == 0)
    def _():
        acc_ref[...] = jnp.zeros_like(acc_ref)

    acc_ref[...] += jnp.dot(a_ref[...], w_ref[...],
                            preferred_element_type=jnp.float32)

    @pl.when(k == pl.num_programs(2) - 1)
    def _():
        acc = acc_ref[...]
        # Unpadded bf16 output (width y_ref.shape[-1] <= tn; masked stores when
        # the layer has Cout=64).
        y_ref[...] = acc[:, :y_ref.shape[-1]].astype(y_ref.dtype)
        # BN partials in f32 (row 0 = sum, row 1 = sum of squares).
        s1 = jnp.sum(acc, axis=0, keepdims=True)
        s2 = jnp.sum(acc * acc, axis=0, keepdims=True)
        row = lax.broadcasted_iota(jnp.int32, (8, acc.shape[1]), 0)
        st = jnp.where(row == 0, s1, jnp.where(row == 1, s2, 0.0))
        st_ref[...] = st[None]


# ---------------------------------------------------------------------------
# Pass 2: y*scale + shift (+ residual) (+ ReLU), all bf16 in / bf16 out,
#         f32 math inside.
# ---------------------------------------------------------------------------
def _bn_apply_kernel(y_ref, sc_ref, sh_ref, *rest, relu, has_res):
    if has_res:
        res_ref, o_ref = rest
    else:
        (o_ref,) = rest
    out = y_ref[...].astype(jnp.float32) * sc_ref[...] + sh_ref[...]
    if has_res:
        out = out + res_ref[...].astype(jnp.float32)
    if relu:
        out = jnp.maximum(out, 0.0)
    o_ref[...] = out.astype(o_ref.dtype)


def fused_conv_bn(x, cp, stride, pad, relu, residual=None):
    """x: (B, D, H, W, Cin) NDHWC (any float dtype; cast to bf16 here).
    cp: prepared conv params (packed bf16 weights, f32 gamma/beta, tile sizes).
    residual: NDHWC tensor matching the conv output shape (added after BN,
    before ReLU).  Returns bf16 NDHWC."""
    B = x.shape[0]
    kd, kh, kw = cp['ksize']

    # bf16 BEFORE the im2col materialization (halves the dominant HBM stream).
    x = x.astype(jnp.bfloat16)
    # Patch feature ordering is (Cin, kd, kh, kw), Cin slowest — matches the
    # PyTorch w.reshape(Cout, -1) packing done in _prepare_conv.
    patches = lax.conv_general_dilated_patches(
        x, filter_shape=(kd, kh, kw), window_strides=tuple(stride),
        padding=[(p, p) for p in pad],
        dimension_numbers=("NDHWC", "DHWIO", "NDHWC"))
    _, Do, Ho, Wo, K = patches.shape
    M = B * Do * Ho * Wo

    Kp, Np, tk, tn, Cout = cp['Kp'], cp['Np'], cp['tk'], cp['tn'], cp['Cout']
    tm = min(_TM_MAX, _round_up(M, 16))
    Mp = _round_up(M, tm)
    gm, gn, gk = Mp // tm, Np // tn, Kp // tk
    tn_out = min(tn, Cout)               # unpadded output tile width
    gn_out = Cout // tn_out

    a = patches.reshape(M, K)
    if (Mp, Kp) != (M, K):
        a = jnp.pad(a, ((0, Mp - M), (0, Kp - K)))   # zero rows -> zero stats

    # ---- pass 1: matmul + BN partials --------------------------------------
    y, st = pl.pallas_call(
        _conv_stats_kernel,
        out_shape=(jax.ShapeDtypeStruct((Mp, Cout), jnp.bfloat16),
                   jax.ShapeDtypeStruct((gm, 8, Np), jnp.float32)),
        grid_spec=pltpu.PrefetchScalarGridSpec(
            num_scalar_prefetch=0,
            grid=(gm, gn, gk),
            in_specs=[pl.BlockSpec((tm, tk), lambda i, j, k: (i, k)),
                      pl.BlockSpec((tk, tn), lambda i, j, k: (k, j))],
            out_specs=[pl.BlockSpec((tm, tn_out), lambda i, j, k: (i, j)),
                       pl.BlockSpec((1, 8, tn), lambda i, j, k: (i, 0, j))],
            scratch_shapes=[pltpu.VMEM((tm, tn), jnp.float32)]),
        compiler_params=pltpu.CompilerParams(
            dimension_semantics=("parallel", "parallel", "arbitrary"),
            vmem_limit_bytes=_vmem_limit()),
    )(a, cp['w'])

    # ---- cross-tile BN reduction (train-mode batch statistics) -------------
    tot = jnp.sum(st, axis=0)            # (8, Np) f32
    s1, s2 = tot[0, :Cout], tot[1, :Cout]
    mean = s1 / M                        # divide by REAL M (padded rows are 0)
    var = jnp.maximum(s2 / M - mean * mean, 0.0)
    scale_v = cp['g'] * lax.rsqrt(var + _BN_EPS)
    shift_v = cp['b'] - mean * scale_v
    scale = scale_v.reshape(1, Cout)
    shift = shift_v.reshape(1, Cout)

    # ---- pass 2: apply BN + residual + ReLU ---------------------------------
    has_res = residual is not None
    ins = [y, scale, shift]
    in_specs = [pl.BlockSpec((tm, tn_out), lambda i, j: (i, j)),
                pl.BlockSpec((1, tn_out), lambda i, j: (0, j)),
                pl.BlockSpec((1, tn_out), lambda i, j: (0, j))]
    if has_res:
        r = residual.reshape(M, Cout).astype(jnp.bfloat16)
        if Mp != M:
            r = jnp.pad(r, ((0, Mp - M), (0, 0)))
        ins.append(r)
        in_specs.append(pl.BlockSpec((tm, tn_out), lambda i, j: (i, j)))

    out = pl.pallas_call(
        functools.partial(_bn_apply_kernel, relu=relu, has_res=has_res),
        out_shape=jax.ShapeDtypeStruct((Mp, Cout), jnp.bfloat16),
        grid_spec=pltpu.PrefetchScalarGridSpec(
            num_scalar_prefetch=0,
            grid=(gm, gn_out),
            in_specs=in_specs,
            out_specs=pl.BlockSpec((tm, tn_out), lambda i, j: (i, j))),
        compiler_params=pltpu.CompilerParams(
            dimension_semantics=("parallel", "parallel"),
            vmem_limit_bytes=_vmem_limit()),
    )(*ins)

    if Mp != M:
        out = out[:M]
    return out.reshape(B, Do, Ho, Wo, Cout)


# ---------------------------------------------------------------------------
# Pooling
# ---------------------------------------------------------------------------
def maxpool3d_k3s2p1(x):
    """MaxPool3d(kernel=3, stride=2, padding=1) on NDHWC via XLA's tuned
    reduce_window emitter (padding folded in, no 27x strided-slice traffic)."""
    init = jnp.array(-jnp.inf, dtype=x.dtype)
    return lax.reduce_window(x, init, lax.max,
                             window_dimensions=(1, 3, 3, 3, 1),
                             window_strides=(1, 2, 2, 2, 1),
                             padding=((0, 0), (1, 1), (1, 1), (1, 1), (0, 0)))


# ---------------------------------------------------------------------------
# ResNet blocks / backbone / fusion
# ---------------------------------------------------------------------------
def basic_block(x, blk):
    s = blk['stride']
    if 'down' in blk:
        # TODO(synk): MONAI shortcut_type/bias_downsample nuances approximated
        # as type-B shortcut (1x1x1 conv + BN, no bias).
        shortcut = fused_conv_bn(x, blk['down'], stride=(s, s, s),
                                 pad=(0, 0, 0), relu=False)
    else:
        shortcut = x
    out = fused_conv_bn(x, blk['conv1'], stride=(s, s, s), pad=(1, 1, 1),
                        relu=True)
    out = fused_conv_bn(out, blk['conv2'], stride=(1, 1, 1), pad=(1, 1, 1),
                        relu=True, residual=shortcut)
    return out


def backbone_forward(bp, x_ncdhw):
    """3D ResNet-18 (MONAI-style: conv1 7^3 stride (1,2,2)), one CT sequence."""
    x = jnp.transpose(x_ncdhw, (0, 2, 3, 4, 1))            # NCDHW -> NDHWC
    x = fused_conv_bn(x, bp['conv1'], stride=(1, 2, 2), pad=(3, 3, 3), relu=True)
    x = maxpool3d_k3s2p1(x)
    for stage in bp['stages']:
        for blk in stage:
            x = basic_block(x, blk)
    # Adaptive global average pool -> (B, 512), f32 accumulation.
    pooled = jnp.mean(x.astype(jnp.float32), axis=(1, 2, 3))
    # Tiny FC: jnp.dot beats a 128-padded Pallas matmul at this size.
    return pooled @ bp['fc_w'].T + bp['fc_b']               # (B, num_classes)


def tumor_classification_forward(params, sequences):
    """IntermediateFusionResNet forward with fusion_method='concat'."""
    outs = [backbone_forward(bp, seq)
            for bp, seq in zip(params['backbones'], sequences)]
    stacked = jnp.stack(outs, axis=1)                # (B, num_seq, num_classes)
    flat = stacked.reshape(stacked.shape[0], -1)     # (B, num_seq*num_classes)
    return flat @ params['fusion_w'].T + params['fusion_b']


# ---------------------------------------------------------------------------
# Parameter init (PyTorch-layout) and one-time prepare (pack / pad / cast)
# ---------------------------------------------------------------------------
def _init_backbone(key, num_classes):
    ks = iter(jax.random.split(key, 128))

    def w(shape, scale=0.05):
        return scale * jax.random.normal(next(ks), shape, jnp.float32)

    p = {
        'conv1_w': w((64, 1, 7, 7, 7)),
        'bn1_g': jnp.ones((64,), jnp.float32),
        'bn1_b': jnp.zeros((64,), jnp.float32),
        'stages': [],
        'fc_w': w((num_classes, 512)),
        'fc_b': w((num_classes,)),
    }
    inplanes = 64
    for planes, nblocks, stride in zip((64, 128, 256, 512),
                                       (2, 2, 2, 2), (1, 2, 2, 2)):
        blocks = []
        for bidx in range(nblocks):
            s = stride if bidx == 0 else 1
            blk = {
                'stride': s,
                'conv1_w': w((planes, inplanes, 3, 3, 3)),
                'bn1_g': jnp.ones((planes,), jnp.float32),
                'bn1_b': jnp.zeros((planes,), jnp.float32),
                'conv2_w': w((planes, planes, 3, 3, 3)),
                'bn2_g': jnp.ones((planes,), jnp.float32),
                'bn2_b': jnp.zeros((planes,), jnp.float32),
            }
            if s != 1 or inplanes != planes:
                blk['down_w'] = w((planes, inplanes, 1, 1, 1))
                blk['down_g'] = jnp.ones((planes,), jnp.float32)
                blk['down_b'] = jnp.zeros((planes,), jnp.float32)
            blocks.append(blk)
            inplanes = planes
        p['stages'].append(blocks)
    return p


def init_model(key, num_sequences=4, num_classes=2):
    keys = jax.random.split(key, num_sequences + 1)
    return {
        'backbones': [_init_backbone(keys[i], num_classes)
                      for i in range(num_sequences)],
        'fusion_w': 0.05 * jax.random.normal(
            keys[-1], (num_classes, num_sequences * num_classes), jnp.float32),
        'fusion_b': jnp.zeros((num_classes,), jnp.float32),
    }


def _prepare_conv(w, gamma, beta):
    """Pack a PyTorch-layout (Cout,Cin,kd,kh,kw) conv weight into a padded bf16
    (Kp, Np) matmul matrix ONCE; keep gamma/beta as unpadded f32 vectors."""
    Cout, Cin, kd, kh, kw = w.shape
    K, N = Cin * kd * kh * kw, Cout
    Kp, Np = _round_up(K, 128), _round_up(N, 128)
    tk = 256 if Kp % 256 == 0 else 128
    tn = 512 if Np % 512 == 0 else (256 if Np % 256 == 0 else 128)
    wmat = w.reshape(Cout, K).T.astype(jnp.bfloat16)        # (K, N), Cin-major K
    wp = jnp.pad(wmat, ((0, Kp - K), (0, Np - N)))
    return dict(w=wp, g=gamma.astype(jnp.float32), b=beta.astype(jnp.float32),
                Kp=Kp, Np=Np, tk=tk, tn=tn, Cout=N, ksize=(kd, kh, kw))


def prepare_model(raw):
    prepared = {'backbones': [],
                'fusion_w': raw['fusion_w'], 'fusion_b': raw['fusion_b']}
    for bb in raw['backbones']:
        pb = {'conv1': _prepare_conv(bb['conv1_w'], bb['bn1_g'], bb['bn1_b']),
              'fc_w': bb['fc_w'], 'fc_b': bb['fc_b'], 'stages': []}
        for stage in bb['stages']:
            pstage = []
            for blk in stage:
                pblk = {
                    'stride': blk['stride'],
                    'conv1': _prepare_conv(blk['conv1_w'], blk['bn1_g'], blk['bn1_b']),
                    'conv2': _prepare_conv(blk['conv2_w'], blk['bn2_g'], blk['bn2_b']),
                }
                if 'down_w' in blk:
                    pblk['down'] = _prepare_conv(blk['down_w'], blk['down_g'],
                                                 blk['down_b'])
                pstage.append(pblk)
            pb['stages'].append(pstage)
        prepared['backbones'].append(pb)
    return prepared


# ---------------------------------------------------------------------------
if __name__ == "__main__":
    key = jax.random.PRNGKey(0)
    pkey, xkey = jax.random.split(key)

    NUM_SEQUENCES, NUM_CLASSES = 4, 2
    B, D, H, W = 2, 16, 16, 16

    raw_params = init_model(pkey, num_sequences=NUM_SEQUENCES,
                            num_classes=NUM_CLASSES)
    params = prepare_model(raw_params)      # one-time pack/pad/cast of weights

    xkeys = jax.random.split(xkey, NUM_SEQUENCES)
    sequences = [jax.random.normal(k, (B, 1, D, H, W), jnp.float32)
                 for k in xkeys]

    logits = tumor_classification_forward(params, sequences)
    logits = jax.block_until_ready(logits)

    assert logits.shape == (B, NUM_CLASSES), logits.shape
    assert bool(jnp.all(jnp.isfinite(logits)))
    print("KERNEL_OK")
</pallas_src>

<mosaic_0001>
module attributes {stable_mosaic.version = 11 : i64} {
  func.func @_conv_stats_kernel(%arg0: i32, %arg1: i32, %arg2: i32, %arg3: memref<1024x128xbf16, #tpu.memory_space<vmem>>, %arg4: memref<128x128xbf16, #tpu.memory_space<vmem>>, %arg5: memref<1024x64xbf16, #tpu.memory_space<vmem>>, %arg6: memref<1x8x128xf32, #tpu.memory_space<vmem>>, %arg7: memref<1024x128xf32, #tpu.memory_space<vmem>>) attributes {dimension_semantics = [#tpu.dimension_semantics<parallel>, #tpu.dimension_semantics<parallel>, #tpu.dimension_semantics<arbitrary>], iteration_bounds = array<i64: 2, 1, 3>, scalar_prefetch = 0 : i64, scratch_operands = 1 : i64, tpu.core_type = #tpu.core_type<tc>, window_params = [{transform_indices = @transform_0, window_bounds = array<i64: 1024, 128>}, {transform_indices = @transform_1, window_bounds = array<i64: 128, 128>}, {transform_indices = @transform_2, window_bounds = array<i64: 1024, 64>}, {transform_indices = @transform_3, window_bounds = array<i64: 1, 8, 128>}]} {
    %c0_i32 = arith.constant 0 : i32
    %0 = arith.cmpi eq, %arg2, %c0_i32 : i32
    %1 = arith.extui %0 : i1 to i32
    %c0_i32_0 = arith.constant 0 : i32
    %2 = arith.cmpi ne, %1, %c0_i32_0 : i32
    scf.if %2 {
      %cst_9 = arith.constant 0.000000e+00 : f32
      %12 = vector.broadcast %cst_9 : f32 to vector<1024x128xf32>
      %c0_10 = arith.constant 0 : index
      %c0_11 = arith.constant 0 : index
      %13 = vector.load %arg7[%c0_10, %c0_11] : memref<1024x128xf32, #tpu.memory_space<vmem>>, vector<1024x128xf32>
      tpu.vector_store %arg7[%c0_10, %c0_11], %12 {strides = array<i32>} : memref<1024x128xf32, #tpu.memory_space<vmem>>, vector<1024x128xf32>,
    } else {
    }
    %c0 = arith.constant 0 : index
    %c0_1 = arith.constant 0 : index
    %3 = vector.load %arg7[%c0, %c0_1] : memref<1024x128xf32, #tpu.memory_space<vmem>>, vector<1024x128xf32>
    %c0_2 = arith.constant 0 : index
    %c0_3 = arith.constant 0 : index
    %4 = vector.load %arg3[%c0_2, %c0_3] : memref<1024x128xbf16, #tpu.memory_space<vmem>>, vector<1024x128xbf16>
    %c0_4 = arith.constant 0 : index
    %c0_5 = arith.constant 0 : index
    %5 = vector.load %arg4[%c0_4, %c0_5] : memref<128x128xbf16, #tpu.memory_space<vmem>>, vector<128x128xbf16>
    %cst = arith.constant dense<0.000000e+00> : vector<1024x128xf32>
    %6 = tpu.matmul %4, %5, %cst {dimension_numbers = #tpu.dot_dimension_numbers<[1], [0], [0], [1], [0, 0, 1, 1], [], []>} : vector<1024x128xbf16>, vector<128x128xbf16>, vector<1024x128xf32> -> vector<1024x128xf32>
    %7 = arith.addf %3, %6 : vector<1024x128xf32>
    %c0_6 = arith.constant 0 : index
    %c0_7 = arith.constant 0 : index
    %8 = vector.load %arg7[%c0_6, %c0_7] : memref<1024x128xf32, #tpu.memory_space<vmem>>, vector<1024x128xf32>
    tpu.vector_store %arg7[%c0_6, %c0_7], %7 {strides = array<i32>} : memref<1024x128xf32, #tpu.memory_space<vmem>>, vector<1024x128xf32>,
    %c2_i32 = arith.constant 2 : i32
    %9 = arith.cmpi eq, %arg2, %c2_i32 : i32
    %10 = arith.extui %9 : i1 to i32
    %c0_i32_8 = arith.constant 0 : i32
    %11 = arith.cmpi ne, %10, %c0_i32_8 : i32
    scf.if %11 {
      %c0_9 = arith.constant 0 : index
      %c0_10 = arith.constant 0 : index
      %12 = vector.load %arg7[%c0_9, %c0_10] : memref<1024x128xf32, #tpu.memory_space<vmem>>, vector<1024x128xf32>
      %13 = vector.extract_strided_slice %12 {offsets = [0, 0], sizes = [1024, 64], strides = [1, 1]} : vector<1024x128xf32> to vector<1024x64xf32>
      %14 = arith.truncf %13 : vector<1024x64xf32> to vector<1024x64xbf16>
      %c0_11 = arith.constant 0 : index
      %c0_12 = arith.constant 0 : index
      %15 = vector.load %arg5[%c0_11, %c0_12] : memref<1024x64xbf16, #tpu.memory_space<vmem>>, vector<1024x64xbf16>
      tpu.vector_store %arg5[%c0_11, %c0_12], %14 {strides = array<i32>} : memref<1024x64xbf16, #tpu.memory_space<vmem>>, vector<1024x64xbf16>,
      %cst_13 = arith.constant dense<0.000000e+00> : vector<128xf32>
      %16 = vector.multi_reduction <add>, %12, %cst_13 [0] : vector<1024x128xf32> to vector<128xf32>
      %17 = vector.shape_cast %16 : vector<128xf32> to vector<1x128xf32>
      %18 = arith.mulf %12, %12 : vector<1024x128xf32>
      %cst_14 = arith.constant dense<0.000000e+00> : vector<128xf32>
      %19 = vector.multi_reduction <add>, %18, %cst_14 [0] : vector<1024x128xf32> to vector<128xf32>
      %20 = vector.shape_cast %19 : vector<128xf32> to vector<1x128xf32>
      %21 = tpu.iota {dimensions = array<i32: 0>} : vector<8x128xi32>
      %c0_i32_15 = arith.constant 0 : i32
      %22 = vector.broadcast %c0_i32_15 : i32 to vector<8x128xi32>
      %23 = arith.cmpi eq, %21, %22 : vector<8x128xi32>
      %c1_i32 = arith.constant 1 : i32
      %24 = vector.broadcast %c1_i32 : i32 to vector<8x128xi32>
      %25 = arith.cmpi eq, %21, %24 : vector<8x128xi32>
      %cst_16 = arith.constant 0.000000e+00 : f32
      %26 = vector.shape_cast %20 : vector<1x128xf32> to vector<1x128xf32>
      %27 = vector.broadcast %26 : vector<1x128xf32> to vector<8x128xf32>
      %28 = vector.broadcast %cst_16 : f32 to vector<8x128xf32>
      %29 = arith.select %25, %27, %28 : vector<8x128xi1>, vector<8x128xf32>
      %30 = vector.shape_cast %17 : vector<1x128xf32> to vector<1x128xf32>
      %31 = vector.broadcast %30 : vector<1x128xf32> to vector<8x128xf32>
      %32 = arith.select %23, %31, %29 : vector<8x128xi1>, vector<8x128xf32>
      %33 = vector.shape_cast %32 : vector<8x128xf32> to vector<1x8x128xf32>
      %c0_17 = arith.constant 0 : index
      %c0_18 = arith.constant 0 : index
      %c0_19 = arith.constant 0 : index
      %34 = vector.load %arg6[%c0_17, %c0_18, %c0_19] : memref<1x8x128xf32, #tpu.memory_space<vmem>>, vector<1x8x128xf32>
      tpu.vector_store %arg6[%c0_17, %c0_18, %c0_19], %33 {strides = array<i32>} : memref<1x8x128xf32, #tpu.memory_space<vmem>>, vector<1x8x128xf32>,
    } else {
    }
    return
  }
  func.func @transform_0(%arg0: i32, %arg1: i32, %arg2: i32) -> (i32, i32) {
    %c0_i32 = arith.constant 0 : i32
    return %arg0, %arg2 : i32, i32
  }
  func.func @transform_1(%arg0: i32, %arg1: i32, %arg2: i32) -> (i32, i32) {
    %c0_i32 = arith.constant 0 : i32
    return %arg2, %arg1 : i32, i32
  }
  func.func @transform_2(%arg0: i32, %arg1: i32, %arg2: i32) -> (i32, i32) {
    %c0_i32 = arith.constant 0 : i32
    return %arg0, %arg1 : i32, i32
  }
  func.func @transform_3(%arg0: i32, %arg1: i32, %arg2: i32) -> (i32, i32, i32) {
    %c0_i32 = arith.constant 0 : i32
    %c0_i32_0 = arith.constant 0 : i32
    return %arg0, %c0_i32, %arg1 : i32, i32, i32
  }
}

</mosaic_0001>

<bundles_post_ra>
// kernel: tpu_custom_call.1
= control target key start
LH: loop header
LB: loop body
LE: loop exit
PB: predicated region body
PF: predicated region fallthrough
CT: control target
= control target key end

     0   :  { %s5943_s0 = inlined_call_operand.hbm [shape: bf16[2048,384], index: 0, kind: input, shape index: {}]   ;;  %s5944_s1 = inlined_call_operand.hbm [shape: bf16[384,128], index: 1, kind: input, shape index: {}]   ;;  %s5945_s2 = inlined_call_operand.vmem [shape: bf16[2048,64], index: 2, kind: output, shape index: {0}]   ;;  %s5946_s3 = inlined_call_operand.hbm [shape: f32[2,8,128], index: 3, kind: output, shape index: {1}]  }
   0x1   :  { %5987 = sst [smem:[#allocation31_spill]] %s5943_s0 }
   0x2   :  { %5988 = sst [smem:[#allocation32_spill]] %s5945_s2 }
   0x3   :  { %5989 = sst [smem:[#allocation33_spill]] %s5946_s3 }
   0x4   :  { %9 = vsyncpa [#allocation4], 0 }
   0x5   :  { %11 = vsyncpa [#allocation4 + $0x1], 0 }
   0x6   :  { %12 = vsyncpa [#allocation7], 0 }
   0x7   :  { %14 = vsyncpa [#allocation7 + $0x1], 0 }
   0x8   :  { %15 = vsyncpa [#allocation5], 0 }
   0x9   :  { %17 = vsyncpa [#allocation5 + $0x1], 0  ;;  %s4295_s12 = smov 0   ;;  %s4297_s13 = smov 0  }
   0xa   :  { %s4299_s14 = smov 0   ;;  %s4301_s15 = smov 0  }
   0xb   :  { %s4303_s16 = smov 0   ;;  %s4305_s17 = smov 0  }
   0xc   :  { %s4307_s18 = smov 0   ;;  %s4309_s19 = smov 0  }
   0xd   :  { %s4311_s20 = smov 0   ;;  %s4313_s21 = smov 0  }
   0xe   :  { %s4315_s22 = smov 0   ;;  %s4317_s23 = smov 0  }
   0xf   :  { %s4319_s24 = smov 0   ;;  %s4321_s25 = smov 0  }
  0x10 LB: > { %5990 = sst [smem:[#allocation12_spill]] %s4250_s21  ;;  %s35_s26 = sadd.s32 1, %s4258_s23  ;;  %s4266_s25 = sphi %s4321_s25, %s23_s25   ;;  %s4262_s24 = sphi %s4319_s24, %s6051_s24   ;;  %s4258_s23 = sphi %s4317_s23, %s6050_s23   ;;  %s4254_s22 = sphi %s4315_s22, %s6049_s22   ;;  %s4250_s21 = sphi %s4313_s21, %s6048_s21   ;;  %s4246_s20 = sphi %s4311_s20, %s6061_s20   ;;  %s4242_s19 = sphi %s4309_s19, %s6060_s19   ;;  %s4238_s18 = sphi %s4307_s18, %s6059_s18   ;;  %s4234_s17 = sphi %s4305_s17, %s6058_s17   ;;  %s4230_s16 = sphi %s4303_s16, %s6057_s16   ;;  %s4226_s15 = sphi %s4301_s15, %s6056_s15   ;;  %s4222_s14 = sphi %s4299_s14, %s6055_s14   ;;  %s4218_s13 = sphi %s4297_s13, %s6054_s13   ;;  %s4214_s12 = sphi %s4295_s12, %s6053_s12  }
  0x11   : > { %5991 = sst [smem:[#allocation13_spill]] %s4258_s23  ;;  %s42_s27 = sadd.s32 1, %s4262_s24 }
  0x12   : > { %5992 = sst [smem:[#allocation14_spill]] %s4262_s24  ;;  %p36_p0 = scmp.ge.s32.totalorder %s35_s26, 3 }
  0x13   : > { %s51_s28 = sadd.s32 1, %s4246_s20  ;;  %p58_p1 = scmp.ne.s32.totalorder %s4246_s20, %s4242_s19 }
  0x14   : > { %p5951_p2 = scmp.eq.s32.totalorder %s4266_s25, 0  ;;  %s6063_s26 = smov (%p36_p0, %s35_s26), 0 }
  0x15   : > { %5993 = sst [smem:[#allocation15_spill]] %s6063_s26  ;;  %s6065_s27 = smov (!%p36_p0, %s42_s27), %s4262_s24 }
  0x16   : > { %s4376_s29 = ssub.s32 %s4258_s23, %s6063_s26  ;;  %p4380_p3 = por %p5951_p2, %p58_p1 }
  0x17   : > { %p44_p4 = scmp.ge.s32.totalorder %s6065_s27, 2  ;;  %s135_s4 = sadd.s32 1, %s4222_s14 }
  0x18   : > { %p5950_p7 = scmp.lt.s32.totalorder %s4266_s25, 6  ;;  %s172_s6 = sand.u32 1, %s4246_s20  }
  0x19   : > { %s6067_s27 = smov (%p44_p4, %s6065_s27), 0  ;;  %s3268_s10 = sshll.u32 %s172_s6, 9 }
  0x1a   : > { %5995 = sst [smem:[#allocation16_spill]] %s6067_s27  ;;  %s46_s5 = ssub.s32 %s4262_s24, %s6067_s27 }
  0x1b   : > { %s48_s7 = sor.u32 %s4376_s29, %s46_s5  ;;  %p133_p8 = scmp.eq.s32.totalorder %s46_s5, 0 }
  0x1c   : > { %p49_p9 = scmp.eq.s32.totalorder %s48_s7, 0  ;;  %s3848_s11 = smul.u32 384, %s4262_s24 }
  0x1d   : > { %s4396_s8 = scalar_select %p133_p8, %s4222_s14, %s135_s4  }
  0x1e   : > { %s4399_s9 = scalar_select %p49_p9, %s4246_s20, %s51_s28  }
  0x1f   : > { %p4406_p10 = pnand %p5950_p7, %p4380_p3  ;;  %s182_s27 = sadd.s32 %s4258_s23, %s3848_s11 }
  0x20   : > { %s176_s3 = scalar_lea.vmem [#allocation3], %s3268_s10  ;;  %s3271_s2 = sshll.u32 %s182_s27, 6 }
  0x21   : > { %s185_s21 = sshll.u32 %s176_s3, 4  ;;  %s5997_s0 = sld [smem:[#allocation31_spill]]  ;;  %s4411_s21 = int_to_ptr.vmem [resolvable:$true] %s185_s21 }
  0x22   : > { %p3275_p11 = scmp.ge.s32.totalorder %s4266_s25, 1  ;;  %s4419_s30 = scalar_lea.sflag [#allocation4], %s172_s6 }
  0x23   : > { %p4058_p13 = pneg %p4406_p10 }
  0x27   : > { %s4416_s28 = scalar_lea.hbm %s5997_s0, %s3271_s2  ;;  %s4061_s2 = scalar_lea.hbm %s5997_s0, 49152 }
  0x28   : > { %s4056_s7 = scalar_lea.hbm %s4416_s28, 8192  ;;  %p4062_p3 = scmp.lt.u32.totalorder %s4416_s28, %s5997_s0 }
  0x29   : > { %p4057_p12 = scmp.ne.s32.totalorder %s4416_s28, %s4056_s7  ;;  %p4063_p4 = scmp.lt.u32.totalorder %s4061_s2, %s4056_s7 }
  0x2a   : > { %p4065_p9 = scmp.lt.u32.totalorder %s4056_s7, %s4416_s28 }
  0x2b   : > { %p4059_p0 = pnand %p4058_p13, %p4057_p12  ;;  %p4064_p8 = por %p4063_p4, %p4062_p3 }
  0x2d   : > { %p4060_p1 = pneg %p4059_p0  ;;  %p4066_p7 = por %p4065_p9, %p4064_p8 }
  0x2f   : > { %p4067_p2 = pnand %p4066_p7, %p4060_p1 }
  0x31   : > { %4070 = shalt.err (!%p4067_p2)
}
  0x32   : > { %s4071_s6 = scalar_lea.vmem %s4411_s21, 8192  ;;  %s4268_s4 = smov [#allocation3]  }
  0x33   : > { %p4072_p12 = scmp.ne.s32.totalorder %s4411_s21, %s4071_s6  ;;  %s4076_s5 = sshll.u32 %s4268_s4, 4  ;;  %s4077_s5 = int_to_ptr.vmem [resolvable:$false] %s4076_s5 }
  0x34   : > { %s4078_s3 = scalar_lea.vmem %s4077_s5, 16384  ;;  %p4079_p6 = scmp.lt.s32.totalorder %s4411_s21, %s4077_s5 }
  0x35   : > { %p4074_p0 = pnand %p4072_p12, %p4058_p13  ;;  %p4080_p3 = scmp.lt.s32.totalorder %s4078_s3, %s4071_s6 }
  0x37   : > { %p4075_p5 = pneg %p4074_p0  ;;  %p4081_p4 = por %p4080_p3, %p4079_p6 }
  0x39   : > { %p4082_p8 = pnand %p4081_p4, %p4075_p5 }
  0x3b   : > { %4085 = shalt.err (!%p4082_p8)
}
  0x3c   : > { %s4269_s7 = smov 192   ;;  %s5952_s27 = smov 64  }
  0x3d   : > { %s5953_s2 = smov 4   ;;  %p215_p2 = scmp.lt.s32.totalorder %s4266_s25, 7 }
  0x3e   : > { %3858 = dma.hbm_to_vmem [thread:$0]  (!%p4406_p10), %s4416_s28, 8192, %s4411_s21, %s4419_s30, %s4269_s7, %s5952_s27, %s5953_s2  }
  0x3f   : > { %p4452_p5 = pnand %p3275_p11, %p215_p2  ;;  %s3264_s11 = sadd.s32 4294967295, %s4266_s25  }
  0x40   : > { %s3265_s6 = sadd.s32 4294967294, %s4266_s25   ;;  %p65_p6 = scmp.eq.s32.totalorder %s3264_s11, 0 }
  0x41   : > { %s79_s4 = sadd.s32 1, %s4234_s17  ;;  %p5999_p7 = scmp.eq.s32.totalorder %s4376_s29, 0 }
  0x42   : > { %p6000_p13 = scmp.ne.s32.totalorder %s4242_s19, %s4238_s18  ;;  %p86_p10 = scmp.ne.s32.totalorder %s4234_s17, %s4230_s16 }
  0x43   : > { %s4462_s5 = scalar_select %p5999_p7, %s4234_s17, %s79_s4  }
  0x44   : > { %p4467_p1 = por %p65_p6, %p6000_p13  ;;  %p92_p11 = scmp.ne.s32.totalorder %s4230_s16, %s4226_s15 }
  0x45   : > { %p145_p9 = scmp.ne.s32.totalorder %s4222_s14, %s4218_s13  ;;  %p6002_p12 = scmp.eq.s32.totalorder %s4266_s25, 0 }
  0x46   : > { %s6001_s26 = scalar_select %p4467_p1, 1, 0 }
  0x47   : > { %p88_p0 = por %p86_p10, %p6002_p12  ;;  %p146_p3 = scmp.eq.s32.totalorder %s3264_s11, 5 }
  0x48   : > { %p4479_p4 = por %p92_p11, %p65_p6  ;;  %p151_p8 = scmp.ne.s32.totalorder %s4218_s13, %s4214_s12 }
  0x49   : > { %p4485_p2 = por %p146_p3, %p145_p9  ;;  %p152_p7 = scmp.eq.s32.totalorder %s3265_s6, 5 }
  0x4a   : > { %s6003_s21 = scalar_select %p4479_p4, 1, 0 }
  0x4b   : > { %s6004_s29 = scalar_select %p4485_p2, 1, 0 }
  0x4c   : > { %s195_s18 = sand.u32 1, %s4234_s17   ;;  %s3487_s28 = sshll.u32 %s4258_s23, 10 }
  0x4d   : > { %p4491_p13 = por %p152_p7, %p151_p8  ;;  %s3272_s15 = sshll.u32 %s195_s18, 6 }
  0x4e   : > { %s4498_s11 = scalar_lea.hbm %s5944_s1, %s3487_s28  ;;  %p6006_p6 = scmp.lt.s32.totalorder %s4266_s25, 6 }
  0x4f   : > { %s6005_s30 = scalar_select %p4491_p13, 1, 0 }
  0x50   : > { %p4502_p10 = pnand %p6006_p6, %p88_p0  ;;  %s199_s6 = scalar_lea.vmem [#allocation6], %s3272_s15 }
  0x51   : > { %s207_s27 = sshll.u32 %s199_s6, 4  ;;  %s4508_s2 = scalar_lea.sflag [#allocation7], %s195_s18  ;;  %s4506_s27 = int_to_ptr.vmem [resolvable:$true] %s207_s27 }
  0x52   : > { %s4086_s3 = scalar_lea.hbm %s4498_s11, 1024  ;;  %p4088_p9 = pneg %p4502_p10 }
  0x53   : > { %p4087_p11 = scmp.ne.s32.totalorder %s4498_s11, %s4086_s3  ;;  %s4091_s0 = scalar_lea.hbm %s5944_s1, 3072 }
  0x54   : > { %p4092_p0 = scmp.lt.u32.totalorder %s4498_s11, %s5944_s1  ;;  %p4093_p8 = scmp.lt.u32.totalorder %s4091_s0, %s4086_s3 }
  0x55   : > { %p4089_p12 = pnand %p4088_p9, %p4087_p11  ;;  %p4095_p6 = scmp.lt.u32.totalorder %s4086_s3, %s4498_s11 }
  0x56   : > { %p4094_p7 = por %p4093_p8, %p4092_p0 }
  0x57   : > { %p4090_p3 = pneg %p4089_p12 }
  0x58   : > { %p4096_p13 = por %p4095_p6, %p4094_p7 }
  0x5a   : > { %p4097_p2 = pnand %p4096_p13, %p4090_p3 }
  0x5c   : > { %4100 = shalt.err (!%p4097_p2)
}
  0x5d   : > { %s4101_s18 = scalar_lea.vmem %s4506_s27, 1024  ;;  %s4272_s15 = smov [#allocation6]  }
  0x5e   : > { %p4102_p11 = scmp.ne.s32.totalorder %s4506_s27, %s4101_s18  ;;  %s4106_s6 = sshll.u32 %s4272_s15, 4  ;;  %s4107_s6 = int_to_ptr.vmem [resolvable:$false] %s4106_s6 }
  0x5f   : > { %s4108_s23 = scalar_lea.vmem %s4107_s6, 2048  ;;  %p4109_p1 = scmp.lt.s32.totalorder %s4506_s27, %s4107_s6 }
  0x60   : > { %p4104_p12 = pnand %p4102_p11, %p4088_p9  ;;  %p4110_p0 = scmp.lt.s32.totalorder %s4108_s23, %s4101_s18 }
  0x62   : > { %p4105_p4 = pneg %p4104_p12  ;;  %p4111_p8 = por %p4110_p0, %p4109_p1 }
  0x64   : > { %p4112_p7 = pnand %p4111_p8, %p4105_p4 }
  0x66   : > { %4115 = shalt.err (!%p4112_p7)
}
  0x67   : > { %s6008_s0 = smov 4   ;;  %s6009_s24 = smov 64  }
  0x68   : > { %3861 = dma.hbm_to_vmem [thread:$0]  (!%p4502_p10), %s4498_s11, 1024, %s4506_s27, %s4508_s2, %s6009_s24, %s6009_s24, %s6008_s0  }
  0x69   : > { %219 = sbr.rel (%p4452_p5) target bundleno = 863 (0x35f), region = 28  ;;  %s221_s3 = sand.u32 (!%p4452_p5), 1, %s4242_s19  }
  0x6a   : > { %s3276_s28 = sshll.u32 (!%p4452_p5), %s221_s3, 9  ;;  %s222_s7 = scalar_lea.sflag (!%p4452_p5), [#allocation4], %s221_s3 }
  0x6b   : > { %s4542_s18 = scalar_lea.vmem (!%p4452_p5), [#allocation3], %s3276_s28  ;;  %p6010_p1 = scmp.ne.s32.totalorder (!%p4452_p5), %s6001_s26, 0 }
  0x70   : > { %4201 = dma.done.wait (%p6010_p1), %s222_s7, 8192  }
  0x71   : > { %4203 = vsyncadd (%p6010_p1), %s222_s7, 4294959104  ;;  %s230_s4 = sand.u32 1, %s4230_s16   ;;  %p6011_p5 = scmp.ne.s32.totalorder %s6003_s21, 0 }
  0x72   : > { %s3277_s15 = sshll.u32 %s230_s4, 6  ;;  %s231_s27 = scalar_lea.sflag [#allocation7], %s230_s4 }
  0x73   : > { %s4549_s2 = scalar_lea.vmem [#allocation6], %s3277_s15 }
  0x74   : > { %4205 = dma.done.wait (%p6011_p5), %s231_s27, 1024  }
  0x75   : > { %4207 = vsyncadd (%p6011_p5), %s231_s27, 4294966272  ;;  %s267_s10 = sand.u32 1, %s4218_s13   ;;  %s4557_s11 = sshll.u32 %s4254_s22, 7 }
  0x76   : > { %s4561_s26 = sshll.u32 %s267_s10, 3  ;;  %p273_p4 = scmp.lt.s32.totalorder %s4557_s11, 255 }
  0x77   : > { %s6012_s3 = sld [smem:[#allocation32_spill]]  ;;  %s269_s28 = scalar_lea.vmem [#allocation8], %s4561_s26 }
  0x78   : > { %s274_s6 = scalar_select %p273_p4, %s4557_s11, 255 }
  0x79   : > { %s6013_s7 = sld [smem:[#allocation12_spill]] }
  0x7a   : > { %s3280_s23 = sshll.u32 %s274_s6, 2 }
  0x7d   : > { %s4568_s21 = scalar_lea.vmem %s6012_s3, %s3280_s23 }
  0x7f   : > { %p3281_p2 = scmp.ne.s32.totalorder %s6013_s7, 0 }
  0x80   : > { %v4273_v0 = vmov (!%p3281_p2), 0.0  }
  0x81   : > { %285 = sbr.rel (%p3281_p2) target bundleno = 193 (0xc1), region = 40  ;;  %286 = vst [vmem:[#allocation2] sm:$0xff] (!%p3281_p2), %v4273_v0  ;;  %287 = vst [vmem:[#allocation2 + $0x8] sm:$0xff] (!%p3281_p2), %v4273_v0 }
  0x82   : > { %288 = vst [vmem:[#allocation2 + $0x10] sm:$0xff] (!%p3281_p2), %v4273_v0  ;;  %289 = vst [vmem:[#allocation2 + $0x18] sm:$0xff] (!%p3281_p2), %v4273_v0 }
  0x83   : > { %290 = vst [vmem:[#allocation2 + $0x20] sm:$0xff] (!%p3281_p2), %v4273_v0  ;;  %291 = vst [vmem:[#allocation2 + $0x28] sm:$0xff] (!%p3281_p2), %v4273_v0 }
  0x84   : > { %292 = vst [vmem:[#allocation2 + $0x30] sm:$0xff] (!%p3281_p2), %v4273_v0  ;;  %293 = vst [vmem:[#allocation2 + $0x38] sm:$0xff] (!%p3281_p2), %v4273_v0 }
  0x85   : > { %294 = vst [vmem:[#allocation2 + $0x40] sm:$0xff] (!%p3281_p2), %v4273_v0  ;;  %295 = vst [vmem:[#allocation2 + $0x48] sm:$0xff] (!%p3281_p2), %v4273_v0 }
  0x86   : > { %296 = vst [vmem:[#allocation2 + $0x50] sm:$0xff] (!%p3281_p2), %v4273_v0  ;;  %297 = vst [vmem:[#allocation2 + $0x58] sm:$0xff] (!%p3281_p2), %v4273_v0 }
  0x87   : > { %298 = vst [vmem:[#allocation2 + $0x60] sm:$0xff] (!%p3281_p2), %v4273_v0  ;;  %299 = vst [vmem:[#allocation2 + $0x68] sm:$0xff] (!%p3281_p2), %v4273_v0 }
  0x88   : > { %300 = vst [vmem:[#allocation2 + $0x70] sm:$0xff] %v4273_v0  ;;  %301 = vst [vmem:[#allocation2 + $0x78] sm:$0xff] %v4273_v0 }
  0x89   : > { %302 = vst [vmem:[#allocation2 + $0x80] sm:$0xff] %v4273_v0  ;;  %303 = vst [vmem:[#allocation2 + $0x88] sm:$0xff] %v4273_v0 }
  0x8a   : > { %304 = vst [vmem:[#allocation2 + $0x90] sm:$0xff] %v4273_v0  ;;  %305 = vst [vmem:[#allocation2 + $0x98] sm:$0xff] %v4273_v0 }
  0x8b   : > { %306 = vst [vmem:[#allocation2 + $0xa0] sm:$0xff] %v4273_v0  ;;  %307 = vst [vmem:[#allocation2 + $0xa8] sm:$0xff] %v4273_v0 }
  0x8c   : > { %308 = vst [vmem:[#allocation2 + $0xb0] sm:$0xff] %v4273_v0  ;;  %309 = vst [vmem:[#allocation2 + $0xb8] sm:$0xff] %v4273_v0 }
  0x8d   : > { %310 = vst [vmem:[#allocation2 + $0xc0] sm:$0xff] %v4273_v0  ;;  %311 = vst [vmem:[#allocation2 + $0xc8] sm:$0xff] %v4273_v0 }
  0x8e   : > { %312 = vst [vmem:[#allocation2 + $0xd0] sm:$0xff] %v4273_v0  ;;  %313 = vst [vmem:[#allocation2 + $0xd8] sm:$0xff] %v4273_v0 }
  0x8f   : > { %314 = vst [vmem:[#allocation2 + $0xe0] sm:$0xff] %v4273_v0  ;;  %315 = vst [vmem:[#allocation2 + $0xe8] sm:$0xff] %v4273_v0 }
  0x90   : > { %316 = vst [vmem:[#allocation2 + $0xf0] sm:$0xff] %v4273_v0  ;;  %317 = vst [vmem:[#allocation2 + $0xf8] sm:$0xff] %v4273_v0 }
  0x91   : > { %318 = vst [vmem:[#allocation2 + $0x100] sm:$0xff] %v4273_v0  ;;  %319 = vst [vmem:[#allocation2 + $0x108] sm:$0xff] %v4273_v0 }
  0x92   : > { %320 = vst [vmem:[#allocation2 + $0x110] sm:$0xff] %v4273_v0  ;;  %321 = vst [vmem:[#allocation2 + $0x118] sm:$0xff] %v4273_v0 }
  0x93   : > { %322 = vst [vmem:[#allocation2 + $0x120] sm:$0xff] %v4273_v0  ;;  %323 = vst [vmem:[#allocation2 + $0x128] sm:$0xff] %v4273_v0 }
  0x94   : > { %324 = vst [vmem:[#allocation2 + $0x130] sm:$0xff] %v4273_v0  ;;  %325 = vst [vmem:[#allocation2 + $0x138] sm:$0xff] %v4273_v0 }
  0x95   : > { %326 = vst [vmem:[#allocation2 + $0x140] sm:$0xff] %v4273_v0  ;;  %327 = vst [vmem:[#allocation2 + $0x148] sm:$0xff] %v4273_v0 }
  0x96   : > { %328 = vst [vmem:[#allocation2 + $0x150] sm:$0xff] %v4273_v0  ;;  %329 = vst [vmem:[#allocation2 + $0x158] sm:$0xff] %v4273_v0 }
  0x97   : > { %330 = vst [vmem:[#allocation2 + $0x160] sm:$0xff] %v4273_v0  ;;  %331 = vst [vmem:[#allocation2 + $0x168] sm:$0xff] %v4273_v0 }
  0x98   : > { %332 = vst [vmem:[#allocation2 + $0x170] sm:$0xff] %v4273_v0  ;;  %333 = vst [vmem:[#allocation2 + $0x178] sm:$0xff] %v4273_v0 }
  0x99   : > { %334 = vst [vmem:[#allocation2 + $0x180] sm:$0xff] %v4273_v0  ;;  %335 = vst [vmem:[#allocation2 + $0x188] sm:$0xff] %v4273_v0 }
  0x9a   : > { %336 = vst [vmem:[#allocation2 + $0x190] sm:$0xff] %v4273_v0  ;;  %337 = vst [vmem:[#allocation2 + $0x198] sm:$0xff] %v4273_v0 }
  0x9b   : > { %338 = vst [vmem:[#allocation2 + $0x1a0] sm:$0xff] %v4273_v0  ;;  %339 = vst [vmem:[#allocation2 + $0x1a8] sm:$0xff] %v4273_v0 }
  0x9c   : > { %340 = vst [vmem:[#allocation2 + $0x1b0] sm:$0xff] %v4273_v0  ;;  %341 = vst [vmem:[#allocation2 + $0x1b8] sm:$0xff] %v4273_v0 }
  0x9d   : > { %342 = vst [vmem:[#allocation2 + $0x1c0] sm:$0xff] %v4273_v0  ;;  %343 = vst [vmem:[#allocation2 + $0x1c8] sm:$0xff] %v4273_v0 }
  0x9e   : > { %344 = vst [vmem:[#allocation2 + $0x1d0] sm:$0xff] %v4273_v0  ;;  %345 = vst [vmem:[#allocation2 + $0x1d8] sm:$0xff] %v4273_v0 }
  0x9f   : > { %346 = vst [vmem:[#allocation2 + $0x1e0] sm:$0xff] %v4273_v0  ;;  %347 = vst [vmem:[#allocation2 + $0x1e8] sm:$0xff] %v4273_v0 }
  0xa0   : > { %348 = vst [vmem:[#allocation2 + $0x1f0] sm:$0xff] %v4273_v0  ;;  %349 = vst [vmem:[#allocation2 + $0x1f8] sm:$0xff] %v4273_v0 }
  0xa1   : > { %350 = vst [vmem:[#allocation2 + $0x200] sm:$0xff] %v4273_v0  ;;  %351 = vst [vmem:[#allocation2 + $0x208] sm:$0xff] %v4273_v0 }
  0xa2   : > { %352 = vst [vmem:[#allocation2 + $0x210] sm:$0xff] %v4273_v0  ;;  %353 = vst [vmem:[#allocation2 + $0x218] sm:$0xff] %v4273_v0 }
  0xa3   : > { %354 = vst [vmem:[#allocation2 + $0x220] sm:$0xff] %v4273_v0  ;;  %355 = vst [vmem:[#allocation2 + $0x228] sm:$0xff] %v4273_v0 }
  0xa4   : > { %356 = vst [vmem:[#allocation2 + $0x230] sm:$0xff] %v4273_v0  ;;  %357 = vst [vmem:[#allocation2 + $0x238] sm:$0xff] %v4273_v0 }
  0xa5   : > { %358 = vst [vmem:[#allocation2 + $0x240] sm:$0xff] %v4273_v0  ;;  %359 = vst [vmem:[#allocation2 + $0x248] sm:$0xff] %v4273_v0 }
  0xa6   : > { %360 = vst [vmem:[#allocation2 + $0x250] sm:$0xff] %v4273_v0  ;;  %361 = vst [vmem:[#allocation2 + $0x258] sm:$0xff] %v4273_v0 }
  0xa7   : > { %362 = vst [vmem:[#allocation2 + $0x260] sm:$0xff] %v4273_v0  ;;  %363 = vst [vmem:[#allocation2 + $0x268] sm:$0xff] %v4273_v0 }
  0xa8   : > { %364 = vst [vmem:[#allocation2 + $0x270] sm:$0xff] %v4273_v0  ;;  %365 = vst [vmem:[#allocation2 + $0x278] sm:$0xff] %v4273_v0 }
  0xa9   : > { %366 = vst [vmem:[#allocation2 + $0x280] sm:$0xff] %v4273_v0  ;;  %367 = vst [vmem:[#allocation2 + $0x288] sm:$0xff] %v4273_v0 }
  0xaa   : > { %368 = vst [vmem:[#allocation2 + $0x290] sm:$0xff] %v4273_v0  ;;  %369 = vst [vmem:[#allocation2 + $0x298] sm:$0xff] %v4273_v0 }
  0xab   : > { %370 = vst [vmem:[#allocation2 + $0x2a0] sm:$0xff] %v4273_v0  ;;  %371 = vst [vmem:[#allocation2 + $0x2a8] sm:$0xff] %v4273_v0 }
  0xac   : > { %372 = vst [vmem:[#allocation2 + $0x2b0] sm:$0xff] %v4273_v0  ;;  %373 = vst [vmem:[#allocation2 + $0x2b8] sm:$0xff] %v4273_v0 }
  0xad   : > { %374 = vst [vmem:[#allocation2 + $0x2c0] sm:$0xff] %v4273_v0  ;;  %375 = vst [vmem:[#allocation2 + $0x2c8] sm:$0xff] %v4273_v0 }
  0xae   : > { %376 = vst [vmem:[#allocation2 + $0x2d0] sm:$0xff] %v4273_v0  ;;  %377 = vst [vmem:[#allocation2 + $0x2d8] sm:$0xff] %v4273_v0 }
  0xaf   : > { %378 = vst [vmem:[#allocation2 + $0x2e0] sm:$0xff] %v4273_v0  ;;  %379 = vst [vmem:[#allocation2 + $0x2e8] sm:$0xff] %v4273_v0 }
  0xb0   : > { %380 = vst [vmem:[#allocation2 + $0x2f0] sm:$0xff] %v4273_v0  ;;  %381 = vst [vmem:[#allocation2 + $0x2f8] sm:$0xff] %v4273_v0 }
  0xb1   : > { %382 = vst [vmem:[#allocation2 + $0x300] sm:$0xff] %v4273_v0  ;;  %383 = vst [vmem:[#allocation2 + $0x308] sm:$0xff] %v4273_v0 }
  0xb2   : > { %384 = vst [vmem:[#allocation2 + $0x310] sm:$0xff] %v4273_v0  ;;  %385 = vst [vmem:[#allocation2 + $0x318] sm:$0xff] %v4273_v0 }
  0xb3   : > { %386 = vst [vmem:[#allocation2 + $0x320] sm:$0xff] %v4273_v0  ;;  %387 = vst [vmem:[#allocation2 + $0x328] sm:$0xff] %v4273_v0 }
  0xb4   : > { %388 = vst [vmem:[#allocation2 + $0x330] sm:$0xff] %v4273_v0  ;;  %389 = vst [vmem:[#allocation2 + $0x338] sm:$0xff] %v4273_v0 }
  0xb5   : > { %390 = vst [vmem:[#allocation2 + $0x340] sm:$0xff] %v4273_v0  ;;  %391 = vst [vmem:[#allocation2 + $0x348] sm:$0xff] %v4273_v0 }
  0xb6   : > { %392 = vst [vmem:[#allocation2 + $0x350] sm:$0xff] %v4273_v0  ;;  %393 = vst [vmem:[#allocation2 + $0x358] sm:$0xff] %v4273_v0 }
  0xb7   : > { %394 = vst [vmem:[#allocation2 + $0x360] sm:$0xff] %v4273_v0  ;;  %395 = vst [vmem:[#allocation2 + $0x368] sm:$0xff] %v4273_v0 }
  0xb8   : > { %396 = vst [vmem:[#allocation2 + $0x370] sm:$0xff] %v4273_v0  ;;  %397 = vst [vmem:[#allocation2 + $0x378] sm:$0xff] %v4273_v0 }
  0xb9   : > { %398 = vst [vmem:[#allocation2 + $0x380] sm:$0xff] %v4273_v0  ;;  %399 = vst [vmem:[#allocation2 + $0x388] sm:$0xff] %v4273_v0 }
  0xba   : > { %400 = vst [vmem:[#allocation2 + $0x390] sm:$0xff] %v4273_v0  ;;  %401 = vst [vmem:[#allocation2 + $0x398] sm:$0xff] %v4273_v0 }
  0xbb   : > { %402 = vst [vmem:[#allocation2 + $0x3a0] sm:$0xff] %v4273_v0  ;;  %403 = vst [vmem:[#allocation2 + $0x3a8] sm:$0xff] %v4273_v0 }
  0xbc   : > { %404 = vst [vmem:[#allocation2 + $0x3b0] sm:$0xff] %v4273_v0  ;;  %405 = vst [vmem:[#allocation2 + $0x3b8] sm:$0xff] %v4273_v0 }
  0xbd   : > { %406 = vst [vmem:[#allocation2 + $0x3c0] sm:$0xff] %v4273_v0  ;;  %407 = vst [vmem:[#allocation2 + $0x3c8] sm:$0xff] %v4273_v0 }
  0xbe   : > { %408 = vst [vmem:[#allocation2 + $0x3d0] sm:$0xff] %v4273_v0  ;;  %409 = vst [vmem:[#allocation2 + $0x3d8] sm:$0xff] %v4273_v0 }
  0xbf   : > { %410 = vst [vmem:[#allocation2 + $0x3e0] sm:$0xff] %v4273_v0  ;;  %411 = vst [vmem:[#allocation2 + $0x3e8] sm:$0xff] %v4273_v0 }
  0xc0   : > { %412 = vst [vmem:[#allocation2 + $0x3f0] sm:$0xff] %v4273_v0  ;;  %413 = vst [vmem:[#allocation2 + $0x3f8] sm:$0xff] %v4273_v0 }
  0xc1 PF: > { %v3984_v1 = vld [vmem:[%s4549_s2] sm:$0xff]   ;;  %v3985_v2 = vld [vmem:[%s4549_s2 + $0x8] sm:$0xff]   ;;  %v3986_v3 = vld [vmem:[%s4549_s2 + $0x10] sm:$0xff]   ;;  %s6014_s22 = sld [smem:[#allocation12_spill]] }
  0xc2   : > { %3688 = vmatprep.subr.bf16.mxu0 %v3984_v1  ;;  %3832 = vmatprep.subr.bf16.mxu1 %v3984_v1  ;;  %v3987_v4 = vld [vmem:[%s4549_s2 + $0x18] sm:$0xff]   ;;  %v3992_v5 = vld [vmem:[%s4542_s18] sm:$0xff]   ;;  %v3989_v8 = vld [vmem:[%s4549_s2 + $0x28] sm:$0xff]  }
  0xc3   : > { %3689 = vmatpush3.bf16.msra.mxu0 %v3984_v1  ;;  %3840 = vmatpush3.bf16.msra.mxu1 %v3984_v1  ;;  %v3993_v6 = vld [vmem:[%s4542_s18 + $0x100] sm:$0xff]   ;;  %v3990_v9 = vld [vmem:[%s4549_s2 + $0x30] sm:$0xff]   ;;  %v3991_v10 = vld [vmem:[%s4549_s2 + $0x38] sm:$0xff]  }
  0xc4   : > { %3690 = vmatprep.subr.bf16.mxu0 %v3985_v2  ;;  %3833 = vmatprep.subr.bf16.mxu1 %v3985_v2  ;;  %v3988_v7 = vld [vmem:[%s4549_s2 + $0x20] sm:$0xff]   ;;  %v3994_v11 = vld [vmem:[%s4542_s18 + $0x8] sm:$0xff]   ;;  %v3996_v13 = vld [vmem:[%s4542_s18 + $0x10] sm:$0xff]  }
  0xc5   : > { %3704 = vmatprep.mubr.bf16.mxu0 %v3992_v5  ;;  %3768 = vmatprep.mubr.bf16.mxu1 %v3993_v6  ;;  %v3995_v12 = vld [vmem:[%s4542_s18 + $0x108] sm:$0xff]   ;;  %v3997_v14 = vld [vmem:[%s4542_s18 + $0x110] sm:$0xff]   ;;  %v3998_v15 = vld [vmem:[%s4542_s18 + $0x18] sm:$0xff]  }
  0xc6   : > { %v3999_v16 = vld [vmem:[%s4542_s18 + $0x118] sm:$0xff]   ;;  %v4000_v17 = vld [vmem:[%s4542_s18 + $0x20] sm:$0xff]   ;;  %v4002_v19 = vld [vmem:[%s4542_s18 + $0x28] sm:$0xff]  }
  0xc7   : > { %3691 = vmatpush3.bf16.msra.mxu0 %v3985_v2  ;;  %3841 = vmatpush3.bf16.msra.mxu1 %v3985_v2  ;;  %v4001_v18 = vld [vmem:[%s4542_s18 + $0x120] sm:$0xff]   ;;  %v4003_v20 = vld [vmem:[%s4542_s18 + $0x128] sm:$0xff]   ;;  %v4004_v21 = vld [vmem:[%s4542_s18 + $0x30] sm:$0xff]   ;;  %p3354_p13 = scmp.ne.s32.totalorder %s6014_s22, 2 }
  0xc8   : > { %3692 = vmatprep.subr.bf16.mxu0 %v3986_v3  ;;  %3834 = vmatprep.subr.bf16.mxu1 %v3986_v3  ;;  %v4005_v22 = vld [vmem:[%s4542_s18 + $0x130] sm:$0xff]   ;;  %v4006_v23 = vld [vmem:[%s4542_s18 + $0x38] sm:$0xff]   ;;  %v4008_v25 = vld [vmem:[%s4542_s18 + $0x40] sm:$0xff]  }
  0xc9   : > { %v4007_v24 = vld [vmem:[%s4542_s18 + $0x138] sm:$0xff]   ;;  %v4009_v26 = vld [vmem:[%s4542_s18 + $0x140] sm:$0xff]   ;;  %v4010_v27 = vld [vmem:[%s4542_s18 + $0x48] sm:$0xff]  }
  0xca   : > { %v4011_v28 = vld [vmem:[%s4542_s18 + $0x148] sm:$0xff]   ;;  %v4012_v29 = vld [vmem:[%s4542_s18 + $0x50] sm:$0xff]   ;;  %v4014_v31 = vld [vmem:[%s4542_s18 + $0x58] sm:$0xff]  }
  0xcb   : > { %3693 = vmatpush3.bf16.msra.mxu0 %v3986_v3  ;;  %3842 = vmatpush3.bf16.msra.mxu1 %v3986_v3  ;;  %v4013_v30 = vld [vmem:[%s4542_s18 + $0x150] sm:$0xff]   ;;  %v4015_v32 = vld [vmem:[%s4542_s18 + $0x158] sm:$0xff]   ;;  %v4016_v33 = vld [vmem:[%s4542_s18 + $0x60] sm:$0xff]  }
  0xcc   : > { %3694 = vmatprep.subr.bf16.mxu0 %v3987_v4  ;;  %3835 = vmatprep.subr.bf16.mxu1 %v3987_v4  ;;  %v4017_v34 = vld [vmem:[%s4542_s18 + $0x160] sm:$0xff]   ;;  %v4018_v35 = vld [vmem:[%s4542_s18 + $0x68] sm:$0xff]   ;;  %v4020_v37 = vld [vmem:[%s4542_s18 + $0x70] sm:$0xff]  }
  0xcd   : > { %v4019_v36 = vld [vmem:[%s4542_s18 + $0x168] sm:$0xff]   ;;  %v4021_v38 = vld [vmem:[%s4542_s18 + $0x170] sm:$0xff]   ;;  %v4022_v39 = vld [vmem:[%s4542_s18 + $0x78] sm:$0xff]  }
  0xce   : > { %v4023_v40 = vld [vmem:[%s4542_s18 + $0x178] sm:$0xff]   ;;  %v4024_v41 = vld [vmem:[%s4542_s18 + $0x80] sm:$0xff]   ;;  %v4026_v43 = vld [vmem:[%s4542_s18 + $0x88] sm:$0xff]  }
  0xcf   : > { %3695 = vmatpush3.bf16.msra.mxu0 %v3987_v4  ;;  %3843 = vmatpush3.bf16.msra.mxu1 %v3987_v4  ;;  %v4025_v42 = vld [vmem:[%s4542_s18 + $0x180] sm:$0xff]   ;;  %v4027_v44 = vld [vmem:[%s4542_s18 + $0x188] sm:$0xff]   ;;  %v4028_v45 = vld [vmem:[%s4542_s18 + $0x90] sm:$0xff]  }
  0xd0   : > { %3696 = vmatprep.subr.bf16.mxu0 %v3988_v7  ;;  %3836 = vmatprep.subr.bf16.mxu1 %v3988_v7  ;;  %v4029_v46 = vld [vmem:[%s4542_s18 + $0x190] sm:$0xff]   ;;  %v4030_v47 = vld [vmem:[%s4542_s18 + $0x98] sm:$0xff]   ;;  %v4032_v49 = vld [vmem:[%s4542_s18 + $0xa0] sm:$0xff]  }
  0xd1   : > { %v4031_v48 = vld [vmem:[%s4542_s18 + $0x198] sm:$0xff]   ;;  %v4033_v50 = vld [vmem:[%s4542_s18 + $0x1a0] sm:$0xff]   ;;  %v4034_v51 = vld [vmem:[%s4542_s18 + $0xa8] sm:$0xff]  }
  0xd2   : > { %v4035_v52 = vld [vmem:[%s4542_s18 + $0x1a8] sm:$0xff]   ;;  %v4036_v53 = vld [vmem:[%s4542_s18 + $0xb0] sm:$0xff]   ;;  %v4038_v55 = vld [vmem:[%s4542_s18 + $0xb8] sm:$0xff]  }
  0xd3   : > { %3697 = vmatpush3.bf16.msra.mxu0 %v3988_v7  ;;  %3844 = vmatpush3.bf16.msra.mxu1 %v3988_v7  ;;  %v4037_v54 = vld [vmem:[%s4542_s18 + $0x1b0] sm:$0xff]   ;;  %v4039_v56 = vld [vmem:[%s4542_s18 + $0x1b8] sm:$0xff]   ;;  %v4040_v57 = vld [vmem:[%s4542_s18 + $0xc0] sm:$0xff]  }
  0xd4   : > { %3698 = vmatprep.subr.bf16.mxu0 %v3989_v8  ;;  %3837 = vmatprep.subr.bf16.mxu1 %v3989_v8  ;;  %v4041_v58 = vld [vmem:[%s4542_s18 + $0x1c0] sm:$0xff]   ;;  %v4042_v59 = vld [vmem:[%s4542_s18 + $0xc8] sm:$0xff]   ;;  %v4044_v61 = vld [vmem:[%s4542_s18 + $0xd0] sm:$0xff]  }
  0xd5   : > { %v4043_v60 = vld [vmem:[%s4542_s18 + $0x1c8] sm:$0xff]   ;;  %v4045_v62 = vld [vmem:[%s4542_s18 + $0x1d0] sm:$0xff]   ;;  %v4046_v63 = vld [vmem:[%s4542_s18 + $0xd8] sm:$0xff]  }
  0xd6   : > { %v4047_v0 = vld [vmem:[%s4542_s18 + $0x1d8] sm:$0xff]   ;;  %v4048_v1 = vld [vmem:[%s4542_s18 + $0xe0] sm:$0xff]   ;;  %v4050_v3 = vld [vmem:[%s4542_s18 + $0xe8] sm:$0xff]  }
  0xd7   : > { %3699 = vmatpush3.bf16.msra.mxu0 %v3989_v8  ;;  %3845 = vmatpush3.bf16.msra.mxu1 %v3989_v8  ;;  %v4049_v2 = vld [vmem:[%s4542_s18 + $0x1e0] sm:$0xff]   ;;  %v4051_v4 = vld [vmem:[%s4542_s18 + $0x1e8] sm:$0xff]   ;;  %v4052_v5 = vld [vmem:[%s4542_s18 + $0xf0] sm:$0xff]  }
  0xd8   : > { %3700 = vmatprep.subr.bf16.mxu0 %v3990_v9  ;;  %3838 = vmatprep.subr.bf16.mxu1 %v3990_v9  ;;  %v4053_v6 = vld [vmem:[%s4542_s18 + $0x1f0] sm:$0xff]   ;;  %v4054_v7 = vld [vmem:[%s4542_s18 + $0xf8] sm:$0xff]  }
  0xd9   : > { %v4055_v8 = vld [vmem:[%s4542_s18 + $0x1f8] sm:$0xff]  }
  0xdb   : > { %3701 = vmatpush3.bf16.msra.mxu0 %v3990_v9  ;;  %3846 = vmatpush3.bf16.msra.mxu1 %v3990_v9  ;;  %v416_v9 = vld [vmem:[#allocation2 + $0x10] sm:$0xff] }
  0xdc   : > { %3702 = vmatprep.subr.bf16.mxu0 %v3991_v10  ;;  %3839 = vmatprep.subr.bf16.mxu1 %v3991_v10 }
  0xdf   : > { %3703 = vmatpush3.bf16.msra.mxu0 %v3991_v10  ;;  %3847 = vmatpush3.bf16.msra.mxu1 %v3991_v10  ;;  %v480_v10 = vld [vmem:[#allocation2 + $0x210] sm:$0xff] }
  0xe2   : > { %3705 = vmatmul.mubr.bf16.vlgmr.msra.gmra.mrb[0].mxu0 %v3994_v11  ;;  %3769 = vmatmul.mubr.bf16.vlgmr.msra.gmra.mrb[0].mxu1 %v3995_v12  ;;  %v414_v11 = vld [vmem:[#allocation2] sm:$0xff] }
  0xe3   : > { %3708 = vmatprep.mubr.bf16.mxu0 %v3996_v13  ;;  %3772 = vmatprep.mubr.bf16.mxu1 %v3997_v14  ;;  %v478_v12 = vld [vmem:[#allocation2 + $0x200] sm:$0xff] }
  0xea   : > { %3709 = vmatmul.mubr.bf16.gmra.mrb[4].mxu0 %v3998_v15  ;;  %3773 = vmatmul.mubr.bf16.gmra.mrb[4].mxu1 %v3999_v16  ;;  %v417_v15 = vld [vmem:[#allocation2 + $0x18] sm:$0xff] }
  0xeb   : > { %3712 = vmatprep.mubr.bf16.mxu0 %v4000_v17  ;;  %3776 = vmatprep.mubr.bf16.mxu1 %v4001_v18  ;;  %v481_v16 = vld [vmem:[#allocation2 + $0x218] sm:$0xff] }
  0xf2   : > { %3713 = vmatmul.mubr.bf16.gmra.mrb[8].mxu0 %v4002_v19  ;;  %3777 = vmatmul.mubr.bf16.gmra.mrb[8].mxu1 %v4003_v20 }
  0xf3   : > { %3716 = vmatprep.mubr.bf16.mxu0 %v4004_v21  ;;  %3780 = vmatprep.mubr.bf16.mxu1 %v4005_v22  ;;  %v415_v21 = vld [vmem:[#allocation2 + $0x8] sm:$0xff] }
  0xf4   : > { %v479_v22 = vld [vmem:[#allocation2 + $0x208] sm:$0xff] }
  0xfa   : > { %3717 = vmatmul.mubr.bf16.gmra.mrb[12].mxu0 %v4006_v23  ;;  %3781 = vmatmul.mubr.bf16.gmra.mrb[12].mxu1 %v4007_v24 }
  0xfb   : > { %3720 = vmatprep.mubr.bf16.mxu0 %v4008_v25  ;;  %3784 = vmatprep.mubr.bf16.mxu1 %v4009_v26 }
 0x102   : > { %3721 = vmatmul.mubr.bf16.gmra.mrb[16].mxu0 %v4010_v27  ;;  %3785 = vmatmul.mubr.bf16.gmra.mrb[16].mxu1 %v4011_v28 }
 0x103   : > { %3724 = vmatprep.mubr.bf16.mxu0 %v4012_v29  ;;  %3788 = vmatprep.mubr.bf16.mxu1 %v4013_v30 }
 0x10a   : > { %3725 = vmatmul.mubr.bf16.gmra.mrb[20].mxu0 %v4014_v31  ;;  %3789 = vmatmul.mubr.bf16.gmra.mrb[20].mxu1 %v4015_v32 }
 0x10b   : > { %3728 = vmatprep.mubr.bf16.mxu0 %v4016_v33  ;;  %3792 = vmatprep.mubr.bf16.mxu1 %v4017_v34  ;;  %v420_v33 = vld [vmem:[#allocation2 + $0x30] sm:$0xff] }
 0x10c   : > { %v484_v34 = vld [vmem:[#allocation2 + $0x230] sm:$0xff] }
 0x112   : > { %3729 = vmatmul.mubr.bf16.gmra.mrb[24].mxu0 %v4018_v35  ;;  %3793 = vmatmul.mubr.bf16.gmra.mrb[24].mxu1 %v4019_v36  ;;  %v418_v35 = vld [vmem:[#allocation2 + $0x20] sm:$0xff] }
 0x113   : > { %3732 = vmatprep.mubr.bf16.mxu0 %v4020_v37  ;;  %3796 = vmatprep.mubr.bf16.mxu1 %v4021_v38  ;;  %v482_v36 = vld [vmem:[#allocation2 + $0x220] sm:$0xff] }
 0x11a   : > { %3733 = vmatmul.mubr.bf16.gmra.mrb[28].mxu0 %v4022_v39  ;;  %3797 = vmatmul.mubr.bf16.gmra.mrb[28].mxu1 %v4023_v40  ;;  %v421_v39 = vld [vmem:[#allocation2 + $0x38] sm:$0xff] }
 0x11b   : > { %3736 = vmatprep.mubr.bf16.mxu0 %v4024_v41  ;;  %3800 = vmatprep.mubr.bf16.mxu1 %v4025_v42  ;;  %v485_v40 = vld [vmem:[#allocation2 + $0x238] sm:$0xff] }
 0x122   : > { %3737 = vmatmul.mubr.bf16.gmra.mrb[32].mxu0 %v4026_v43  ;;  %3801 = vmatmul.mubr.bf16.gmra.mrb[32].mxu1 %v4027_v44 }
 0x123   : > { %3740 = vmatprep.mubr.bf16.mxu0 %v4028_v45  ;;  %3804 = vmatprep.mubr.bf16.mxu1 %v4029_v46  ;;  %v419_v45 = vld [vmem:[#allocation2 + $0x28] sm:$0xff] }
 0x124   : > { %v483_v46 = vld [vmem:[#allocation2 + $0x228] sm:$0xff] }
 0x12a   : > { %3741 = vmatmul.mubr.bf16.gmra.mrb[36].mxu0 %v4030_v47  ;;  %3805 = vmatmul.mubr.bf16.gmra.mrb[36].mxu1 %v4031_v48 }
 0x12b   : > { %3744 = vmatprep.mubr.bf16.mxu0 %v4032_v49  ;;  %3808 = vmatprep.mubr.bf16.mxu1 %v4033_v50 }
 0x132   : > { %3745 = vmatmul.mubr.bf16.gmra.mrb[40].mxu0 %v4034_v51  ;;  %3809 = vmatmul.mubr.bf16.gmra.mrb[40].mxu1 %v4035_v52 }
 0x133   : > { %3748 = vmatprep.mubr.bf16.mxu0 %v4036_v53  ;;  %3812 = vmatprep.mubr.bf16.mxu1 %v4037_v54 }
 0x13a   : > { %3749 = vmatmul.mubr.bf16.gmra.mrb[44].mxu0 %v4038_v55  ;;  %3813 = vmatmul.mubr.bf16.gmra.mrb[44].mxu1 %v4039_v56 }
 0x13b   : > { %3752 = vmatprep.mubr.bf16.mxu0 %v4040_v57  ;;  %3816 = vmatprep.mubr.bf16.mxu1 %v4041_v58  ;;  %v424_v57 = vld [vmem:[#allocation2 + $0x50] sm:$0xff] }
 0x13c   : > { %v488_v58 = vld [vmem:[#allocation2 + $0x250] sm:$0xff] }
 0x142   : > { %3753 = vmatmul.mubr.bf16.gmra.mrb[48].mxu0 %v4042_v59  ;;  %3817 = vmatmul.mubr.bf16.gmra.mrb[48].mxu1 %v4043_v60  ;;  %v422_v59 = vld [vmem:[#allocation2 + $0x40] sm:$0xff] }
 0x143   : > { %3756 = vmatprep.mubr.bf16.mxu0 %v4044_v61  ;;  %3820 = vmatprep.mubr.bf16.mxu1 %v4045_v62  ;;  %v486_v60 = vld [vmem:[#allocation2 + $0x240] sm:$0xff] }
 0x14a   : > { %3757 = vmatmul.mubr.bf16.gmra.mrb[52].mxu0 %v4046_v63  ;;  %3821 = vmatmul.mubr.bf16.gmra.mrb[52].mxu1 %v4047_v0  ;;  %v425_v63 = vld [vmem:[#allocation2 + $0x58] sm:$0xff] }
 0x14b   : > { %3760 = vmatprep.mubr.bf16.mxu0 %v4048_v1  ;;  %3824 = vmatprep.mubr.bf16.mxu1 %v4049_v2  ;;  %v489_v0 = vld [vmem:[#allocation2 + $0x258] sm:$0xff] }
 0x152   : > { %3761 = vmatmul.mubr.bf16.gmra.mrb[56].mxu0 %v4050_v3  ;;  %3825 = vmatmul.mubr.bf16.gmra.mrb[56].mxu1 %v4051_v4 }
 0x153   : > { %3764 = vmatprep.mubr.bf16.mxu0 %v4052_v5  ;;  %3828 = vmatprep.mubr.bf16.mxu1 %v4053_v6  ;;  %v423_v5 = vld [vmem:[#allocation2 + $0x48] sm:$0xff] }
 0x154   : > { %v487_v6 = vld [vmem:[#allocation2 + $0x248] sm:$0xff] }
 0x15a   : > { %3765 = vmatmul.mubr.bf16.gmra.mrb[60].mxu0 %v4054_v7  ;;  %3829 = vmatmul.mubr.bf16.gmra.mrb[60].mxu1 %v4055_v8 }
 0x1b5   : > { %v3706_v13 = vpop.f32.mrb[0].mxu0  ;;  %v3770_v14 = vpop.f32.mrb[0].mxu1 }
 0x1b6   : > { %v1665_v17 = vadd.f32 %v3706_v13, %v416_v9  ;;  %v1729_v18 = vadd.f32 %v3770_v14, %v480_v10  ;;  %v1152_v19 = vpop.f32.mrb[1].mxu0  ;;  %v1408_v20 = vpop.f32.mrb[1].mxu1 }
 0x1b7   : > { %v1663_v23 = vadd.f32 %v1152_v19, %v414_v11  ;;  %v1727_v24 = vadd.f32 %v1408_v20, %v478_v12  ;;  %v3707_v25 = vpop.f32.mrb[2].mxu0  ;;  %v3771_v26 = vpop.f32.mrb[2].mxu1  ;;  %v426_v19 = vld [vmem:[#allocation2 + $0x60] sm:$0xff] }
 0x1b8   : > { %1793 = vst [vmem:[#allocation2 + $0x10] sm:$0xff] %v1665_v17  ;;  %1857 = vst [vmem:[#allocation2 + $0x210] sm:$0xff] %v1729_v18  ;;  %v1666_v27 = vadd.f32 %v3707_v25, %v417_v15  ;;  %v1730_v28 = vadd.f32 %v3771_v26, %v481_v16  ;;  %v1155_v29 = vpop.f32.mrb[3].mxu0  ;;  %v1411_v30 = vpop.f32.mrb[3].mxu1  ;;  %v428_v17 = vld [vmem:[#allocation2 + $0x70] sm:$0xff]  ;;  %v490_v20 = vld [vmem:[#allocation2 + $0x260] sm:$0xff] }
 0x1b9   : > { %1791 = vst [vmem:[#allocation2] sm:$0xff] %v1663_v23  ;;  %1855 = vst [vmem:[#allocation2 + $0x200] sm:$0xff] %v1727_v24  ;;  %v1664_v31 = vadd.f32 %v1155_v29, %v415_v21  ;;  %v1728_v32 = vadd.f32 %v1411_v30, %v479_v22  ;;  %v492_v18 = vld [vmem:[#allocation2 + $0x270] sm:$0xff]  ;;  %v429_v23 = vld [vmem:[#allocation2 + $0x78] sm:$0xff] }
 0x1ba   : > { %1794 = vst [vmem:[#allocation2 + $0x18] sm:$0xff] %v1666_v27  ;;  %1858 = vst [vmem:[#allocation2 + $0x218] sm:$0xff] %v1730_v28  ;;  %v493_v24 = vld [vmem:[#allocation2 + $0x278] sm:$0xff]  ;;  %v427_v29 = vld [vmem:[#allocation2 + $0x68] sm:$0xff] }
 0x1bb   : > { %1792 = vst [vmem:[#allocation2 + $0x8] sm:$0xff] %v1664_v31  ;;  %1856 = vst [vmem:[#allocation2 + $0x208] sm:$0xff] %v1728_v32  ;;  %v491_v30 = vld [vmem:[#allocation2 + $0x268] sm:$0xff] }
 0x1bd   : > { %v3710_v37 = vpop.f32.mrb[4].mxu0  ;;  %v3774_v38 = vpop.f32.mrb[4].mxu1 }
 0x1be   : > { %v1669_v41 = vadd.f32 %v3710_v37, %v420_v33  ;;  %v1733_v42 = vadd.f32 %v3774_v38, %v484_v34  ;;  %v1168_v43 = vpop.f32.mrb[5].mxu0  ;;  %v1424_v44 = vpop.f32.mrb[5].mxu1 }
 0x1bf   : > { %v1667_v47 = vadd.f32 %v1168_v43, %v418_v35  ;;  %v1731_v48 = vadd.f32 %v1424_v44, %v482_v36  ;;  %v3711_v49 = vpop.f32.mrb[6].mxu0  ;;  %v3775_v50 = vpop.f32.mrb[6].mxu1  ;;  %v430_v43 = vld [vmem:[#allocation2 + $0x80] sm:$0xff] }
 0x1c0   : > { %1797 = vst [vmem:[#allocation2 + $0x30] sm:$0xff] %v1669_v41  ;;  %1861 = vst [vmem:[#allocation2 + $0x230] sm:$0xff] %v1733_v42  ;;  %v1670_v51 = vadd.f32 %v3711_v49, %v421_v39  ;;  %v1734_v52 = vadd.f32 %v3775_v50, %v485_v40  ;;  %v1171_v53 = vpop.f32.mrb[7].mxu0  ;;  %v1427_v54 = vpop.f32.mrb[7].mxu1  ;;  %v432_v41 = vld [vmem:[#allocation2 + $0x90] sm:$0xff]  ;;  %v494_v44 = vld [vmem:[#allocation2 + $0x280] sm:$0xff] }
 0x1c1   : > { %1795 = vst [vmem:[#allocation2 + $0x20] sm:$0xff] %v1667_v47  ;;  %1859 = vst [vmem:[#allocation2 + $0x220] sm:$0xff] %v1731_v48  ;;  %v1668_v55 = vadd.f32 %v1171_v53, %v419_v45  ;;  %v1732_v56 = vadd.f32 %v1427_v54, %v483_v46  ;;  %v496_v42 = vld [vmem:[#allocation2 + $0x290] sm:$0xff]  ;;  %v433_v47 = vld [vmem:[#allocation2 + $0x98] sm:$0xff] }
 0x1c2   : > { %1798 = vst [vmem:[#allocation2 + $0x38] sm:$0xff] %v1670_v51  ;;  %1862 = vst [vmem:[#allocation2 + $0x238] sm:$0xff] %v1734_v52  ;;  %v497_v48 = vld [vmem:[#allocation2 + $0x298] sm:$0xff]  ;;  %v431_v53 = vld [vmem:[#allocation2 + $0x88] sm:$0xff] }
 0x1c3   : > { %1796 = vst [vmem:[#allocation2 + $0x28] sm:$0xff] %v1668_v55  ;;  %1860 = vst [vmem:[#allocation2 + $0x228] sm:$0xff] %v1732_v56  ;;  %v495_v54 = vld [vmem:[#allocation2 + $0x288] sm:$0xff] }
 0x1c5   : > { %v3714_v61 = vpop.f32.mrb[8].mxu0  ;;  %v3778_v62 = vpop.f32.mrb[8].mxu1 }
 0x1c6   : > { %v1673_v1 = vadd.f32 %v3714_v61, %v424_v57  ;;  %v1737_v2 = vadd.f32 %v3778_v62, %v488_v58  ;;  %v1184_v3 = vpop.f32.mrb[9].mxu0  ;;  %v1440_v4 = vpop.f32.mrb[9].mxu1 }
 0x1c7   : > { %v1671_v7 = vadd.f32 %v1184_v3, %v422_v59  ;;  %v1735_v8 = vadd.f32 %v1440_v4, %v486_v60  ;;  %v3715_v9 = vpop.f32.mrb[10].mxu0  ;;  %v3779_v10 = vpop.f32.mrb[10].mxu1  ;;  %v434_v3 = vld [vmem:[#allocation2 + $0xa0] sm:$0xff] }
 0x1c8   : > { %1801 = vst [vmem:[#allocation2 + $0x50] sm:$0xff] %v1673_v1  ;;  %1865 = vst [vmem:[#allocation2 + $0x250] sm:$0xff] %v1737_v2  ;;  %v1674_v11 = vadd.f32 %v3715_v9, %v425_v63  ;;  %v1738_v12 = vadd.f32 %v3779_v10, %v489_v0  ;;  %v1187_v13 = vpop.f32.mrb[11].mxu0  ;;  %v1443_v14 = vpop.f32.mrb[11].mxu1  ;;  %v436_v1 = vld [vmem:[#allocation2 + $0xb0] sm:$0xff]  ;;  %v498_v4 = vld [vmem:[#allocation2 + $0x2a0] sm:$0xff] }
 0x1c9   : > { %1799 = vst [vmem:[#allocation2 + $0x40] sm:$0xff] %v1671_v7  ;;  %1863 = vst [vmem:[#allocation2 + $0x240] sm:$0xff] %v1735_v8  ;;  %v1672_v15 = vadd.f32 %v1187_v13, %v423_v5  ;;  %v1736_v16 = vadd.f32 %v1443_v14, %v487_v6  ;;  %v500_v2 = vld [vmem:[#allocation2 + $0x2b0] sm:$0xff]  ;;  %v437_v7 = vld [vmem:[#allocation2 + $0xb8] sm:$0xff] }
 0x1ca   : > { %1802 = vst [vmem:[#allocation2 + $0x58] sm:$0xff] %v1674_v11  ;;  %1866 = vst [vmem:[#allocation2 + $0x258] sm:$0xff] %v1738_v12  ;;  %v501_v8 = vld [vmem:[#allocation2 + $0x2b8] sm:$0xff]  ;;  %v435_v13 = vld [vmem:[#allocation2 + $0xa8] sm:$0xff] }
 0x1cb   : > { %1800 = vst [vmem:[#allocation2 + $0x48] sm:$0xff] %v1672_v15  ;;  %1864 = vst [vmem:[#allocation2 + $0x248] sm:$0xff] %v1736_v16  ;;  %v499_v14 = vld [vmem:[#allocation2 + $0x2a8] sm:$0xff] }
 0x1cd   : > { %v3718_v21 = vpop.f32.mrb[12].mxu0  ;;  %v3782_v22 = vpop.f32.mrb[12].mxu1 }
 0x1ce   : > { %v1677_v25 = vadd.f32 %v3718_v21, %v428_v17  ;;  %v1741_v26 = vadd.f32 %v3782_v22, %v492_v18  ;;  %v1200_v27 = vpop.f32.mrb[13].mxu0  ;;  %v1456_v28 = vpop.f32.mrb[13].mxu1 }
 0x1cf   : > { %v1675_v31 = vadd.f32 %v1200_v27, %v426_v19  ;;  %v1739_v32 = vadd.f32 %v1456_v28, %v490_v20  ;;  %v3719_v33 = vpop.f32.mrb[14].mxu0  ;;  %v3783_v34 = vpop.f32.mrb[14].mxu1  ;;  %v438_v27 = vld [vmem:[#allocation2 + $0xc0] sm:$0xff] }
 0x1d0   : > { %1805 = vst [vmem:[#allocation2 + $0x70] sm:$0xff] %v1677_v25  ;;  %1869 = vst [vmem:[#allocation2 + $0x270] sm:$0xff] %v1741_v26  ;;  %v1678_v35 = vadd.f32 %v3719_v33, %v429_v23  ;;  %v1742_v36 = vadd.f32 %v3783_v34, %v493_v24  ;;  %v1203_v37 = vpop.f32.mrb[15].mxu0  ;;  %v1459_v38 = vpop.f32.mrb[15].mxu1  ;;  %v440_v25 = vld [vmem:[#allocation2 + $0xd0] sm:$0xff]  ;;  %v502_v28 = vld [vmem:[#allocation2 + $0x2c0] sm:$0xff] }
 0x1d1   : > { %1803 = vst [vmem:[#allocation2 + $0x60] sm:$0xff] %v1675_v31  ;;  %1867 = vst [vmem:[#allocation2 + $0x260] sm:$0xff] %v1739_v32  ;;  %v1676_v39 = vadd.f32 %v1203_v37, %v427_v29  ;;  %v1740_v40 = vadd.f32 %v1459_v38, %v491_v30  ;;  %v504_v26 = vld [vmem:[#allocation2 + $0x2d0] sm:$0xff]  ;;  %v441_v31 = vld [vmem:[#allocation2 + $0xd8] sm:$0xff] }
 0x1d2   : > { %1806 = vst [vmem:[#allocation2 + $0x78] sm:$0xff] %v1678_v35  ;;  %1870 = vst [vmem:[#allocation2 + $0x278] sm:$0xff] %v1742_v36  ;;  %v505_v32 = vld [vmem:[#allocation2 + $0x2d8] sm:$0xff]  ;;  %v439_v37 = vld [vmem:[#allocation2 + $0xc8] sm:$0xff] }
 0x1d3   : > { %1804 = vst [vmem:[#allocation2 + $0x68] sm:$0xff] %v1676_v39  ;;  %1868 = vst [vmem:[#allocation2 + $0x268] sm:$0xff] %v1740_v40  ;;  %v503_v38 = vld [vmem:[#allocation2 + $0x2c8] sm:$0xff] }
 0x1d5   : > { %v3722_v45 = vpop.f32.mrb[16].mxu0  ;;  %v3786_v46 = vpop.f32.mrb[16].mxu1 }
 0x1d6   : > { %v1681_v49 = vadd.f32 %v3722_v45, %v432_v41  ;;  %v1745_v50 = vadd.f32 %v3786_v46, %v496_v42  ;;  %v1216_v51 = vpop.f32.mrb[17].mxu0  ;;  %v1472_v52 = vpop.f32.mrb[17].mxu1 }
 0x1d7   : > { %v1679_v55 = vadd.f32 %v1216_v51, %v430_v43  ;;  %v1743_v56 = vadd.f32 %v1472_v52, %v494_v44  ;;  %v3723_v57 = vpop.f32.mrb[18].mxu0  ;;  %v3787_v58 = vpop.f32.mrb[18].mxu1  ;;  %v442_v51 = vld [vmem:[#allocation2 + $0xe0] sm:$0xff] }
 0x1d8   : > { %1809 = vst [vmem:[#allocation2 + $0x90] sm:$0xff] %v1681_v49  ;;  %1873 = vst [vmem:[#allocation2 + $0x290] sm:$0xff] %v1745_v50  ;;  %v1682_v59 = vadd.f32 %v3723_v57, %v433_v47  ;;  %v1746_v60 = vadd.f32 %v3787_v58, %v497_v48  ;;  %v1219_v61 = vpop.f32.mrb[19].mxu0  ;;  %v1475_v62 = vpop.f32.mrb[19].mxu1  ;;  %v444_v49 = vld [vmem:[#allocation2 + $0xf0] sm:$0xff]  ;;  %v506_v52 = vld [vmem:[#allocation2 + $0x2e0] sm:$0xff] }
 0x1d9   : > { %1807 = vst [vmem:[#allocation2 + $0x80] sm:$0xff] %v1679_v55  ;;  %1871 = vst [vmem:[#allocation2 + $0x280] sm:$0xff] %v1743_v56  ;;  %v1680_v63 = vadd.f32 %v1219_v61, %v431_v53  ;;  %v1744_v0 = vadd.f32 %v1475_v62, %v495_v54  ;;  %v508_v50 = vld [vmem:[#allocation2 + $0x2f0] sm:$0xff]  ;;  %v445_v55 = vld [vmem:[#allocation2 + $0xf8] sm:$0xff] }
 0x1da   : > { %1810 = vst [vmem:[#allocation2 + $0x98] sm:$0xff] %v1682_v59  ;;  %1874 = vst [vmem:[#allocation2 + $0x298] sm:$0xff] %v1746_v60  ;;  %v509_v56 = vld [vmem:[#allocation2 + $0x2f8] sm:$0xff]  ;;  %v443_v61 = vld [vmem:[#allocation2 + $0xe8] sm:$0xff] }
 0x1db   : > { %1808 = vst [vmem:[#allocation2 + $0x88] sm:$0xff] %v1680_v63  ;;  %1872 = vst [vmem:[#allocation2 + $0x288] sm:$0xff] %v1744_v0  ;;  %v507_v62 = vld [vmem:[#allocation2 + $0x2e8] sm:$0xff] }
 0x1dd   : > { %v3726_v5 = vpop.f32.mrb[20].mxu0  ;;  %v3790_v6 = vpop.f32.mrb[20].mxu1 }
 0x1de   : > { %v1685_v9 = vadd.f32 %v3726_v5, %v436_v1  ;;  %v1749_v10 = vadd.f32 %v3790_v6, %v500_v2  ;;  %v1232_v11 = vpop.f32.mrb[21].mxu0  ;;  %v1488_v12 = vpop.f32.mrb[21].mxu1 }
 0x1df   : > { %v1683_v15 = vadd.f32 %v1232_v11, %v434_v3  ;;  %v1747_v16 = vadd.f32 %v1488_v12, %v498_v4  ;;  %v3727_v17 = vpop.f32.mrb[22].mxu0  ;;  %v3791_v18 = vpop.f32.mrb[22].mxu1  ;;  %v446_v11 = vld [vmem:[#allocation2 + $0x100] sm:$0xff] }
 0x1e0   : > { %1813 = vst [vmem:[#allocation2 + $0xb0] sm:$0xff] %v1685_v9  ;;  %1877 = vst [vmem:[#allocation2 + $0x2b0] sm:$0xff] %v1749_v10  ;;  %v1686_v19 = vadd.f32 %v3727_v17, %v437_v7  ;;  %v1750_v20 = vadd.f32 %v3791_v18, %v501_v8  ;;  %v1235_v21 = vpop.f32.mrb[23].mxu0  ;;  %v1491_v22 = vpop.f32.mrb[23].mxu1  ;;  %v448_v9 = vld [vmem:[#allocation2 + $0x110] sm:$0xff]  ;;  %v510_v12 = vld [vmem:[#allocation2 + $0x300] sm:$0xff] }
 0x1e1   : > { %1811 = vst [vmem:[#allocation2 + $0xa0] sm:$0xff] %v1683_v15  ;;  %1875 = vst [vmem:[#allocation2 + $0x2a0] sm:$0xff] %v1747_v16  ;;  %v1684_v23 = vadd.f32 %v1235_v21, %v435_v13  ;;  %v1748_v24 = vadd.f32 %v1491_v22, %v499_v14  ;;  %v512_v10 = vld [vmem:[#allocation2 + $0x310] sm:$0xff]  ;;  %v449_v15 = vld [vmem:[#allocation2 + $0x118] sm:$0xff] }
 0x1e2   : > { %1814 = vst [vmem:[#allocation2 + $0xb8] sm:$0xff] %v1686_v19  ;;  %1878 = vst [vmem:[#allocation2 + $0x2b8] sm:$0xff] %v1750_v20  ;;  %v513_v16 = vld [vmem:[#allocation2 + $0x318] sm:$0xff]  ;;  %v447_v21 = vld [vmem:[#allocation2 + $0x108] sm:$0xff] }
 0x1e3   : > { %1812 = vst [vmem:[#allocation2 + $0xa8] sm:$0xff] %v1684_v23  ;;  %1876 = vst [vmem:[#allocation2 + $0x2a8] sm:$0xff] %v1748_v24  ;;  %v511_v22 = vld [vmem:[#allocation2 + $0x308] sm:$0xff] }
 0x1e5   : > { %v3730_v29 = vpop.f32.mrb[24].mxu0  ;;  %v3794_v30 = vpop.f32.mrb[24].mxu1 }
 0x1e6   : > { %v1689_v33 = vadd.f32 %v3730_v29, %v440_v25  ;;  %v1753_v34 = vadd.f32 %v3794_v30, %v504_v26  ;;  %v1248_v35 = vpop.f32.mrb[25].mxu0  ;;  %v1504_v36 = vpop.f32.mrb[25].mxu1 }
 0x1e7   : > { %v1687_v39 = vadd.f32 %v1248_v35, %v438_v27  ;;  %v1751_v40 = vadd.f32 %v1504_v36, %v502_v28  ;;  %v3731_v41 = vpop.f32.mrb[26].mxu0  ;;  %v3795_v42 = vpop.f32.mrb[26].mxu1  ;;  %v450_v35 = vld [vmem:[#allocation2 + $0x120] sm:$0xff] }
 0x1e8   : > { %1817 = vst [vmem:[#allocation2 + $0xd0] sm:$0xff] %v1689_v33  ;;  %1881 = vst [vmem:[#allocation2 + $0x2d0] sm:$0xff] %v1753_v34  ;;  %v1690_v43 = vadd.f32 %v3731_v41, %v441_v31  ;;  %v1754_v44 = vadd.f32 %v3795_v42, %v505_v32  ;;  %v1251_v45 = vpop.f32.mrb[27].mxu0  ;;  %v1507_v46 = vpop.f32.mrb[27].mxu1  ;;  %v452_v33 = vld [vmem:[#allocation2 + $0x130] sm:$0xff]  ;;  %v514_v36 = vld [vmem:[#allocation2 + $0x320] sm:$0xff] }
 0x1e9   : > { %1815 = vst [vmem:[#allocation2 + $0xc0] sm:$0xff] %v1687_v39  ;;  %1879 = vst [vmem:[#allocation2 + $0x2c0] sm:$0xff] %v1751_v40  ;;  %v1688_v47 = vadd.f32 %v1251_v45, %v439_v37  ;;  %v1752_v48 = vadd.f32 %v1507_v46, %v503_v38  ;;  %v516_v34 = vld [vmem:[#allocation2 + $0x330] sm:$0xff]  ;;  %v453_v39 = vld [vmem:[#allocation2 + $0x138] sm:$0xff] }
 0x1ea   : > { %1818 = vst [vmem:[#allocation2 + $0xd8] sm:$0xff] %v1690_v43  ;;  %1882 = vst [vmem:[#allocation2 + $0x2d8] sm:$0xff] %v1754_v44  ;;  %v517_v40 = vld [vmem:[#allocation2 + $0x338] sm:$0xff]  ;;  %v451_v45 = vld [vmem:[#allocation2 + $0x128] sm:$0xff] }
 0x1eb   : > { %1816 = vst [vmem:[#allocation2 + $0xc8] sm:$0xff] %v1688_v47  ;;  %1880 = vst [vmem:[#allocation2 + $0x2c8] sm:$0xff] %v1752_v48  ;;  %v515_v46 = vld [vmem:[#allocation2 + $0x328] sm:$0xff] }
 0x1ed   : > { %v3734_v53 = vpop.f32.mrb[28].mxu0  ;;  %v3798_v54 = vpop.f32.mrb[28].mxu1 }
 0x1ee   : > { %v1693_v57 = vadd.f32 %v3734_v53, %v444_v49  ;;  %v1757_v58 = vadd.f32 %v3798_v54, %v508_v50  ;;  %v1264_v59 = vpop.f32.mrb[29].mxu0  ;;  %v1520_v60 = vpop.f32.mrb[29].mxu1 }
 0x1ef   : > { %v1691_v63 = vadd.f32 %v1264_v59, %v442_v51  ;;  %v1755_v0 = vadd.f32 %v1520_v60, %v506_v52  ;;  %v3735_v1 = vpop.f32.mrb[30].mxu0  ;;  %v3799_v2 = vpop.f32.mrb[30].mxu1  ;;  %v454_v59 = vld [vmem:[#allocation2 + $0x140] sm:$0xff] }
 0x1f0   : > { %1821 = vst [vmem:[#allocation2 + $0xf0] sm:$0xff] %v1693_v57  ;;  %1885 = vst [vmem:[#allocation2 + $0x2f0] sm:$0xff] %v1757_v58  ;;  %v1694_v3 = vadd.f32 %v3735_v1, %v445_v55  ;;  %v1758_v4 = vadd.f32 %v3799_v2, %v509_v56  ;;  %v1267_v5 = vpop.f32.mrb[31].mxu0  ;;  %v1523_v6 = vpop.f32.mrb[31].mxu1  ;;  %v456_v57 = vld [vmem:[#allocation2 + $0x150] sm:$0xff]  ;;  %v518_v60 = vld [vmem:[#allocation2 + $0x340] sm:$0xff] }
 0x1f1   : > { %1819 = vst [vmem:[#allocation2 + $0xe0] sm:$0xff] %v1691_v63  ;;  %1883 = vst [vmem:[#allocation2 + $0x2e0] sm:$0xff] %v1755_v0  ;;  %v1692_v7 = vadd.f32 %v1267_v5, %v443_v61  ;;  %v1756_v8 = vadd.f32 %v1523_v6, %v507_v62  ;;  %v520_v58 = vld [vmem:[#allocation2 + $0x350] sm:$0xff]  ;;  %v457_v63 = vld [vmem:[#allocation2 + $0x158] sm:$0xff] }
 0x1f2   : > { %1822 = vst [vmem:[#allocation2 + $0xf8] sm:$0xff] %v1694_v3  ;;  %1886 = vst [vmem:[#allocation2 + $0x2f8] sm:$0xff] %v1758_v4  ;;  %v521_v0 = vld [vmem:[#allocation2 + $0x358] sm:$0xff]  ;;  %v455_v5 = vld [vmem:[#allocation2 + $0x148] sm:$0xff] }
 0x1f3   : > { %1820 = vst [vmem:[#allocation2 + $0xe8] sm:$0xff] %v1692_v7  ;;  %1884 = vst [vmem:[#allocation2 + $0x2e8] sm:$0xff] %v1756_v8  ;;  %v519_v6 = vld [vmem:[#allocation2 + $0x348] sm:$0xff] }
 0x1f5   : > { %v3738_v13 = vpop.f32.mrb[32].mxu0  ;;  %v3802_v14 = vpop.f32.mrb[32].mxu1 }
 0x1f6   : > { %v1697_v17 = vadd.f32 %v3738_v13, %v448_v9  ;;  %v1761_v18 = vadd.f32 %v3802_v14, %v512_v10  ;;  %v1280_v19 = vpop.f32.mrb[33].mxu0  ;;  %v1536_v20 = vpop.f32.mrb[33].mxu1 }
 0x1f7   : > { %v1695_v23 = vadd.f32 %v1280_v19, %v446_v11  ;;  %v1759_v24 = vadd.f32 %v1536_v20, %v510_v12  ;;  %v3739_v25 = vpop.f32.mrb[34].mxu0  ;;  %v3803_v26 = vpop.f32.mrb[34].mxu1  ;;  %v458_v19 = vld [vmem:[#allocation2 + $0x160] sm:$0xff] }
 0x1f8   : > { %1825 = vst [vmem:[#allocation2 + $0x110] sm:$0xff] %v1697_v17  ;;  %1889 = vst [vmem:[#allocation2 + $0x310] sm:$0xff] %v1761_v18  ;;  %v1698_v27 = vadd.f32 %v3739_v25, %v449_v15  ;;  %v1762_v28 = vadd.f32 %v3803_v26, %v513_v16  ;;  %v1283_v29 = vpop.f32.mrb[35].mxu0  ;;  %v1539_v30 = vpop.f32.mrb[35].mxu1  ;;  %v460_v17 = vld [vmem:[#allocation2 + $0x170] sm:$0xff]  ;;  %v522_v20 = vld [vmem:[#allocation2 + $0x360] sm:$0xff] }
 0x1f9   : > { %1823 = vst [vmem:[#allocation2 + $0x100] sm:$0xff] %v1695_v23  ;;  %1887 = vst [vmem:[#allocation2 + $0x300] sm:$0xff] %v1759_v24  ;;  %v1696_v31 = vadd.f32 %v1283_v29, %v447_v21  ;;  %v1760_v32 = vadd.f32 %v1539_v30, %v511_v22  ;;  %v524_v18 = vld [vmem:[#allocation2 + $0x370] sm:$0xff]  ;;  %v461_v23 = vld [vmem:[#allocation2 + $0x178] sm:$0xff] }
 0x1fa   : > { %1826 = vst [vmem:[#allocation2 + $0x118] sm:$0xff] %v1698_v27  ;;  %1890 = vst [vmem:[#allocation2 + $0x318] sm:$0xff] %v1762_v28  ;;  %v525_v24 = vld [vmem:[#allocation2 + $0x378] sm:$0xff]  ;;  %v459_v29 = vld [vmem:[#allocation2 + $0x168] sm:$0xff] }
 0x1fb   : > { %1824 = vst [vmem:[#allocation2 + $0x108] sm:$0xff] %v1696_v31  ;;  %1888 = vst [vmem:[#allocation2 + $0x308] sm:$0xff] %v1760_v32  ;;  %v523_v30 = vld [vmem:[#allocation2 + $0x368] sm:$0xff] }
 0x1fd   : > { %v3742_v37 = vpop.f32.mrb[36].mxu0  ;;  %v3806_v38 = vpop.f32.mrb[36].mxu1 }
 0x1fe   : > { %v1701_v41 = vadd.f32 %v3742_v37, %v452_v33  ;;  %v1765_v42 = vadd.f32 %v3806_v38, %v516_v34  ;;  %v1296_v43 = vpop.f32.mrb[37].mxu0  ;;  %v1552_v44 = vpop.f32.mrb[37].mxu1 }
 0x1ff   : > { %v1699_v47 = vadd.f32 %v1296_v43, %v450_v35  ;;  %v1763_v48 = vadd.f32 %v1552_v44, %v514_v36  ;;  %v3743_v49 = vpop.f32.mrb[38].mxu0  ;;  %v3807_v50 = vpop.f32.mrb[38].mxu1  ;;  %v462_v43 = vld [vmem:[#allocation2 + $0x180] sm:$0xff] }
 0x200   : > { %1829 = vst [vmem:[#allocation2 + $0x130] sm:$0xff] %v1701_v41  ;;  %1893 = vst [vmem:[#allocation2 + $0x330] sm:$0xff] %v1765_v42  ;;  %v1702_v51 = vadd.f32 %v3743_v49, %v453_v39  ;;  %v1766_v52 = vadd.f32 %v3807_v50, %v517_v40  ;;  %v1299_v53 = vpop.f32.mrb[39].mxu0  ;;  %v1555_v54 = vpop.f32.mrb[39].mxu1  ;;  %v464_v41 = vld [vmem:[#allocation2 + $0x190] sm:$0xff]  ;;  %v526_v44 = vld [vmem:[#allocation2 + $0x380] sm:$0xff] }
 0x201   : > { %1827 = vst [vmem:[#allocation2 + $0x120] sm:$0xff] %v1699_v47  ;;  %1891 = vst [vmem:[#allocation2 + $0x320] sm:$0xff] %v1763_v48  ;;  %v1700_v55 = vadd.f32 %v1299_v53, %v451_v45  ;;  %v1764_v56 = vadd.f32 %v1555_v54, %v515_v46  ;;  %v528_v42 = vld [vmem:[#allocation2 + $0x390] sm:$0xff]  ;;  %v465_v47 = vld [vmem:[#allocation2 + $0x198] sm:$0xff] }
 0x202   : > { %1830 = vst [vmem:[#allocation2 + $0x138] sm:$0xff] %v1702_v51  ;;  %1894 = vst [vmem:[#allocation2 + $0x338] sm:$0xff] %v1766_v52  ;;  %v529_v48 = vld [vmem:[#allocation2 + $0x398] sm:$0xff]  ;;  %v463_v53 = vld [vmem:[#allocation2 + $0x188] sm:$0xff] }
 0x203   : > { %1828 = vst [vmem:[#allocation2 + $0x128] sm:$0xff] %v1700_v55  ;;  %1892 = vst [vmem:[#allocation2 + $0x328] sm:$0xff] %v1764_v56  ;;  %v527_v54 = vld [vmem:[#allocation2 + $0x388] sm:$0xff] }
 0x205   : > { %v3746_v61 = vpop.f32.mrb[40].mxu0  ;;  %v3810_v62 = vpop.f32.mrb[40].mxu1 }
 0x206   : > { %v1705_v1 = vadd.f32 %v3746_v61, %v456_v57  ;;  %v1769_v2 = vadd.f32 %v3810_v62, %v520_v58  ;;  %v1312_v3 = vpop.f32.mrb[41].mxu0  ;;  %v1568_v4 = vpop.f32.mrb[41].mxu1 }
 0x207   : > { %v1703_v7 = vadd.f32 %v1312_v3, %v454_v59  ;;  %v1767_v8 = vadd.f32 %v1568_v4, %v518_v60  ;;  %v3747_v9 = vpop.f32.mrb[42].mxu0  ;;  %v3811_v10 = vpop.f32.mrb[42].mxu1  ;;  %v466_v3 = vld [vmem:[#allocation2 + $0x1a0] sm:$0xff] }
 0x208   : > { %1833 = vst [vmem:[#allocation2 + $0x150] sm:$0xff] %v1705_v1  ;;  %1897 = vst [vmem:[#allocation2 + $0x350] sm:$0xff] %v1769_v2  ;;  %v1706_v11 = vadd.f32 %v3747_v9, %v457_v63  ;;  %v1770_v12 = vadd.f32 %v3811_v10, %v521_v0  ;;  %v1315_v13 = vpop.f32.mrb[43].mxu0  ;;  %v1571_v14 = vpop.f32.mrb[43].mxu1  ;;  %v468_v1 = vld [vmem:[#allocation2 + $0x1b0] sm:$0xff]  ;;  %v530_v4 = vld [vmem:[#allocation2 + $0x3a0] sm:$0xff] }
 0x209   : > { %1831 = vst [vmem:[#allocation2 + $0x140] sm:$0xff] %v1703_v7  ;;  %1895 = vst [vmem:[#allocation2 + $0x340] sm:$0xff] %v1767_v8  ;;  %v1704_v15 = vadd.f32 %v1315_v13, %v455_v5  ;;  %v1768_v16 = vadd.f32 %v1571_v14, %v519_v6  ;;  %v532_v2 = vld [vmem:[#allocation2 + $0x3b0] sm:$0xff]  ;;  %v469_v7 = vld [vmem:[#allocation2 + $0x1b8] sm:$0xff] }
 0x20a   : > { %1834 = vst [vmem:[#allocation2 + $0x158] sm:$0xff] %v1706_v11  ;;  %1898 = vst [vmem:[#allocation2 + $0x358] sm:$0xff] %v1770_v12  ;;  %v533_v8 = vld [vmem:[#allocation2 + $0x3b8] sm:$0xff]  ;;  %v467_v13 = vld [vmem:[#allocation2 + $0x1a8] sm:$0xff] }
 0x20b   : > { %1832 = vst [vmem:[#allocation2 + $0x148] sm:$0xff] %v1704_v15  ;;  %1896 = vst [vmem:[#allocation2 + $0x348] sm:$0xff] %v1768_v16  ;;  %v531_v14 = vld [vmem:[#allocation2 + $0x3a8] sm:$0xff] }
 0x20d   : > { %v3750_v21 = vpop.f32.mrb[44].mxu0  ;;  %v3814_v22 = vpop.f32.mrb[44].mxu1 }
 0x20e   : > { %v1709_v25 = vadd.f32 %v3750_v21, %v460_v17  ;;  %v1773_v26 = vadd.f32 %v3814_v22, %v524_v18  ;;  %v1328_v27 = vpop.f32.mrb[45].mxu0  ;;  %v1584_v28 = vpop.f32.mrb[45].mxu1 }
 0x20f   : > { %v1707_v31 = vadd.f32 %v1328_v27, %v458_v19  ;;  %v1771_v32 = vadd.f32 %v1584_v28, %v522_v20  ;;  %v3751_v33 = vpop.f32.mrb[46].mxu0  ;;  %v3815_v34 = vpop.f32.mrb[46].mxu1  ;;  %v470_v27 = vld [vmem:[#allocation2 + $0x1c0] sm:$0xff] }
 0x210   : > { %1837 = vst [vmem:[#allocation2 + $0x170] sm:$0xff] %v1709_v25  ;;  %1901 = vst [vmem:[#allocation2 + $0x370] sm:$0xff] %v1773_v26  ;;  %v1710_v35 = vadd.f32 %v3751_v33, %v461_v23  ;;  %v1774_v36 = vadd.f32 %v3815_v34, %v525_v24  ;;  %v1331_v37 = vpop.f32.mrb[47].mxu0  ;;  %v1587_v38 = vpop.f32.mrb[47].mxu1  ;;  %v472_v25 = vld [vmem:[#allocation2 + $0x1d0] sm:$0xff]  ;;  %v534_v28 = vld [vmem:[#allocation2 + $0x3c0] sm:$0xff] }
 0x211   : > { %1835 = vst [vmem:[#allocation2 + $0x160] sm:$0xff] %v1707_v31  ;;  %1899 = vst [vmem:[#allocation2 + $0x360] sm:$0xff] %v1771_v32  ;;  %v1708_v39 = vadd.f32 %v1331_v37, %v459_v29  ;;  %v1772_v40 = vadd.f32 %v1587_v38, %v523_v30  ;;  %v536_v26 = vld [vmem:[#allocation2 + $0x3d0] sm:$0xff]  ;;  %v473_v31 = vld [vmem:[#allocation2 + $0x1d8] sm:$0xff] }
 0x212   : > { %1838 = vst [vmem:[#allocation2 + $0x178] sm:$0xff] %v1710_v35  ;;  %1902 = vst [vmem:[#allocation2 + $0x378] sm:$0xff] %v1774_v36  ;;  %v537_v32 = vld [vmem:[#allocation2 + $0x3d8] sm:$0xff]  ;;  %v471_v37 = vld [vmem:[#allocation2 + $0x1c8] sm:$0xff] }
 0x213   : > { %1836 = vst [vmem:[#allocation2 + $0x168] sm:$0xff] %v1708_v39  ;;  %1900 = vst [vmem:[#allocation2 + $0x368] sm:$0xff] %v1772_v40  ;;  %v535_v38 = vld [vmem:[#allocation2 + $0x3c8] sm:$0xff] }
 0x215   : > { %v3754_v45 = vpop.f32.mrb[48].mxu0  ;;  %v3818_v46 = vpop.f32.mrb[48].mxu1 }
 0x216   : > { %v1713_v49 = vadd.f32 %v3754_v45, %v464_v41  ;;  %v1777_v50 = vadd.f32 %v3818_v46, %v528_v42  ;;  %v1344_v51 = vpop.f32.mrb[49].mxu0  ;;  %v1600_v52 = vpop.f32.mrb[49].mxu1 }
 0x217   : > { %v1711_v55 = vadd.f32 %v1344_v51, %v462_v43  ;;  %v1775_v56 = vadd.f32 %v1600_v52, %v526_v44  ;;  %v3755_v57 = vpop.f32.mrb[50].mxu0  ;;  %v3819_v58 = vpop.f32.mrb[50].mxu1  ;;  %v474_v51 = vld [vmem:[#allocation2 + $0x1e0] sm:$0xff] }
 0x218   : > { %1841 = vst [vmem:[#allocation2 + $0x190] sm:$0xff] %v1713_v49  ;;  %1905 = vst [vmem:[#allocation2 + $0x390] sm:$0xff] %v1777_v50  ;;  %v1714_v59 = vadd.f32 %v3755_v57, %v465_v47  ;;  %v1778_v60 = vadd.f32 %v3819_v58, %v529_v48  ;;  %v1347_v61 = vpop.f32.mrb[51].mxu0  ;;  %v1603_v62 = vpop.f32.mrb[51].mxu1  ;;  %v476_v49 = vld [vmem:[#allocation2 + $0x1f0] sm:$0xff]  ;;  %v538_v52 = vld [vmem:[#allocation2 + $0x3e0] sm:$0xff] }
 0x219   : > { %1839 = vst [vmem:[#allocation2 + $0x180] sm:$0xff] %v1711_v55  ;;  %1903 = vst [vmem:[#allocation2 + $0x380] sm:$0xff] %v1775_v56  ;;  %v1712_v63 = vadd.f32 %v1347_v61, %v463_v53  ;;  %v1776_v0 = vadd.f32 %v1603_v62, %v527_v54  ;;  %v540_v50 = vld [vmem:[#allocation2 + $0x3f0] sm:$0xff]  ;;  %v477_v55 = vld [vmem:[#allocation2 + $0x1f8] sm:$0xff] }
 0x21a   : > { %1842 = vst [vmem:[#allocation2 + $0x198] sm:$0xff] %v1714_v59  ;;  %1906 = vst [vmem:[#allocation2 + $0x398] sm:$0xff] %v1778_v60  ;;  %v541_v56 = vld [vmem:[#allocation2 + $0x3f8] sm:$0xff]  ;;  %v475_v61 = vld [vmem:[#allocation2 + $0x1e8] sm:$0xff] }
 0x21b   : > { %1840 = vst [vmem:[#allocation2 + $0x188] sm:$0xff] %v1712_v63  ;;  %1904 = vst [vmem:[#allocation2 + $0x388] sm:$0xff] %v1776_v0  ;;  %v539_v62 = vld [vmem:[#allocation2 + $0x3e8] sm:$0xff] }
 0x21d   : > { %v3758_v5 = vpop.f32.mrb[52].mxu0  ;;  %v3822_v6 = vpop.f32.mrb[52].mxu1 }
 0x21e   : > { %v1717_v9 = vadd.f32 %v3758_v5, %v468_v1  ;;  %v1781_v10 = vadd.f32 %v3822_v6, %v532_v2  ;;  %v1360_v11 = vpop.f32.mrb[53].mxu0  ;;  %v1616_v12 = vpop.f32.mrb[53].mxu1 }
 0x21f   : > { %v1715_v15 = vadd.f32 %v1360_v11, %v466_v3  ;;  %v1779_v16 = vadd.f32 %v1616_v12, %v530_v4  ;;  %v3759_v17 = vpop.f32.mrb[54].mxu0  ;;  %v3823_v18 = vpop.f32.mrb[54].mxu1 }
 0x220   : > { %1845 = vst [vmem:[#allocation2 + $0x1b0] sm:$0xff] %v1717_v9  ;;  %1909 = vst [vmem:[#allocation2 + $0x3b0] sm:$0xff] %v1781_v10  ;;  %v1718_v19 = vadd.f32 %v3759_v17, %v469_v7  ;;  %v1782_v20 = vadd.f32 %v3823_v18, %v533_v8  ;;  %v1363_v21 = vpop.f32.mrb[55].mxu0  ;;  %v1619_v22 = vpop.f32.mrb[55].mxu1 }
 0x221   : > { %1843 = vst [vmem:[#allocation2 + $0x1a0] sm:$0xff] %v1715_v15  ;;  %1907 = vst [vmem:[#allocation2 + $0x3a0] sm:$0xff] %v1779_v16  ;;  %v1716_v23 = vadd.f32 %v1363_v21, %v467_v13  ;;  %v1780_v24 = vadd.f32 %v1619_v22, %v531_v14 }
 0x222   : > { %1846 = vst [vmem:[#allocation2 + $0x1b8] sm:$0xff] %v1718_v19  ;;  %1910 = vst [vmem:[#allocation2 + $0x3b8] sm:$0xff] %v1782_v20 }
 0x223   : > { %1844 = vst [vmem:[#allocation2 + $0x1a8] sm:$0xff] %v1716_v23  ;;  %1908 = vst [vmem:[#allocation2 + $0x3a8] sm:$0xff] %v1780_v24 }
 0x225   : > { %v3762_v29 = vpop.f32.mrb[56].mxu0  ;;  %v3826_v30 = vpop.f32.mrb[56].mxu1 }
 0x226   : > { %v1721_v33 = vadd.f32 %v3762_v29, %v472_v25  ;;  %v1785_v34 = vadd.f32 %v3826_v30, %v536_v26  ;;  %v1376_v35 = vpop.f32.mrb[57].mxu0  ;;  %v1632_v36 = vpop.f32.mrb[57].mxu1 }
 0x227   : > { %v1719_v39 = vadd.f32 %v1376_v35, %v470_v27  ;;  %v1783_v40 = vadd.f32 %v1632_v36, %v534_v28  ;;  %v3763_v41 = vpop.f32.mrb[58].mxu0  ;;  %v3827_v42 = vpop.f32.mrb[58].mxu1 }
 0x228   : > { %1849 = vst [vmem:[#allocation2 + $0x1d0] sm:$0xff] %v1721_v33  ;;  %1913 = vst [vmem:[#allocation2 + $0x3d0] sm:$0xff] %v1785_v34  ;;  %v1722_v43 = vadd.f32 %v3763_v41, %v473_v31  ;;  %v1786_v44 = vadd.f32 %v3827_v42, %v537_v32  ;;  %v1379_v45 = vpop.f32.mrb[59].mxu0  ;;  %v1635_v46 = vpop.f32.mrb[59].mxu1 }
 0x229   : > { %1847 = vst [vmem:[#allocation2 + $0x1c0] sm:$0xff] %v1719_v39  ;;  %1911 = vst [vmem:[#allocation2 + $0x3c0] sm:$0xff] %v1783_v40  ;;  %v1720_v47 = vadd.f32 %v1379_v45, %v471_v37  ;;  %v1784_v48 = vadd.f32 %v1635_v46, %v535_v38 }
 0x22a   : > { %1850 = vst [vmem:[#allocation2 + $0x1d8] sm:$0xff] %v1722_v43  ;;  %1914 = vst [vmem:[#allocation2 + $0x3d8] sm:$0xff] %v1786_v44 }
 0x22b   : > { %1848 = vst [vmem:[#allocation2 + $0x1c8] sm:$0xff] %v1720_v47  ;;  %1912 = vst [vmem:[#allocation2 + $0x3c8] sm:$0xff] %v1784_v48 }
 0x22d   : > { %v3766_v53 = vpop.f32.mrb[60].mxu0  ;;  %v3830_v54 = vpop.f32.mrb[60].mxu1  ;;  %1922 = sbr.rel (%p3354_p13) target bundleno = 837 (0x345), region = 44 }
 0x22e   : > { %v1725_v57 = vadd.f32 %v3766_v53, %v476_v49  ;;  %v1789_v58 = vadd.f32 %v3830_v54, %v540_v50  ;;  %v1392_v59 = vpop.f32.mrb[61].mxu0  ;;  %v1648_v60 = vpop.f32.mrb[61].mxu1 }
 0x22f   : > { %v1723_v63 = vadd.f32 %v1392_v59, %v474_v51  ;;  %v1787_v0 = vadd.f32 %v1648_v60, %v538_v52  ;;  %v3767_v1 = vpop.f32.mrb[62].mxu0  ;;  %v3831_v2 = vpop.f32.mrb[62].mxu1 }
 0x230   : > { %1853 = vst [vmem:[#allocation2 + $0x1f0] sm:$0xff] %v1725_v57  ;;  %1917 = vst [vmem:[#allocation2 + $0x3f0] sm:$0xff] %v1789_v58  ;;  %v1726_v3 = vadd.f32 %v3767_v1, %v477_v55  ;;  %v1790_v4 = vadd.f32 %v3831_v2, %v541_v56  ;;  %v1395_v5 = vpop.f32.mrb[63].mxu0  ;;  %v1651_v6 = vpop.f32.mrb[63].mxu1 }
 0x231   : > { %1851 = vst [vmem:[#allocation2 + $0x1e0] sm:$0xff] %v1723_v63  ;;  %1915 = vst [vmem:[#allocation2 + $0x3e0] sm:$0xff] %v1787_v0  ;;  %v1724_v7 = vadd.f32 %v1395_v5, %v475_v61  ;;  %v1788_v8 = vadd.f32 %v1651_v6, %v539_v62 }
 0x232   : > { %1854 = vst [vmem:[#allocation2 + $0x1f8] sm:$0xff] %v1726_v3  ;;  %1918 = vst [vmem:[#allocation2 + $0x3f8] sm:$0xff] %v1790_v4 }
 0x233   : > { %1852 = vst [vmem:[#allocation2 + $0x1e8] sm:$0xff] %v1724_v7  ;;  %1916 = vst [vmem:[#allocation2 + $0x3e8] sm:$0xff] %v1788_v8 }
 0x234   : > { %v1923_v9 = vld [vmem:[#allocation2] sm:$0xff]  ;;  %vm2563_vm0 = vcmask 519168   ;;  %v1924_v10 = vld [vmem:[#allocation2 + $0x8] sm:$0xff]  ;;  %v1925_v11 = vld [vmem:[#allocation2 + $0x10] sm:$0xff] }
 0x235   : > { %v3488_v12 = vpack.c.bf16 %v1923_v9, %v1923_v9  ;;  %v2825_v13 = vmul.f32 %v1923_v9, %v1923_v9  ;;  %v3489_v14 = vpack.c.bf16 %v1924_v10, %v1924_v10  ;;  %v2692_v15 = vadd.f32 %v1924_v10, %v1923_v9  ;;  %v1926_v16 = vld [vmem:[#allocation2 + $0x18] sm:$0xff]  ;;  %v1927_v21 = vld [vmem:[#allocation2 + $0x20] sm:$0xff]  ;;  %v1928_v24 = vld [vmem:[#allocation2 + $0x28] sm:$0xff] }
 0x236   : > { %v2826_v17 = vmul.f32 %v1924_v10, %v1924_v10  ;;  %v3490_v18 = vpack.c.bf16 %v1925_v11, %v1925_v11  ;;  %v2827_v19 = vmul.f32 %v1925_v11, %v1925_v11  ;;  %v3491_v20 = vpack.c.bf16 %v1926_v16, %v1926_v16  ;;  %v1929_v25 = vld [vmem:[#allocation2 + $0x30] sm:$0xff]  ;;  %v1930_v30 = vld [vmem:[#allocation2 + $0x38] sm:$0xff]  ;;  %v1931_v33 = vld [vmem:[#allocation2 + $0x40] sm:$0xff] }
 0x237   : > { %2564 = vst.msk [vmem:[%s4568_s21] sm:$0xf] %vm2563_vm0, %v3488_v12  ;;  %2565 = vst.msk [vmem:[%s4568_s21 + $0x4] sm:$0xf] %vm2563_vm0, %v3489_v14  ;;  %v2693_v22 = vadd.f32 %v2692_v15, %v1925_v11  ;;  %v3492_v23 = vpack.c.bf16 %v1927_v21, %v1927_v21  ;;  %v2828_v27 = vmul.f32 %v1926_v16, %v1926_v16  ;;  %v4783_v34 = vld [vmem:[#allocation2 + $0x48] sm:$0xff]  ;;  %v4791_v39 = vld [vmem:[#allocation2 + $0x50] sm:$0xff] }
 0x238   : > { %v2953_v26 = vadd.f32 %v2826_v17, %v2825_v13  ;;  %2566 = vst.msk [vmem:[%s4568_s21 + $0x8] sm:$0xf] %vm2563_vm0, %v3490_v18  ;;  %2567 = vst.msk [vmem:[%s4568_s21 + $0xc] sm:$0xf] %vm2563_vm0, %v3491_v20  ;;  %v3493_v28 = vpack.c.bf16 %v1928_v24, %v1928_v24  ;;  %v3494_v29 = vpack.c.bf16 %v1929_v25, %v1929_v25  ;;  %v4797_v42 = vld [vmem:[#allocation2 + $0x58] sm:$0xff]  ;;  %v4799_v43 = vld [vmem:[#allocation2 + $0x60] sm:$0xff] }
 0x239   : > { %v2694_v31 = vadd.f32 %v2693_v22, %v1926_v16  ;;  %2568 = vst.msk [vmem:[%s4568_s21 + $0x10] sm:$0xf] %vm2563_vm0, %v3492_v23  ;;  %v3495_v32 = vpack.c.bf16 %v1930_v30, %v1930_v30  ;;  %v2829_v36 = vmul.f32 %v1927_v21, %v1927_v21  ;;  %v3496_v37 = vpack.c.bf16 %v1931_v33, %v1931_v33  ;;  %v4809_v48 = vld [vmem:[#allocation2 + $0x68] sm:$0xff]  ;;  %v4815_v51 = vld [vmem:[#allocation2 + $0x70] sm:$0xff]  ;;  %v4817_v52 = vld [vmem:[#allocation2 + $0x78] sm:$0xff] }
 0x23a   : > { %v2954_v35 = vadd.f32 %v2953_v26, %v2827_v19  ;;  %2569 = vst.msk [vmem:[%s4568_s21 + $0x14] sm:$0xf] %vm2563_vm0, %v3493_v28  ;;  %2570 = vst.msk [vmem:[%s4568_s21 + $0x18] sm:$0xf] %vm2563_vm0, %v3494_v29  ;;  %v3497_v38 = vpack.c.bf16 %v4783_v34, %v4783_v34  ;;  %v3498_v41 = vpack.c.bf16 %v4791_v39, %v4791_v39  ;;  %v4827_v57 = vld [vmem:[#allocation2 + $0x80] sm:$0xff]  ;;  %v4833_v60 = vld [vmem:[#allocation2 + $0x88] sm:$0xff] }
 0x23b   : > { %v2695_v40 = vadd.f32 %v2694_v31, %v1927_v21  ;;  %2571 = vst.msk [vmem:[%s4568_s21 + $0x1c] sm:$0xf] %vm2563_vm0, %v3495_v32  ;;  %v2830_v45 = vmul.f32 %v1928_v24, %v1928_v24  ;;  %2572 = vst.msk [vmem:[%s4568_s21 + $0x20] sm:$0xf] %vm2563_vm0, %v3496_v37  ;;  %v3499_v46 = vpack.c.bf16 %v4797_v42, %v4797_v42  ;;  %v4835_v61 = vld [vmem:[#allocation2 + $0x90] sm:$0xff]  ;;  %v4845_v2 = vld [vmem:[#allocation2 + $0x98] sm:$0xff] }
 0x23c   : > { %v2955_v44 = vadd.f32 %v2954_v35, %v2828_v27  ;;  %2573 = vst.msk [vmem:[%s4568_s21 + $0x24] sm:$0xf] %vm2563_vm0, %v3497_v38  ;;  %v3500_v47 = vpack.c.bf16 %v4799_v43, %v4799_v43  ;;  %2574 = vst.msk [vmem:[%s4568_s21 + $0x28] sm:$0xf] %vm2563_vm0, %v3498_v41  ;;  %v3501_v50 = vpack.c.bf16 %v4809_v48, %v4809_v48  ;;  %v4851_v5 = vld [vmem:[#allocation2 + $0xa0] sm:$0xff]  ;;  %v4853_v6 = vld [vmem:[#allocation2 + $0xa8] sm:$0xff] }
 0x23d   : > { %v2696_v49 = vadd.f32 %v2695_v40, %v1928_v24  ;;  %v2831_v54 = vmul.f32 %v1929_v25, %v1929_v25  ;;  %2575 = vst.msk [vmem:[%s4568_s21 + $0x2c] sm:$0xf] %vm2563_vm0, %v3499_v46  ;;  %v3502_v55 = vpack.c.bf16 %v4815_v51, %v4815_v51  ;;  %v3503_v56 = vpack.c.bf16 %v4817_v52, %v4817_v52  ;;  %v4863_v11 = vld [vmem:[#allocation2 + $0xb0] sm:$0xff]  ;;  %v4869_v14 = vld [vmem:[#allocation2 + $0xb8] sm:$0xff]  ;;  %v4871_v15 = vld [vmem:[#allocation2 + $0xc0] sm:$0xff] }
 0x23e   : > { %v2956_v53 = vadd.f32 %v2955_v44, %v2829_v36  ;;  %2576 = vst.msk [vmem:[%s4568_s21 + $0x30] sm:$0xf] %vm2563_vm0, %v3500_v47  ;;  %2577 = vst.msk [vmem:[%s4568_s21 + $0x34] sm:$0xf] %vm2563_vm0, %v3501_v50  ;;  %v3504_v59 = vpack.c.bf16 %v4827_v57, %v4827_v57  ;;  %v2832_v63 = vmul.f32 %v1930_v30, %v1930_v30  ;;  %v4883_v20 = vld [vmem:[#allocation2 + $0xc8] sm:$0xff]  ;;  %v4890_v23 = vld [vmem:[#allocation2 + $0xd0] sm:$0xff] }
 0x23f   : > { %v2697_v58 = vadd.f32 %v2696_v49, %v1929_v25  ;;  %2578 = vst.msk [vmem:[%s4568_s21 + $0x38] sm:$0xf] %vm2563_vm0, %v3502_v55  ;;  %2579 = vst.msk [vmem:[%s4568_s21 + $0x3c] sm:$0xf] %vm2563_vm0, %v3503_v56  ;;  %v3505_v0 = vpack.c.bf16 %v4833_v60, %v4833_v60  ;;  %v3506_v1 = vpack.c.bf16 %v4835_v61, %v4835_v61  ;;  %v4892_v24 = vld [vmem:[#allocation2 + $0xd8] sm:$0xff]  ;;  %v4904_v29 = vld [vmem:[#allocation2 + $0xe0] sm:$0xff] }
 0x240   : > { %v2957_v62 = vadd.f32 %v2956_v53, %v2830_v45  ;;  %2580 = vst.msk [vmem:[%s4568_s21 + $0x40] sm:$0xf] %vm2563_vm0, %v3504_v59  ;;  %v3507_v4 = vpack.c.bf16 %v4845_v2, %v4845_v2  ;;  %v2833_v8 = vmul.f32 %v1931_v33, %v1931_v33  ;;  %v3508_v9 = vpack.c.bf16 %v4851_v5, %v4851_v5  ;;  %v4911_v32 = vld [vmem:[#allocation2 + $0xe8] sm:$0xff]  ;;  %v4925_v38 = vld [vmem:[#allocation2 + $0xf8] sm:$0xff]  ;;  %v4932_v41 = vld [vmem:[#allocation2 + $0x100] sm:$0xff] }
 0x241   : > { %v2698_v3 = vadd.f32 %v2697_v58, %v1930_v30  ;;  %2581 = vst.msk [vmem:[%s4568_s21 + $0x44] sm:$0xf] %vm2563_vm0, %v3505_v0  ;;  %2582 = vst.msk [vmem:[%s4568_s21 + $0x48] sm:$0xf] %vm2563_vm0, %v3506_v1  ;;  %v3509_v10 = vpack.c.bf16 %v4853_v6, %v4853_v6  ;;  %v3510_v13 = vpack.c.bf16 %v4863_v11, %v4863_v11  ;;  %v4934_v44 = vld [vmem:[#allocation2 + $0x108] sm:$0xff]  ;;  %v4946_v49 = vld [vmem:[#allocation2 + $0x110] sm:$0xff] }
 0x242   : > { %v2958_v7 = vadd.f32 %v2957_v62, %v2831_v54  ;;  %2583 = vst.msk [vmem:[%s4568_s21 + $0x4c] sm:$0xf] %vm2563_vm0, %v3507_v4  ;;  %v2834_v17 = vmul.f32 %v4783_v34, %v4783_v34  ;;  %2584 = vst.msk [vmem:[%s4568_s21 + $0x50] sm:$0xf] %vm2563_vm0, %v3508_v9  ;;  %v3511_v18 = vpack.c.bf16 %v4869_v14, %v4869_v14  ;;  %v4953_v54 = vld [vmem:[#allocation2 + $0x118] sm:$0xff]  ;;  %v4955_v55 = vld [vmem:[#allocation2 + $0x120] sm:$0xff] }
 0x243   : > { %v2699_v12 = vadd.f32 %v2698_v3, %v1931_v33  ;;  %2585 = vst.msk [vmem:[%s4568_s21 + $0x54] sm:$0xf] %vm2563_vm0, %v3509_v10  ;;  %v3512_v19 = vpack.c.bf16 %v4871_v15, %v4871_v15  ;;  %2586 = vst.msk [vmem:[%s4568_s21 + $0x58] sm:$0xf] %vm2563_vm0, %v3510_v13  ;;  %v3513_v22 = vpack.c.bf16 %v4883_v20, %v4883_v20  ;;  %v4913_v33 = vld [vmem:[#allocation2 + $0xf0] sm:$0xff]  ;;  %v4967_v62 = vld [vmem:[#allocation2 + $0x128] sm:$0xff] }
 0x244   : > { %v2959_v16 = vadd.f32 %v2958_v7, %v2832_v63  ;;  %v2835_v26 = vmul.f32 %v4791_v39, %v4791_v39  ;;  %2587 = vst.msk [vmem:[%s4568_s21 + $0x5c] sm:$0xf] %vm2563_vm0, %v3511_v18  ;;  %v3514_v27 = vpack.c.bf16 %v4890_v23, %v4890_v23  ;;  %v3515_v28 = vpack.c.bf16 %v4892_v24, %v4892_v24  ;;  %v4974_v1 = vld [vmem:[#allocation2 + $0x130] sm:$0xff]  ;;  %v4976_v3 = vld [vmem:[#allocation2 + $0x138] sm:$0xff]  ;;  %v4988_v9 = vld [vmem:[#allocation2 + $0x140] sm:$0xff] }
 0x245   : > { %v2700_v21 = vadd.f32 %v2699_v12, %v4783_v34  ;;  %2588 = vst.msk [vmem:[%s4568_s21 + $0x60] sm:$0xf] %vm2563_vm0, %v3512_v19  ;;  %2589 = vst.msk [vmem:[%s4568_s21 + $0x64] sm:$0xf] %vm2563_vm0, %v3513_v22  ;;  %v3516_v31 = vpack.c.bf16 %v4904_v29, %v4904_v29  ;;  %v2836_v35 = vmul.f32 %v4797_v42, %v4797_v42  ;;  %v4995_v13 = vld [vmem:[#allocation2 + $0x148] sm:$0xff] }
 0x246   : > { %v2960_v25 = vadd.f32 %v2959_v16, %v2833_v8  ;;  %2590 = vst.msk [vmem:[%s4568_s21 + $0x68] sm:$0xf] %vm2563_vm0, %v3514_v27  ;;  %2591 = vst.msk [vmem:[%s4568_s21 + $0x6c] sm:$0xf] %vm2563_vm0, %v3515_v28  ;;  %v3517_v36 = vpack.c.bf16 %v4911_v32, %v4911_v32  ;;  %v3518_v37 = vpack.c.bf16 %v4913_v33, %v4913_v33  ;;  %v4997_v16 = vld [vmem:[#allocation2 + $0x150] sm:$0xff]  ;;  %v5018_v27 = vld [vmem:[#allocation2 + $0x168] sm:$0xff] }
 0x247   : > { %v2701_v30 = vadd.f32 %v2700_v21, %v4791_v39  ;;  %2592 = vst.msk [vmem:[%s4568_s21 + $0x70] sm:$0xf] %vm2563_vm0, %v3516_v31  ;;  %v3519_v40 = vpack.c.bf16 %v4925_v38, %v4925_v38  ;;  %v2837_v46 = vmul.f32 %v4799_v43, %v4799_v43  ;;  %v3521_v47 = vpack.c.bf16 %v4934_v44, %v4934_v44  ;;  %v5009_v21 = vld [vmem:[#allocation2 + $0x158] sm:$0xff] }
 0x248   : > { %v2961_v34 = vadd.f32 %v2960_v25, %v2834_v17  ;;  %2593 = vst.msk [vmem:[%s4568_s21 + $0x74] sm:$0xf] %vm2563_vm0, %v3517_v36  ;;  %2594 = vst.msk [vmem:[%s4568_s21 + $0x78] sm:$0xf] %vm2563_vm0, %v3518_v37  ;;  %v3522_v53 = vpack.c.bf16 %v4946_v49, %v4946_v49  ;;  %v2838_v58 = vmul.f32 %v4809_v48, %v4809_v48  ;;  %v5037_v37 = vld [vmem:[#allocation2 + $0x178] sm:$0xff] }
 0x249   : > { %v2702_v39 = vadd.f32 %v2701_v30, %v4797_v42  ;;  %v3520_v42 = vpack.c.bf16 %v4932_v41, %v4932_v41  ;;  %2595 = vst.msk [vmem:[%s4568_s21 + $0x7c] sm:$0xf] %vm2563_vm0, %v3519_v40  ;;  %2597 = vst.msk [vmem:[%s4568_s21 + $0x84] sm:$0xf] %vm2563_vm0, %v3521_v47  ;;  %v3524_v59 = vpack.c.bf16 %v4955_v55, %v4955_v55 }
 0x24a   : > { %v2962_v45 = vadd.f32 %v2961_v34, %v2835_v26  ;;  %2598 = vst.msk [vmem:[%s4568_s21 + $0x88] sm:$0xf] %vm2563_vm0, %v3522_v53  ;;  %v3525_v0 = vpack.c.bf16 %v4967_v62, %v4967_v62  ;;  %v2839_v7 = vmul.f32 %v4815_v51, %v4815_v51  ;;  %v3527_v8 = vpack.c.bf16 %v4976_v3, %v4976_v3  ;;  %v5016_v26 = vld [vmem:[#allocation2 + $0x160] sm:$0xff]  ;;  %v5030_v34 = vld [vmem:[#allocation2 + $0x170] sm:$0xff] }
 0x24b   : > { %v2703_v50 = vadd.f32 %v2702_v39, %v4799_v43  ;;  %2596 = vst.msk [vmem:[%s4568_s21 + $0x80] sm:$0xf] %vm2563_vm0, %v3520_v42  ;;  %v3523_v43 = vpack.c.bf16 %v4953_v54, %v4953_v54  ;;  %2600 = vst.msk [vmem:[%s4568_s21 + $0x90] sm:$0xf] %vm2563_vm0, %v3524_v59  ;;  %v3528_v12 = vpack.c.bf16 %v4988_v9, %v4988_v9  ;;  %v5039_v39 = vld [vmem:[#allocation2 + $0x180] sm:$0xff]  ;;  %v5051_v42 = vld [vmem:[#allocation2 + $0x188] sm:$0xff] }
 0x24c   : > { %v2963_v56 = vadd.f32 %v2962_v45, %v2836_v35  ;;  %2601 = vst.msk [vmem:[%s4568_s21 + $0x94] sm:$0xf] %vm2563_vm0, %v3525_v0  ;;  %v2840_v18 = vmul.f32 %v4817_v52, %v4817_v52  ;;  %2603 = vst.msk [vmem:[%s4568_s21 + $0x9c] sm:$0xf] %vm2563_vm0, %v3527_v8  ;;  %v3530_v19 = vpack.c.bf16 %v4997_v16, %v4997_v16  ;;  %v5058_v53 = vld [vmem:[#allocation2 + $0x190] sm:$0xff] }
 0x24d   : > { %v2704_v63 = vadd.f32 %v2703_v50, %v4809_v48  ;;  %2599 = vst.msk [vmem:[%s4568_s21 + $0x8c] sm:$0xf] %vm2563_vm0, %v3523_v43  ;;  %v3526_v48 = vpack.c.bf16 %v4974_v1, %v4974_v1  ;;  %2604 = vst.msk [vmem:[%s4568_s21 + $0xa0] sm:$0xf] %vm2563_vm0, %v3528_v12  ;;  %v3531_v25 = vpack.c.bf16 %v5009_v21, %v5009_v21 }
 0x24e   : > { %v2964_v4 = vadd.f32 %v2963_v56, %v2837_v46  ;;  %v2841_v30 = vmul.f32 %v4827_v57, %v4827_v57  ;;  %2606 = vst.msk [vmem:[%s4568_s21 + $0xa8] sm:$0xf] %vm2563_vm0, %v3530_v19  ;;  %v3533_v31 = vpack.c.bf16 %v5018_v27, %v5018_v27  ;;  %v3534_v36 = vpack.c.bf16 %v5030_v34, %v5030_v34  ;;  %v5060_v56 = vld [vmem:[#allocation2 + $0x198] sm:$0xff]  ;;  %v5100_v19 = vld [vmem:[#allocation2 + $0x1c0] sm:$0xff] }
 0x24f   : > { %v2705_v10 = vadd.f32 %v2704_v63, %v4815_v51  ;;  %2602 = vst.msk [vmem:[%s4568_s21 + $0x98] sm:$0xf] %vm2563_vm0, %v3526_v48  ;;  %v3529_v51 = vpack.c.bf16 %v4995_v13, %v4995_v13  ;;  %2607 = vst.msk [vmem:[%s4568_s21 + $0xac] sm:$0xf] %vm2563_vm0, %v3531_v25  ;;  %v2842_v45 = vmul.f32 %v4833_v60, %v4833_v60  ;;  %v5072_v63 = vld [vmem:[#allocation2 + $0x1a0] sm:$0xff]  ;;  %v5081_v48 = vld [vmem:[#allocation2 + $0x1b0] sm:$0xff] }
 0x250   : > { %v2965_v17 = vadd.f32 %v2964_v4, %v2838_v58  ;;  %2609 = vst.msk [vmem:[%s4568_s21 + $0xb4] sm:$0xf] %vm2563_vm0, %v3533_v31  ;;  %v3536_v46 = vpack.c.bf16 %v5039_v39, %v5039_v39  ;;  %2610 = vst.msk [vmem:[%s4568_s21 + $0xb8] sm:$0xf] %vm2563_vm0, %v3534_v36  ;;  %v3537_v50 = vpack.c.bf16 %v5051_v42, %v5051_v42  ;;  %v5121_v36 = vld [vmem:[#allocation2 + $0x1d8] sm:$0xff] }
 0x251   : > { %v2706_v22 = vadd.f32 %v2705_v10, %v4817_v52  ;;  %2605 = vst.msk [vmem:[%s4568_s21 + $0xa4] sm:$0xf] %vm2563_vm0, %v3529_v51  ;;  %v3532_v52 = vpack.c.bf16 %v5016_v26, %v5016_v26  ;;  %v2843_v43 = vmul.f32 %v4835_v61, %v4835_v61  ;;  %v3539_v59 = vpack.c.bf16 %v5060_v56, %v5060_v56 }
 0x252   : > { %v2966_v28 = vadd.f32 %v2965_v17, %v2839_v7  ;;  %2612 = vst.msk [vmem:[%s4568_s21 + $0xc0] sm:$0xf] %vm2563_vm0, %v3536_v46  ;;  %2613 = vst.msk [vmem:[%s4568_s21 + $0xc4] sm:$0xf] %vm2563_vm0, %v3537_v50  ;;  %v3540_v4 = vpack.c.bf16 %v5072_v63, %v5072_v63  ;;  %v5079_v7 = vld [vmem:[#allocation2 + $0x1a8] sm:$0xff]  ;;  %v2844_v10 = vmul.f32 %v4845_v2, %v4845_v2  ;;  %v5093_v17 = vld [vmem:[#allocation2 + $0x1b8] sm:$0xff] }
 0x253   : > { %v2707_v35 = vadd.f32 %v2706_v22, %v4827_v57  ;;  %2608 = vst.msk [vmem:[%s4568_s21 + $0xb0] sm:$0xf] %vm2563_vm0, %v3532_v52  ;;  %v3535_v57 = vpack.c.bf16 %v5037_v37, %v5037_v37  ;;  %2615 = vst.msk [vmem:[%s4568_s21 + $0xcc] sm:$0xf] %vm2563_vm0, %v3539_v59  ;;  %v3542_v12 = vpack.c.bf16 %v5081_v48, %v5081_v48  ;;  %v5102_v22 = vld [vmem:[#allocation2 + $0x1c8] sm:$0xff]  ;;  %v5114_v52 = vld [vmem:[#allocation2 + $0x1d0] sm:$0xff] }
 0x254   : > { %v2967_v40 = vadd.f32 %v2966_v28, %v2840_v18  ;;  %2616 = vst.msk [vmem:[%s4568_s21 + $0xd0] sm:$0xf] %vm2563_vm0, %v3540_v4  ;;  %v3543_v51 = vpack.c.bf16 %v5093_v17, %v5093_v17  ;;  %v2845_v28 = vmul.f32 %v4851_v5, %v4851_v5 }
 0x255   : > { %v2708_v47 = vadd.f32 %v2707_v35, %v4833_v60  ;;  %2611 = vst.msk [vmem:[%s4568_s21 + $0xbc] sm:$0xf] %vm2563_vm0, %v3535_v57  ;;  %v3538_v60 = vpack.c.bf16 %v5058_v53, %v5058_v53  ;;  %2618 = vst.msk [vmem:[%s4568_s21 + $0xd8] sm:$0xf] %vm2563_vm0, %v3542_v12  ;;  %v3546_v35 = vpack.c.bf16 %v5114_v52, %v5114_v52  ;;  %v5163_v12 = vld [vmem:[#allocation2 + $0x208] sm:$0xff] }
 0x256   : > { %v2968_v58 = vadd.f32 %v2967_v40, %v2841_v30  ;;  %v3545_v30 = vpack.c.bf16 %v5102_v22, %v5102_v22  ;;  %2619 = vst.msk [vmem:[%s4568_s21 + $0xdc] sm:$0xf] %vm2563_vm0, %v3543_v51  ;;  %v5123_v40 = vld [vmem:[#allocation2 + $0x1e0] sm:$0xff]  ;;  %v2846_v57 = vmul.f32 %v4853_v6, %v4853_v6 }
 0x257   : > { %v2709_v0 = vadd.f32 %v2708_v47, %v4835_v61  ;;  %2614 = vst.msk [vmem:[%s4568_s21 + $0xc8] sm:$0xf] %vm2563_vm0, %v3538_v60  ;;  %v3541_v61 = vpack.c.bf16 %v5079_v7, %v5079_v7  ;;  %v3548_v46 = vpack.c.bf16 %v5123_v40, %v5123_v40  ;;  %v5135_v47 = vld [vmem:[#allocation2 + $0x1e8] sm:$0xff]  ;;  %2622 = vst.msk [vmem:[%s4568_s21 + $0xe8] sm:$0xf] %vm2563_vm0, %v3546_v35  ;;  %v5144_v60 = vld [vmem:[#allocation2 + $0x1f8] sm:$0xff] }
 0x258   : > { %v2969_v8 = vadd.f32 %v2968_v58, %v2842_v45  ;;  %2621 = vst.msk [vmem:[%s4568_s21 + $0xe4] sm:$0xf] %vm2563_vm0, %v3545_v30  ;;  %v3549_v58 = vpack.c.bf16 %v5135_v47, %v5135_v47  ;;  %v3551_v4 = vpack.c.bf16 %v5144_v60, %v5144_v60  ;;  %v5184_v35 = vld [vmem:[#allocation2 + $0x220] sm:$0xff] }
 0x259   : > { %v2710_v18 = vadd.f32 %v2709_v0, %v4845_v2  ;;  %2617 = vst.msk [vmem:[%s4568_s21 + $0xd4] sm:$0xf] %vm2563_vm0, %v3541_v61  ;;  %v3544_v2 = vpack.c.bf16 %v5100_v19, %v5100_v19  ;;  %v2847_v0 = vmul.f32 %v4863_v11, %v4863_v11  ;;  %2624 = vst.msk [vmem:[%s4568_s21 + $0xf0] sm:$0xf] %vm2563_vm0, %v3548_v46 }
 0x25a   : > { %v2970_v25 = vadd.f32 %v2969_v8, %v2843_v43  ;;  %v5142_v43 = vld [vmem:[#allocation2 + $0x1f0] sm:$0xff]  ;;  %v5156_v8 = vld [vmem:[#allocation2 + $0x200] sm:$0xff]  ;;  %2625 = vst.msk [vmem:[%s4568_s21 + $0xf4] sm:$0xf] %vm2563_vm0, %v3549_v58  ;;  %2627 = vst.msk [vmem:[%s4568_s21 + $0xfc] sm:$0xf] %vm2563_vm0, %v3551_v4 }
 0x25b   : > { %v2711_v31 = vadd.f32 %v2710_v18, %v4851_v5  ;;  %2620 = vst.msk [vmem:[%s4568_s21 + $0xe0] sm:$0xf] %vm2563_vm0, %v3544_v2  ;;  %v3547_v5 = vpack.c.bf16 %v5121_v36, %v5121_v36  ;;  %v3552_v61 = vpack.c.bf16 %v5156_v8, %v5156_v8  ;;  %v5165_v18 = vld [vmem:[#allocation2 + $0x210] sm:$0xff]  ;;  %v5177_v2 = vld [vmem:[#allocation2 + $0x218] sm:$0xff] }
 0x25c   : > { %v2971_v45 = vadd.f32 %v2970_v25, %v2844_v10  ;;  %v2848_v25 = vmul.f32 %v4869_v14, %v4869_v14 }
 0x25d   : > { %v2712_v50 = vadd.f32 %v2711_v31, %v4853_v6  ;;  %2623 = vst.msk [vmem:[%s4568_s21 + $0xec] sm:$0xf] %vm2563_vm0, %v3547_v5  ;;  %v3550_v6 = vpack.c.bf16 %v5142_v43, %v5142_v43  ;;  %2628 = vst.msk [vmem:[%s4568_s21 + $0x100] sm:$0xf] %vm2563_vm0, %v3552_v61  ;;  %v3555_v31 = vpack.c.bf16 %v5177_v2, %v5177_v2 }
 0x25e   : > { %v2972_v59 = vadd.f32 %v2971_v45, %v2845_v28  ;;  %v3554_v28 = vpack.c.bf16 %v5165_v18, %v5165_v18  ;;  %v5186_v45 = vld [vmem:[#allocation2 + $0x228] sm:$0xff]  ;;  %v2849_v5 = vmul.f32 %v4871_v15, %v4871_v15 }
 0x25f   : > { %v2713_v10 = vadd.f32 %v2712_v50, %v4863_v11  ;;  %2626 = vst.msk [vmem:[%s4568_s21 + $0xf8] sm:$0xf] %vm2563_vm0, %v3550_v6  ;;  %v3553_v11 = vpack.c.bf16 %v5163_v12, %v5163_v12  ;;  %v3557_v46 = vpack.c.bf16 %v5186_v45, %v5186_v45  ;;  %v5198_v50 = vld [vmem:[#allocation2 + $0x230] sm:$0xff]  ;;  %2631 = vst.msk [vmem:[%s4568_s21 + $0x10c] sm:$0xf] %vm2563_vm0, %v3555_v31  ;;  %v5207_v6 = vld [vmem:[#allocation2 + $0x240] sm:$0xff] }
 0x260   : > { %v2973_v51 = vadd.f32 %v2972_v59, %v2846_v57  ;;  %2630 = vst.msk [vmem:[%s4568_s21 + $0x108] sm:$0xf] %vm2563_vm0, %v3554_v28  ;;  %v3558_v59 = vpack.c.bf16 %v5198_v50, %v5198_v50  ;;  %v3560_v61 = vpack.c.bf16 %v5207_v6, %v5207_v6  ;;  %v5226_v28 = vld [vmem:[#allocation2 + $0x250] sm:$0xff] }
 0x261   : > { %v2714_v30 = vadd.f32 %v2713_v10, %v4869_v14  ;;  %2629 = vst.msk [vmem:[%s4568_s21 + $0x104] sm:$0xf] %vm2563_vm0, %v3553_v11  ;;  %v3556_v14 = vpack.c.bf16 %v5184_v35, %v5184_v35  ;;  %v2850_v10 = vmul.f32 %v4883_v20, %v4883_v20  ;;  %2633 = vst.msk [vmem:[%s4568_s21 + $0x114] sm:$0xf] %vm2563_vm0, %v3557_v46  ;;  %v5240_v46 = vld [vmem:[#allocation2 + $0x260] sm:$0xff] }
 0x262   : > { %v2974_v57 = vadd.f32 %v2973_v51, %v2847_v0  ;;  %v5205_v0 = vld [vmem:[#allocation2 + $0x238] sm:$0xff]  ;;  %v5219_v51 = vld [vmem:[#allocation2 + $0x248] sm:$0xff]  ;;  %2634 = vst.msk [vmem:[%s4568_s21 + $0x118] sm:$0xf] %vm2563_vm0, %v3558_v59  ;;  %2636 = vst.msk [vmem:[%s4568_s21 + $0x120] sm:$0xf] %vm2563_vm0, %v3560_v61  ;;  %v2852_v61 = vmul.f32 %v4892_v24, %v4892_v24 }
 0x263   : > { %v2715_v58 = vadd.f32 %v2714_v30, %v4871_v15  ;;  %2632 = vst.msk [vmem:[%s4568_s21 + $0x110] sm:$0xf] %vm2563_vm0, %v3556_v14  ;;  %v3559_v15 = vpack.c.bf16 %v5205_v0, %v5205_v0  ;;  %v5228_v30 = vld [vmem:[#allocation2 + $0x258] sm:$0xff]  ;;  %6015 = vst [vmem:[#allocation17_spill] sm:$0xff] %v5240_v46  ;;  %v5247_v59 = vld [vmem:[#allocation2 + $0x268] sm:$0xff] }
 0x264   : > { %v2975_v4 = vadd.f32 %v2974_v57, %v2848_v25  ;;  %v3561_v25 = vpack.c.bf16 %v5219_v51, %v5219_v51  ;;  %v2851_v57 = vmul.f32 %v4890_v23, %v4890_v23  ;;  %v3563_v14 = vpack.c.bf16 %v5228_v30, %v5228_v30  ;;  %6016 = vst [vmem:[#allocation18_spill] sm:$0xff] %v5247_v59 }
 0x265   : > { %v2716_v11 = vadd.f32 %v2715_v58, %v4883_v20  ;;  %2635 = vst.msk [vmem:[%s4568_s21 + $0x11c] sm:$0xf] %vm2563_vm0, %v3559_v15  ;;  %v3562_v20 = vpack.c.bf16 %v5226_v28, %v5226_v28 }
 0x266   : > { %v2976_v31 = vadd.f32 %v2975_v4, %v2849_v5  ;;  %2637 = vst.msk [vmem:[%s4568_s21 + $0x124] sm:$0xf] %vm2563_vm0, %v3561_v25  ;;  %v3564_v5 = vpack.c.bf16 %v5240_v46, %v5240_v46  ;;  %v5249_v4 = vld [vmem:[#allocation2 + $0x270] sm:$0xff]  ;;  %2639 = vst.msk [vmem:[%s4568_s21 + $0x12c] sm:$0xf] %vm2563_vm0, %v3563_v14  ;;  %v5261_v25 = vld [vmem:[#allocation2 + $0x278] sm:$0xff] }
 0x267   : > { %v2717_v58 = vadd.f32 %v2716_v11, %v4890_v23  ;;  %2638 = vst.msk [vmem:[%s4568_s21 + $0x128] sm:$0xf] %vm2563_vm0, %v3562_v20  ;;  %v3565_v23 = vpack.c.bf16 %v5247_v59, %v5247_v59  ;;  %v3566_v11 = vpack.c.bf16 %v5249_v4, %v5249_v4  ;;  %6017 = vst [vmem:[#allocation19_spill] sm:$0xff] %v5261_v25  ;;  %v5270_v20 = vld [vmem:[#allocation2 + $0x288] sm:$0xff] }
 0x268   : > { %v2977_v15 = vadd.f32 %v2976_v31, %v2850_v10  ;;  %2640 = vst.msk [vmem:[%s4568_s21 + $0x130] sm:$0xf] %vm2563_vm0, %v3564_v5  ;;  %v3567_v10 = vpack.c.bf16 %v5261_v25, %v5261_v25  ;;  %v5268_v31 = vld [vmem:[#allocation2 + $0x280] sm:$0xff]  ;;  %v2853_v59 = vmul.f32 %v4904_v29, %v4904_v29  ;;  %v5282_v5 = vld [vmem:[#allocation2 + $0x290] sm:$0xff] }
 0x269   : > { %v2718_v46 = vadd.f32 %v2717_v58, %v4892_v24  ;;  %6018 = vst [vmem:[#allocation20_spill] sm:$0xff] %v5268_v31  ;;  %2641 = vst.msk [vmem:[%s4568_s21 + $0x134] sm:$0xf] %vm2563_vm0, %v3565_v23  ;;  %v3568_v24 = vpack.c.bf16 %v5268_v31, %v5268_v31  ;;  %v3569_v58 = vpack.c.bf16 %v5270_v20, %v5270_v20  ;;  %v5291_v23 = vld [vmem:[#allocation2 + $0x2a0] sm:$0xff] }
 0x26a   : > { %v2978_v14 = vadd.f32 %v2977_v15, %v2851_v57  ;;  %2642 = vst.msk [vmem:[%s4568_s21 + $0x138] sm:$0xf] %vm2563_vm0, %v3566_v11  ;;  %6019 = vst [vmem:[#allocation21_spill] sm:$0xff] %v5282_v5  ;;  %v3570_v57 = vpack.c.bf16 %v5282_v5, %v5282_v5  ;;  %v5289_v15 = vld [vmem:[#allocation2 + $0x298] sm:$0xff]  ;;  %v2854_v31 = vmul.f32 %v4911_v32, %v4911_v32 }
 0x26b   : > { %v2719_v25 = vadd.f32 %v2718_v46, %v4904_v29  ;;  %2643 = vst.msk [vmem:[%s4568_s21 + $0x13c] sm:$0xf] %vm2563_vm0, %v3567_v10  ;;  %6020 = vst [vmem:[#allocation22_spill] sm:$0xff] %v5289_v15  ;;  %v3571_v29 = vpack.c.bf16 %v5289_v15, %v5289_v15  ;;  %v3572_v46 = vpack.c.bf16 %v5291_v23, %v5291_v23  ;;  %v5303_v10 = vld [vmem:[#allocation2 + $0x2a8] sm:$0xff] }
 0x26c   : > { %v2979_v11 = vadd.f32 %v2978_v14, %v2852_v61  ;;  %2644 = vst.msk [vmem:[%s4568_s21 + $0x140] sm:$0xf] %vm2563_vm0, %v3568_v24  ;;  %2645 = vst.msk [vmem:[%s4568_s21 + $0x144] sm:$0xf] %vm2563_vm0, %v3569_v58  ;;  %v3573_v61 = vpack.c.bf16 %v5303_v10, %v5303_v10  ;;  %v5310_v14 = vld [vmem:[#allocation2 + $0x2b0] sm:$0xff]  ;;  %v5312_v24 = vld [vmem:[#allocation2 + $0x2b8] sm:$0xff]  ;;  %v2855_v15 = vmul.f32 %v4913_v33, %v4913_v33 }
 0x26d   : > { %6021 = vst [vmem:[#allocation23_spill] sm:$0xff] %v5303_v10  ;;  %v2720_v5 = vadd.f32 %v2719_v25, %v4911_v32  ;;  %2646 = vst.msk [vmem:[%s4568_s21 + $0x148] sm:$0xf] %vm2563_vm0, %v3570_v57  ;;  %v3574_v32 = vpack.c.bf16 %v5310_v14, %v5310_v14  ;;  %v3575_v25 = vpack.c.bf16 %v5312_v24, %v5312_v24  ;;  %v5324_v57 = vld [vmem:[#allocation2 + $0x2c0] sm:$0xff] }
 0x26e   : > { %6022 = vst [vmem:[#allocation24_spill] sm:$0xff] %v5310_v14  ;;  %v2980_v58 = vadd.f32 %v2979_v11, %v2853_v59  ;;  %2647 = vst.msk [vmem:[%s4568_s21 + $0x14c] sm:$0xf] %vm2563_vm0, %v3571_v29  ;;  %v3576_v59 = vpack.c.bf16 %v5324_v57, %v5324_v57  ;;  %v5331_v11 = vld [vmem:[#allocation2 + $0x2c8] sm:$0xff]  ;;  %v5333_v29 = vld [vmem:[#allocation2 + $0x2d0] sm:$0xff]  ;;  %v2856_v14 = vmul.f32 %v4925_v38, %v4925_v38 }
 0x26f   : > { %2648 = vst.msk [vmem:[%s4568_s21 + $0x150] sm:$0xf] %vm2563_vm0, %v3572_v46  ;;  %6023 = vst [vmem:[#allocation25_spill] sm:$0xff] %v5324_v57  ;;  %v2721_v10 = vadd.f32 %v2720_v5, %v4913_v33  ;;  %v3577_v33 = vpack.c.bf16 %v5331_v11, %v5331_v11  ;;  %v3578_v5 = vpack.c.bf16 %v5333_v29, %v5333_v29 }
 0x270   : > { %2649 = vst.msk [vmem:[%s4568_s21 + $0x154] sm:$0xf] %vm2563_vm0, %v3573_v61  ;;  %6024 = vst [vmem:[#allocation26_spill] sm:$0xff] %v5331_v11  ;;  %v2981_v46 = vadd.f32 %v2980_v58, %v2854_v31  ;;  %v5345_v61 = vld [vmem:[#allocation2 + $0x2d8] sm:$0xff]  ;;  %v5352_v58 = vld [vmem:[#allocation2 + $0x2e0] sm:$0xff]  ;;  %v2857_v11 = vmul.f32 %v4932_v41, %v4932_v41 }
 0x271   : > { %2650 = vst.msk [vmem:[%s4568_s21 + $0x158] sm:$0xf] %vm2563_vm0, %v3574_v32  ;;  %2651 = vst.msk [vmem:[%s4568_s21 + $0x15c] sm:$0xf] %vm2563_vm0, %v3575_v25  ;;  %v2722_v57 = vadd.f32 %v2721_v10, %v4925_v38  ;;  %v3579_v31 = vpack.c.bf16 %v5345_v61, %v5345_v61  ;;  %v5354_v32 = vld [vmem:[#allocation2 + $0x2e8] sm:$0xff]  ;;  %v3580_v38 = vpack.c.bf16 %v5352_v58, %v5352_v58 }
 0x272   : > { %6025 = vst [vmem:[#allocation27_spill] sm:$0xff] %v5345_v61  ;;  %2652 = vst.msk [vmem:[%s4568_s21 + $0x160] sm:$0xf] %vm2563_vm0, %v3576_v59  ;;  %v2982_v25 = vadd.f32 %v2981_v46, %v2855_v15  ;;  %v3581_v10 = vpack.c.bf16 %v5354_v32, %v5354_v32  ;;  %v5366_v59 = vld [vmem:[#allocation2 + $0x2f0] sm:$0xff]  ;;  %v5373_v46 = vld [vmem:[#allocation2 + $0x2f8] sm:$0xff] }
 0x273   : > { %6026 = vst [vmem:[#allocation28_spill] sm:$0xff] %v5352_v58  ;;  %2653 = vst.msk [vmem:[%s4568_s21 + $0x164] sm:$0xf] %vm2563_vm0, %v3577_v33  ;;  %v2723_v61 = vadd.f32 %v2722_v57, %v4932_v41  ;;  %v3582_v15 = vpack.c.bf16 %v5366_v59, %v5366_v59  ;;  %v5375_v33 = vld [vmem:[#allocation2 + $0x300] sm:$0xff]  ;;  %v2858_v58 = vmul.f32 %v4934_v44, %v4934_v44 }
 0x274   : > { %2654 = vst.msk [vmem:[%s4568_s21 + $0x168] sm:$0xf] %vm2563_vm0, %v3578_v5  ;;  %6027 = vst [vmem:[#allocation29_spill] sm:$0xff] %v5366_v59  ;;  %v2983_v5 = vadd.f32 %v2982_v25, %v2856_v14  ;;  %v3583_v41 = vpack.c.bf16 %v5373_v46, %v5373_v46  ;;  %v3584_v57 = vpack.c.bf16 %v5375_v33, %v5375_v33  ;;  %v5390_v59 = vld [vmem:[#allocation2 + $0x308] sm:$0xff] }
 0x275   : > { %2655 = vst.msk [vmem:[%s4568_s21 + $0x16c] sm:$0xf] %vm2563_vm0, %v3579_v31  ;;  %2656 = vst.msk [vmem:[%s4568_s21 + $0x170] sm:$0xf] %vm2563_vm0, %v3580_v38  ;;  %v2724_v31 = vadd.f32 %v2723_v61, %v4934_v44  ;;  %v2859_v25 = vmul.f32 %v4946_v49, %v4946_v49  ;;  %v3585_v38 = vpack.c.bf16 %v5390_v59, %v5390_v59  ;;  %v5401_v44 = vld [vmem:[#allocation2 + $0x310] sm:$0xff] }
 0x276   : > { %2657 = vst.msk [vmem:[%s4568_s21 + $0x174] sm:$0xf] %vm2563_vm0, %v3581_v10  ;;  %2658 = vst.msk [vmem:[%s4568_s21 + $0x178] sm:$0xf] %vm2563_vm0, %v3582_v15  ;;  %v2984_v14 = vadd.f32 %v2983_v5, %v2857_v11  ;;  %v2860_v15 = vmul.f32 %v4953_v54, %v4953_v54  ;;  %v3586_v11 = vpack.c.bf16 %v5401_v44, %v5401_v44 }
 0x277   : > { %2659 = vst.msk [vmem:[%s4568_s21 + $0x17c] sm:$0xf] %vm2563_vm0, %v3583_v41  ;;  %2660 = vst.msk [vmem:[%s4568_s21 + $0x180] sm:$0xf] %vm2563_vm0, %v3584_v57  ;;  %v2725_v10 = vadd.f32 %v2724_v31, %v4946_v49  ;;  %v5410_v41 = vld [vmem:[#allocation2 + $0x318] sm:$0xff]  ;;  %v2861_v49 = vmul.f32 %v4955_v55, %v4955_v55 }
 0x278   : > { %v2985_v61 = vadd.f32 %v2984_v14, %v2858_v58  ;;  %2661 = vst.msk [vmem:[%s4568_s21 + $0x184] sm:$0xf] %vm2563_vm0, %v3585_v38  ;;  %2662 = vst.msk [vmem:[%s4568_s21 + $0x188] sm:$0xf] %vm2563_vm0, %v3586_v11  ;;  %v3587_v58 = vpack.c.bf16 %v5410_v41, %v5410_v41  ;;  %v5419_v14 = vld [vmem:[#allocation2 + $0x320] sm:$0xff] }
 0x279   : > { %v2726_v5 = vadd.f32 %v2725_v10, %v4953_v54  ;;  %v2862_v54 = vmul.f32 %v4967_v62, %v4967_v62 }
 0x27a   : > { %v2986_v57 = vadd.f32 %v2985_v61, %v2859_v25  ;;  %2663 = vst.msk [vmem:[%s4568_s21 + $0x18c] sm:$0xf] %vm2563_vm0, %v3587_v58  ;;  %v3588_v25 = vpack.c.bf16 %v5419_v14, %v5419_v14  ;;  %v5428_v61 = vld [vmem:[#allocation2 + $0x328] sm:$0xff] }
 0x27b   : > { %v2727_v31 = vadd.f32 %v2726_v5, %v4955_v55  ;;  %v2863_v55 = vmul.f32 %v4974_v1, %v4974_v1 }
 0x27c   : > { %v2987_v38 = vadd.f32 %v2986_v57, %v2860_v15  ;;  %2664 = vst.msk [vmem:[%s4568_s21 + $0x190] sm:$0xf] %vm2563_vm0, %v3588_v25  ;;  %v3589_v15 = vpack.c.bf16 %v5428_v61, %v5428_v61  ;;  %v5437_v57 = vld [vmem:[#allocation2 + $0x330] sm:$0xff] }
 0x27d   : > { %v2728_v10 = vadd.f32 %v2727_v31, %v4967_v62  ;;  %v2864_v62 = vmul.f32 %v4976_v3, %v4976_v3 }
 0x27e   : > { %v2988_v11 = vadd.f32 %v2987_v38, %v2861_v49  ;;  %2665 = vst.msk [vmem:[%s4568_s21 + $0x194] sm:$0xf] %vm2563_vm0, %v3589_v15  ;;  %v3590_v49 = vpack.c.bf16 %v5437_v57, %v5437_v57  ;;  %v5446_v38 = vld [vmem:[#allocation2 + $0x338] sm:$0xff] }
 0x27f   : > { %v2729_v5 = vadd.f32 %v2728_v10, %v4974_v1  ;;  %v2865_v1 = vmul.f32 %v4988_v9, %v4988_v9 }
 0x280   : > { %v2989_v58 = vadd.f32 %v2988_v11, %v2862_v54  ;;  %2666 = vst.msk [vmem:[%s4568_s21 + $0x198] sm:$0xf] %vm2563_vm0, %v3590_v49  ;;  %v3591_v54 = vpack.c.bf16 %v5446_v38, %v5446_v38  ;;  %v5455_v11 = vld [vmem:[#allocation2 + $0x340] sm:$0xff] }
 0x281   : > { %v2730_v31 = vadd.f32 %v2729_v5, %v4976_v3  ;;  %v2866_v3 = vmul.f32 %v4995_v13, %v4995_v13 }
 0x282   : > { %v2990_v25 = vadd.f32 %v2989_v58, %v2863_v55  ;;  %2667 = vst.msk [vmem:[%s4568_s21 + $0x19c] sm:$0xf] %vm2563_vm0, %v3591_v54  ;;  %v3592_v55 = vpack.c.bf16 %v5455_v11, %v5455_v11  ;;  %v5464_v58 = vld [vmem:[#allocation2 + $0x348] sm:$0xff] }
 0x283   : > { %v2731_v10 = vadd.f32 %v2730_v31, %v4988_v9  ;;  %v2867_v9 = vmul.f32 %v4997_v16, %v4997_v16 }
 0x284   : > { %v2991_v15 = vadd.f32 %v2990_v25, %v2864_v62  ;;  %2668 = vst.msk [vmem:[%s4568_s21 + $0x1a0] sm:$0xf] %vm2563_vm0, %v3592_v55  ;;  %v3593_v62 = vpack.c.bf16 %v5464_v58, %v5464_v58  ;;  %v5473_v25 = vld [vmem:[#allocation2 + $0x350] sm:$0xff] }
 0x285   : > { %v2732_v5 = vadd.f32 %v2731_v10, %v4995_v13  ;;  %v2868_v13 = vmul.f32 %v5009_v21, %v5009_v21 }
 0x286   : > { %v2992_v49 = vadd.f32 %v2991_v15, %v2865_v1  ;;  %2669 = vst.msk [vmem:[%s4568_s21 + $0x1a4] sm:$0xf] %vm2563_vm0, %v3593_v62  ;;  %v3594_v1 = vpack.c.bf16 %v5473_v25, %v5473_v25  ;;  %v5482_v15 = vld [vmem:[#allocation2 + $0x358] sm:$0xff] }
 0x287   : > { %v2733_v31 = vadd.f32 %v2732_v5, %v4997_v16  ;;  %v2869_v16 = vmul.f32 %v5016_v26, %v5016_v26 }
 0x288   : > { %v2993_v54 = vadd.f32 %v2992_v49, %v2866_v3  ;;  %2670 = vst.msk [vmem:[%s4568_s21 + $0x1a8] sm:$0xf] %vm2563_vm0, %v3594_v1  ;;  %v3595_v3 = vpack.c.bf16 %v5482_v15, %v5482_v15  ;;  %v5491_v49 = vld [vmem:[#allocation2 + $0x360] sm:$0xff] }
 0x289   : > { %v2734_v10 = vadd.f32 %v2733_v31, %v5009_v21  ;;  %v2870_v21 = vmul.f32 %v5018_v27, %v5018_v27 }
 0x28a   : > { %v2994_v55 = vadd.f32 %v2993_v54, %v2867_v9  ;;  %2671 = vst.msk [vmem:[%s4568_s21 + $0x1ac] sm:$0xf] %vm2563_vm0, %v3595_v3  ;;  %v3596_v9 = vpack.c.bf16 %v5491_v49, %v5491_v49  ;;  %v5500_v54 = vld [vmem:[#allocation2 + $0x368] sm:$0xff] }
 0x28b   : > { %v2735_v5 = vadd.f32 %v2734_v10, %v5016_v26  ;;  %v2871_v26 = vmul.f32 %v5030_v34, %v5030_v34 }
 0x28c   : > { %v2995_v62 = vadd.f32 %v2994_v55, %v2868_v13  ;;  %2672 = vst.msk [vmem:[%s4568_s21 + $0x1b0] sm:$0xf] %vm2563_vm0, %v3596_v9  ;;  %v3597_v13 = vpack.c.bf16 %v5500_v54, %v5500_v54  ;;  %v5509_v55 = vld [vmem:[#allocation2 + $0x370] sm:$0xff] }
 0x28d   : > { %v2736_v31 = vadd.f32 %v2735_v5, %v5018_v27  ;;  %v2872_v27 = vmul.f32 %v5037_v37, %v5037_v37 }
 0x28e   : > { %v2996_v1 = vadd.f32 %v2995_v62, %v2869_v16  ;;  %2673 = vst.msk [vmem:[%s4568_s21 + $0x1b4] sm:$0xf] %vm2563_vm0, %v3597_v13  ;;  %v3598_v16 = vpack.c.bf16 %v5509_v55, %v5509_v55  ;;  %v5518_v62 = vld [vmem:[#allocation2 + $0x378] sm:$0xff] }
 0x28f   : > { %v2737_v10 = vadd.f32 %v2736_v31, %v5030_v34  ;;  %v2873_v34 = vmul.f32 %v5039_v39, %v5039_v39 }
 0x290   : > { %v2997_v3 = vadd.f32 %v2996_v1, %v2870_v21  ;;  %2674 = vst.msk [vmem:[%s4568_s21 + $0x1b8] sm:$0xf] %vm2563_vm0, %v3598_v16  ;;  %v3599_v21 = vpack.c.bf16 %v5518_v62, %v5518_v62  ;;  %v5527_v1 = vld [vmem:[#allocation2 + $0x380] sm:$0xff] }
 0x291   : > { %v2738_v5 = vadd.f32 %v2737_v10, %v5037_v37  ;;  %v2874_v37 = vmul.f32 %v5051_v42, %v5051_v42 }
 0x292   : > { %v2998_v9 = vadd.f32 %v2997_v3, %v2871_v26  ;;  %2675 = vst.msk [vmem:[%s4568_s21 + $0x1bc] sm:$0xf] %vm2563_vm0, %v3599_v21  ;;  %v3600_v26 = vpack.c.bf16 %v5527_v1, %v5527_v1  ;;  %v5536_v3 = vld [vmem:[#allocation2 + $0x388] sm:$0xff] }
 0x293   : > { %v2739_v31 = vadd.f32 %v2738_v5, %v5039_v39  ;;  %v2875_v39 = vmul.f32 %v5058_v53, %v5058_v53 }
 0x294   : > { %v2999_v13 = vadd.f32 %v2998_v9, %v2872_v27  ;;  %2676 = vst.msk [vmem:[%s4568_s21 + $0x1c0] sm:$0xf] %vm2563_vm0, %v3600_v26  ;;  %v3601_v27 = vpack.c.bf16 %v5536_v3, %v5536_v3  ;;  %v5545_v9 = vld [vmem:[#allocation2 + $0x390] sm:$0xff] }
 0x295   : > { %v2740_v10 = vadd.f32 %v2739_v31, %v5051_v42  ;;  %v2876_v42 = vmul.f32 %v5060_v56, %v5060_v56 }
 0x296   : > { %v3000_v16 = vadd.f32 %v2999_v13, %v2873_v34  ;;  %2677 = vst.msk [vmem:[%s4568_s21 + $0x1c4] sm:$0xf] %vm2563_vm0, %v3601_v27  ;;  %v3602_v34 = vpack.c.bf16 %v5545_v9, %v5545_v9  ;;  %v5554_v13 = vld [vmem:[#allocation2 + $0x398] sm:$0xff] }
 0x297   : > { %v2741_v5 = vadd.f32 %v2740_v10, %v5058_v53  ;;  %v2877_v53 = vmul.f32 %v5072_v63, %v5072_v63 }
 0x298   : > { %v3001_v21 = vadd.f32 %v3000_v16, %v2874_v37  ;;  %2678 = vst.msk [vmem:[%s4568_s21 + $0x1c8] sm:$0xf] %vm2563_vm0, %v3602_v34  ;;  %v3603_v37 = vpack.c.bf16 %v5554_v13, %v5554_v13  ;;  %v5563_v16 = vld [vmem:[#allocation2 + $0x3a0] sm:$0xff] }
 0x299   : > { %v2742_v31 = vadd.f32 %v2741_v5, %v5060_v56  ;;  %v2878_v56 = vmul.f32 %v5079_v7, %v5079_v7 }
 0x29a   : > { %v3002_v26 = vadd.f32 %v3001_v21, %v2875_v39  ;;  %2679 = vst.msk [vmem:[%s4568_s21 + $0x1cc] sm:$0xf] %vm2563_vm0, %v3603_v37  ;;  %v3604_v39 = vpack.c.bf16 %v5563_v16, %v5563_v16  ;;  %v5572_v21 = vld [vmem:[#allocation2 + $0x3a8] sm:$0xff] }
 0x29b   : > { %v2743_v10 = vadd.f32 %v2742_v31, %v5072_v63  ;;  %v2879_v63 = vmul.f32 %v5081_v48, %v5081_v48 }
 0x29c   : > { %v3003_v27 = vadd.f32 %v3002_v26, %v2876_v42  ;;  %2680 = vst.msk [vmem:[%s4568_s21 + $0x1d0] sm:$0xf] %vm2563_vm0, %v3604_v39  ;;  %v3605_v42 = vpack.c.bf16 %v5572_v21, %v5572_v21  ;;  %v5581_v26 = vld [vmem:[#allocation2 + $0x3b0] sm:$0xff] }
 0x29d   : > { %v2744_v5 = vadd.f32 %v2743_v10, %v5079_v7  ;;  %v2880_v7 = vmul.f32 %v5093_v17, %v5093_v17 }
 0x29e   : > { %v3004_v34 = vadd.f32 %v3003_v27, %v2877_v53  ;;  %2681 = vst.msk [vmem:[%s4568_s21 + $0x1d4] sm:$0xf] %vm2563_vm0, %v3605_v42  ;;  %v3606_v53 = vpack.c.bf16 %v5581_v26, %v5581_v26  ;;  %v5590_v27 = vld [vmem:[#allocation2 + $0x3b8] sm:$0xff] }
 0x29f   : > { %v2745_v31 = vadd.f32 %v2744_v5, %v5081_v48  ;;  %v2881_v48 = vmul.f32 %v5100_v19, %v5100_v19 }
 0x2a0   : > { %v3005_v37 = vadd.f32 %v3004_v34, %v2878_v56  ;;  %2682 = vst.msk [vmem:[%s4568_s21 + $0x1d8] sm:$0xf] %vm2563_vm0, %v3606_v53  ;;  %v3607_v56 = vpack.c.bf16 %v5590_v27, %v5590_v27  ;;  %v5599_v34 = vld [vmem:[#allocation2 + $0x3c0] sm:$0xff] }
 0x2a1   : > { %v2746_v10 = vadd.f32 %v2745_v31, %v5093_v17  ;;  %v2882_v17 = vmul.f32 %v5102_v22, %v5102_v22 }
 0x2a2   : > { %v3006_v39 = vadd.f32 %v3005_v37, %v2879_v63  ;;  %2683 = vst.msk [vmem:[%s4568_s21 + $0x1dc] sm:$0xf] %vm2563_vm0, %v3607_v56  ;;  %v3608_v63 = vpack.c.bf16 %v5599_v34, %v5599_v34  ;;  %v5608_v37 = vld [vmem:[#allocation2 + $0x3c8] sm:$0xff] }
 0x2a3   : > { %v2747_v5 = vadd.f32 %v2746_v10, %v5100_v19  ;;  %v2883_v19 = vmul.f32 %v5114_v52, %v5114_v52 }
 0x2a4   : > { %v3007_v42 = vadd.f32 %v3006_v39, %v2880_v7  ;;  %2684 = vst.msk [vmem:[%s4568_s21 + $0x1e0] sm:$0xf] %vm2563_vm0, %v3608_v63  ;;  %v3609_v7 = vpack.c.bf16 %v5608_v37, %v5608_v37  ;;  %v5617_v39 = vld [vmem:[#allocation2 + $0x3d0] sm:$0xff] }
 0x2a5   : > { %v2748_v31 = vadd.f32 %v2747_v5, %v5102_v22  ;;  %v2884_v22 = vmul.f32 %v5121_v36, %v5121_v36 }
 0x2a6   : > { %v3008_v53 = vadd.f32 %v3007_v42, %v2881_v48  ;;  %2685 = vst.msk [vmem:[%s4568_s21 + $0x1e4] sm:$0xf] %vm2563_vm0, %v3609_v7  ;;  %v3610_v48 = vpack.c.bf16 %v5617_v39, %v5617_v39  ;;  %v5626_v42 = vld [vmem:[#allocation2 + $0x3d8] sm:$0xff] }
 0x2a7   : > { %v2749_v10 = vadd.f32 %v2748_v31, %v5114_v52  ;;  %v2885_v52 = vmul.f32 %v5123_v40, %v5123_v40 }
 0x2a8   : > { %v3009_v56 = vadd.f32 %v3008_v53, %v2882_v17  ;;  %2686 = vst.msk [vmem:[%s4568_s21 + $0x1e8] sm:$0xf] %vm2563_vm0, %v3610_v48  ;;  %v3611_v17 = vpack.c.bf16 %v5626_v42, %v5626_v42  ;;  %v5635_v53 = vld [vmem:[#allocation2 + $0x3e0] sm:$0xff] }
 0x2a9   : > { %v2750_v5 = vadd.f32 %v2749_v10, %v5121_v36  ;;  %v2886_v36 = vmul.f32 %v5135_v47, %v5135_v47 }
 0x2aa   : > { %v3010_v63 = vadd.f32 %v3009_v56, %v2883_v19  ;;  %2687 = vst.msk [vmem:[%s4568_s21 + $0x1ec] sm:$0xf] %vm2563_vm0, %v3611_v17  ;;  %v3612_v19 = vpack.c.bf16 %v5635_v53, %v5635_v53  ;;  %v5644_v56 = vld [vmem:[#allocation2 + $0x3e8] sm:$0xff] }
 0x2ab   : > { %v2751_v31 = vadd.f32 %v2750_v5, %v5123_v40  ;;  %6028 = vst [vmem:[#allocation30_spill] sm:$0xff] %v5644_v56  ;;  %v2887_v40 = vmul.f32 %v5142_v43, %v5142_v43 }
 0x2ac   : > { %v3011_v7 = vadd.f32 %v3010_v63, %v2884_v22  ;;  %2688 = vst.msk [vmem:[%s4568_s21 + $0x1f0] sm:$0xf] %vm2563_vm0, %v3612_v19  ;;  %v3613_v22 = vpack.c.bf16 %v5644_v56, %v5644_v56  ;;  %v5653_v63 = vld [vmem:[#allocation2 + $0x3f0] sm:$0xff]  ;;  %v2889_v56 = vmul.f32 %v5156_v8, %v5156_v8 }
 0x2ad   : > { %v2752_v10 = vadd.f32 %v2751_v31, %v5135_v47  ;;  %v2888_v47 = vmul.f32 %v5144_v60, %v5144_v60 }
 0x2ae   : > { %v3012_v48 = vadd.f32 %v3011_v7, %v2885_v52  ;;  %2689 = vst.msk [vmem:[%s4568_s21 + $0x1f4] sm:$0xf] %vm2563_vm0, %v3613_v22  ;;  %v3614_v52 = vpack.c.bf16 %v5653_v63, %v5653_v63  ;;  %v5662_v7 = vld [vmem:[#allocation2 + $0x3f8] sm:$0xff] }
 0x2af   : > { %v2753_v5 = vadd.f32 %v2752_v10, %v5142_v43  ;;  %v3615_v43 = vpack.c.bf16 %v5662_v7, %v5662_v7 }
 0x2b0   : > { %v3013_v17 = vadd.f32 %v3012_v48, %v2886_v36  ;;  %2690 = vst.msk [vmem:[%s4568_s21 + $0x1f8] sm:$0xf] %vm2563_vm0, %v3614_v52  ;;  %v2890_v48 = vmul.f32 %v5163_v12, %v5163_v12  ;;  %v2892_v52 = vmul.f32 %v5177_v2, %v5177_v2 }
 0x2b1   : > { %v2754_v31 = vadd.f32 %v2753_v5, %v5144_v60  ;;  %2691 = vst.msk [vmem:[%s4568_s21 + $0x1fc] sm:$0xf] %vm2563_vm0, %v3615_v43 }
 0x2b2   : > { %v3014_v19 = vadd.f32 %v3013_v17, %v2887_v40  ;;  %v2891_v40 = vmul.f32 %v5165_v18, %v5165_v18 }
 0x2b3   : > { %v2755_v36 = vadd.f32 %v2754_v31, %v5156_v8  ;;  %v2893_v31 = vmul.f32 %v5184_v35, %v5184_v35 }
 0x2b4   : > { %v3015_v10 = vadd.f32 %v3014_v19, %v2888_v47 }
 0x2b5   : > { %v2756_v60 = vadd.f32 %v2755_v36, %v5163_v12  ;;  %v2894_v12 = vmul.f32 %v5186_v45, %v5186_v45 }
 0x2b6   : > { %v3016_v22 = vadd.f32 %v3015_v10, %v2889_v56 }
 0x2b7   : > { %v2757_v5 = vadd.f32 %v2756_v60, %v5165_v18  ;;  %v2895_v18 = vmul.f32 %v5198_v50, %v5198_v50 }
 0x2b8   : > { %v3017_v17 = vadd.f32 %v3016_v22, %v2890_v48 }
 0x2b9   : > { %v2758_v8 = vadd.f32 %v2757_v5, %v5177_v2  ;;  %v2896_v2 = vmul.f32 %v5205_v0, %v5205_v0 }
 0x2ba   : > { %v3018_v47 = vadd.f32 %v3017_v17, %v2891_v40 }
 0x2bb   : > { %v2759_v19 = vadd.f32 %v2758_v8, %v5184_v35  ;;  %v2897_v35 = vmul.f32 %v5207_v6, %v5207_v6 }
 0x2bc   : > { %v3019_v43 = vadd.f32 %v3018_v47, %v2892_v52 }
 0x2bd   : > { %v2760_v56 = vadd.f32 %v2759_v19, %v5186_v45  ;;  %v2898_v45 = vmul.f32 %v5219_v51, %v5219_v51 }
 0x2be   : > { %v3020_v36 = vadd.f32 %v3019_v43, %v2893_v31 }
 0x2bf   : > { %v2761_v10 = vadd.f32 %v2760_v56, %v5198_v50  ;;  %v2899_v50 = vmul.f32 %v5226_v28, %v5226_v28 }
 0x2c0   : > { %v3021_v48 = vadd.f32 %v3020_v36, %v2894_v12 }
 0x2c1   : > { %v2762_v60 = vadd.f32 %v2761_v10, %v5205_v0  ;;  %v2900_v0 = vmul.f32 %v5228_v30, %v5228_v30 }
 0x2c2   : > { %v3022_v22 = vadd.f32 %v3021_v48, %v2895_v18 }
 0x2c3   : > { %v2763_v40 = vadd.f32 %v2762_v60, %v5207_v6  ;;  %v6029_v6 = vld [vmem:[#allocation17_spill] sm:$0xff] }
 0x2c4   : > { %v3023_v5 = vadd.f32 %v3022_v22, %v2896_v2  ;;  %v2901_v43 = vmul.f32 %v6029_v6, %v6029_v6 }
 0x2c5   : > { %v2764_v17 = vadd.f32 %v2763_v40, %v5219_v51  ;;  %v6030_v51 = vld [vmem:[#allocation18_spill] sm:$0xff]  ;;  %v6032_v40 = vld [vmem:[#allocation20_spill] sm:$0xff] }
 0x2c6   : > { %v3024_v52 = vadd.f32 %v3023_v5, %v2897_v35  ;;  %v2902_v36 = vmul.f32 %v6030_v51, %v6030_v51  ;;  %v2905_v5 = vmul.f32 %v6032_v40, %v6032_v40 }
 0x2c7   : > { %v2765_v8 = vadd.f32 %v2764_v17, %v5226_v28  ;;  %v2903_v28 = vmul.f32 %v5249_v4, %v5249_v4 }
 0x2c8   : > { %v3025_v47 = vadd.f32 %v3024_v52, %v2898_v45  ;;  %v2906_v52 = vmul.f32 %v5270_v20, %v5270_v20 }
 0x2c9   : > { %v2766_v31 = vadd.f32 %v2765_v8, %v5228_v30  ;;  %v6031_v30 = vld [vmem:[#allocation19_spill] sm:$0xff] }
 0x2ca   : > { %v3026_v19 = vadd.f32 %v3025_v47, %v2899_v50  ;;  %v2904_v60 = vmul.f32 %v6031_v30, %v6031_v30 }
 0x2cb   : > { %v2767_v12 = vadd.f32 %v2766_v31, %v6029_v6 }
 0x2cc   : > { %v3027_v56 = vadd.f32 %v3026_v19, %v2900_v0  ;;  %v6034_v19 = vld [vmem:[#allocation22_spill] sm:$0xff] }
 0x2cd   : > { %v2768_v18 = vadd.f32 %v2767_v12, %v6030_v51  ;;  %v2908_v6 = vmul.f32 %v6034_v19, %v6034_v19 }
 0x2ce   : > { %v3028_v10 = vadd.f32 %v3027_v56, %v2901_v43  ;;  %v2909_v56 = vmul.f32 %v5291_v23, %v5291_v23 }
 0x2cf   : > { %v2769_v48 = vadd.f32 %v2768_v18, %v5249_v4  ;;  %v6033_v4 = vld [vmem:[#allocation21_spill] sm:$0xff] }
 0x2d0   : > { %v3029_v2 = vadd.f32 %v3028_v10, %v2902_v36  ;;  %v2907_v47 = vmul.f32 %v6033_v4, %v6033_v4 }
 0x2d1   : > { %v2770_v22 = vadd.f32 %v2769_v48, %v6031_v30  ;;  %v6036_v48 = vld [vmem:[#allocation24_spill] sm:$0xff] }
 0x2d2   : > { %v3030_v35 = vadd.f32 %v3029_v2, %v2903_v28  ;;  %v2911_v2 = vmul.f32 %v6036_v48, %v6036_v48 }
 0x2d3   : > { %v2771_v45 = vadd.f32 %v2770_v22, %v6032_v40  ;;  %v2912_v22 = vmul.f32 %v5312_v24, %v5312_v24 }
 0x2d4   : > { %v3031_v17 = vadd.f32 %v3030_v35, %v2904_v60 }
 0x2d5   : > { %v2772_v50 = vadd.f32 %v2771_v45, %v5270_v20  ;;  %v6035_v20 = vld [vmem:[#allocation23_spill] sm:$0xff] }
 0x2d6   : > { %v3032_v8 = vadd.f32 %v3031_v17, %v2905_v5  ;;  %v2910_v18 = vmul.f32 %v6035_v20, %v6035_v20 }
 0x2d7   : > { %v2773_v0 = vadd.f32 %v2772_v50, %v6033_v4 }
 0x2d8   : > { %v3033_v31 = vadd.f32 %v3032_v8, %v2906_v52  ;;  %v6038_v52 = vld [vmem:[#allocation26_spill] sm:$0xff] }
 0x2d9   : > { %v2774_v43 = vadd.f32 %v2773_v0, %v6034_v19  ;;  %v2914_v50 = vmul.f32 %v6038_v52, %v6038_v52 }
 0x2da   : > { %v3034_v12 = vadd.f32 %v3033_v31, %v2907_v47  ;;  %v2915_v47 = vmul.f32 %v5333_v29, %v5333_v29 }
 0x2db   : > { %v2775_v51 = vadd.f32 %v2774_v43, %v5291_v23  ;;  %v6037_v23 = vld [vmem:[#allocation25_spill] sm:$0xff] }
 0x2dc   : > { %v3035_v36 = vadd.f32 %v3034_v12, %v2908_v6  ;;  %v2913_v5 = vmul.f32 %v6037_v23, %v6037_v23  ;;  %v6040_v12 = vld [vmem:[#allocation28_spill] sm:$0xff] }
 0x2dd   : > { %v2776_v10 = vadd.f32 %v2775_v51, %v6035_v20  ;;  %v2918_v20 = vmul.f32 %v5354_v32, %v5354_v32 }
 0x2de   : > { %v3036_v28 = vadd.f32 %v3035_v36, %v2909_v56  ;;  %v2917_v56 = vmul.f32 %v6040_v12, %v6040_v12 }
 0x2df   : > { %v2777_v30 = vadd.f32 %v2776_v10, %v6036_v48 }
 0x2e0   : > { %v3037_v60 = vadd.f32 %v3036_v28, %v2910_v18 }
 0x2e1   : > { %v2778_v35 = vadd.f32 %v2777_v30, %v5312_v24  ;;  %v6039_v24 = vld [vmem:[#allocation27_spill] sm:$0xff]  ;;  %v2920_v30 = vmul.f32 %v5373_v46, %v5373_v46 }
 0x2e2   : > { %v3038_v40 = vadd.f32 %v3037_v60, %v2911_v2  ;;  %v2916_v19 = vmul.f32 %v6039_v24, %v6039_v24 }
 0x2e3   : > { %v2779_v45 = vadd.f32 %v2778_v35, %v6037_v23  ;;  %v2921_v35 = vmul.f32 %v5375_v33, %v5375_v33 }
 0x2e4   : > { %v3039_v17 = vadd.f32 %v3038_v40, %v2912_v22 }
 0x2e5   : > { %v2780_v8 = vadd.f32 %v2779_v45, %v6038_v52 }
 0x2e6   : > { %v3040_v4 = vadd.f32 %v3039_v17, %v2913_v5  ;;  %v2923_v17 = vmul.f32 %v5401_v44, %v5401_v44 }
 0x2e7   : > { %v2781_v0 = vadd.f32 %v2780_v8, %v5333_v29  ;;  %v6041_v29 = vld [vmem:[#allocation29_spill] sm:$0xff] }
 0x2e8   : > { %v3041_v31 = vadd.f32 %v3040_v4, %v2914_v50  ;;  %v2919_v28 = vmul.f32 %v6041_v29, %v6041_v29 }
 0x2e9   : > { %v2782_v6 = vadd.f32 %v2781_v0, %v6039_v24 }
 0x2ea   : > { %v3042_v43 = vadd.f32 %v3041_v31, %v2915_v47 }
 0x2eb   : > { %v2783_v51 = vadd.f32 %v2782_v6, %v6040_v12 }
 0x2ec   : > { %v3043_v36 = vadd.f32 %v3042_v43, %v2916_v19 }
 0x2ed   : > { %v2784_v18 = vadd.f32 %v2783_v51, %v5354_v32  ;;  %v2922_v32 = vmul.f32 %v5390_v59, %v5390_v59 }
 0x2ee   : > { %v3044_v10 = vadd.f32 %v3043_v36, %v2917_v56 }
 0x2ef   : > { %v2785_v48 = vadd.f32 %v2784_v18, %v6041_v29 }
 0x2f0   : > { %v3045_v2 = vadd.f32 %v3044_v10, %v2918_v20 }
 0x2f1   : > { %v2786_v60 = vadd.f32 %v2785_v48, %v5373_v46  ;;  %v2924_v46 = vmul.f32 %v5410_v41, %v5410_v41 }
 0x2f2   : > { %v3046_v22 = vadd.f32 %v3045_v2, %v2919_v28 }
 0x2f3   : > { %v2787_v40 = vadd.f32 %v2786_v60, %v5375_v33  ;;  %v2925_v33 = vmul.f32 %v5419_v14, %v5419_v14 }
 0x2f4   : > { %v3047_v23 = vadd.f32 %v3046_v22, %v2920_v30 }
 0x2f5   : > { %v2788_v5 = vadd.f32 %v2787_v40, %v5390_v59  ;;  %v2926_v59 = vmul.f32 %v5428_v61, %v5428_v61 }
 0x2f6   : > { %v3048_v45 = vadd.f32 %v3047_v23, %v2921_v35 }
 0x2f7   : > { %v2789_v52 = vadd.f32 %v2788_v5, %v5401_v44  ;;  %v2927_v44 = vmul.f32 %v5437_v57, %v5437_v57 }
 0x2f8   : > { %v3049_v50 = vadd.f32 %v3048_v45, %v2922_v32 }
 0x2f9   : > { %v2790_v8 = vadd.f32 %v2789_v52, %v5410_v41  ;;  %v2928_v41 = vmul.f32 %v5446_v38, %v5446_v38 }
 0x2fa   : > { %v3050_v4 = vadd.f32 %v3049_v50, %v2923_v17 }
 0x2fb   : > { %v2791_v47 = vadd.f32 %v2790_v8, %v5419_v14  ;;  %v2929_v14 = vmul.f32 %v5455_v11, %v5455_v11 }
 0x2fc   : > { %v3051_v0 = vadd.f32 %v3050_v4, %v2924_v46 }
 0x2fd   : > { %v2792_v31 = vadd.f32 %v2791_v47, %v5428_v61  ;;  %v2930_v61 = vmul.f32 %v5464_v58, %v5464_v58 }
 0x2fe   : > { %v3052_v24 = vadd.f32 %v3051_v0, %v2925_v33 }
 0x2ff   : > { %v2793_v19 = vadd.f32 %v2792_v31, %v5437_v57  ;;  %v2931_v57 = vmul.f32 %v5473_v25, %v5473_v25 }
 0x300   : > { %v3053_v6 = vadd.f32 %v3052_v24, %v2926_v59 }
 0x301   : > { %v2794_v43 = vadd.f32 %v2793_v19, %v5446_v38  ;;  %v2932_v38 = vmul.f32 %v5482_v15, %v5482_v15 }
 0x302   : > { %v3054_v12 = vadd.f32 %v3053_v6, %v2927_v44 }
 0x303   : > { %v2795_v56 = vadd.f32 %v2794_v43, %v5455_v11  ;;  %v2933_v11 = vmul.f32 %v5491_v49, %v5491_v49 }
 0x304   : > { %v3055_v51 = vadd.f32 %v3054_v12, %v2928_v41 }
 0x305   : > { %v2796_v36 = vadd.f32 %v2795_v56, %v5464_v58  ;;  %v2934_v58 = vmul.f32 %v5500_v54, %v5500_v54 }
 0x306   : > { %v3056_v20 = vadd.f32 %v3055_v51, %v2929_v14 }
 0x307   : > { %v2797_v18 = vadd.f32 %v2796_v36, %v5473_v25  ;;  %v2935_v25 = vmul.f32 %v5509_v55, %v5509_v55 }
 0x308   : > { %v3057_v10 = vadd.f32 %v3056_v20, %v2930_v61 }
 0x309   : > { %v2798_v29 = vadd.f32 %v2797_v18, %v5482_v15  ;;  %v2936_v15 = vmul.f32 %v5518_v62, %v5518_v62 }
 0x30a   : > { %v3058_v28 = vadd.f32 %v3057_v10, %v2931_v57 }
 0x30b   : > { %v2799_v48 = vadd.f32 %v2798_v29, %v5491_v49  ;;  %v2937_v49 = vmul.f32 %v5527_v1, %v5527_v1 }
 0x30c   : > { %v3059_v2 = vadd.f32 %v3058_v28, %v2932_v38 }
 0x30d   : > { %v2800_v30 = vadd.f32 %v2799_v48, %v5500_v54  ;;  %v2938_v54 = vmul.f32 %v5536_v3, %v5536_v3 }
 0x30e   : > { %v3060_v60 = vadd.f32 %v3059_v2, %v2933_v11 }
 0x30f   : > { %v2801_v22 = vadd.f32 %v2800_v30, %v5509_v55  ;;  %v2939_v55 = vmul.f32 %v5545_v9, %v5545_v9  ;;  %v3086_v30 = vlaneseq }
 0x310   : > { %v3061_v35 = vadd.f32 %v3060_v60, %v2934_v58 }
 0x311   : > { %v2802_v40 = vadd.f32 %v2801_v22, %v5518_v62  ;;  %v2940_v62 = vmul.f32 %v5554_v13, %v5554_v13 }
 0x312   : > { %v3062_v23 = vadd.f32 %v3061_v35, %v2935_v25 }
 0x313   : > { %v2803_v32 = vadd.f32 %v2802_v40, %v5527_v1  ;;  %v2941_v1 = vmul.f32 %v5563_v16, %v5563_v16 }
 0x314   : > { %v3063_v5 = vadd.f32 %v3062_v23, %v2936_v15  ;;  %v3087_v15 = vshrl.u32 %v3086_v30, 7 }
 0x315   : > { %v2804_v45 = vadd.f32 %v2803_v32, %v5536_v3  ;;  %v2942_v3 = vmul.f32 %v5572_v21, %v5572_v21 }
 0x316   : > { %v3064_v17 = vadd.f32 %v3063_v5, %v2937_v49  ;;  %vm3089_vm1 = vcmp.eq.s32.totalorder %v3087_v15, 1  ;;  %vm3088_vm2 = vcmp.eq.s32.totalorder %v3087_v15, 0 }
 0x317   : > { %v2805_v52 = vadd.f32 %v2804_v45, %v5545_v9  ;;  %v2943_v9 = vmul.f32 %v5581_v26, %v5581_v26 }
 0x318   : > { %v3065_v50 = vadd.f32 %v3064_v17, %v2938_v54 }
 0x319   : > { %v2806_v46 = vadd.f32 %v2805_v52, %v5554_v13  ;;  %v2944_v13 = vmul.f32 %v5590_v27, %v5590_v27 }
 0x31a   : > { %v3066_v8 = vadd.f32 %v3065_v50, %v2939_v55 }
 0x31b   : > { %v2807_v4 = vadd.f32 %v2806_v46, %v5563_v16  ;;  %v2945_v16 = vmul.f32 %v5599_v34, %v5599_v34 }
 0x31c   : > { %v3067_v33 = vadd.f32 %v3066_v8, %v2940_v62 }
 0x31d   : > { %v2808_v47 = vadd.f32 %v2807_v4, %v5572_v21  ;;  %v2946_v21 = vmul.f32 %v5608_v37, %v5608_v37 }
 0x31e   : > { %v3068_v0 = vadd.f32 %v3067_v33, %v2941_v1 }
 0x31f   : > { %v2809_v59 = vadd.f32 %v2808_v47, %v5581_v26  ;;  %v2947_v26 = vmul.f32 %v5617_v39, %v5617_v39 }
 0x320   : > { %v3069_v31 = vadd.f32 %v3068_v0, %v2942_v3 }
 0x321   : > { %v2810_v24 = vadd.f32 %v2809_v59, %v5590_v27  ;;  %v2948_v27 = vmul.f32 %v5626_v42, %v5626_v42 }
 0x322   : > { %v3070_v44 = vadd.f32 %v3069_v31, %v2943_v9 }
 0x323   : > { %v2811_v19 = vadd.f32 %v2810_v24, %v5599_v34  ;;  %v2949_v34 = vmul.f32 %v5635_v53, %v5635_v53 }
 0x324   : > { %v3071_v6 = vadd.f32 %v3070_v44, %v2944_v13 }
 0x325   : > { %v2812_v41 = vadd.f32 %v2811_v19, %v5608_v37  ;;  %v6042_v37 = vld [vmem:[#allocation30_spill] sm:$0xff] }
 0x326   : > { %v3072_v43 = vadd.f32 %v3071_v6, %v2945_v16  ;;  %v2950_v20 = vmul.f32 %v6042_v37, %v6042_v37 }
 0x327   : > { %v2813_v12 = vadd.f32 %v2812_v41, %v5617_v39  ;;  %v2951_v39 = vmul.f32 %v5653_v63, %v5653_v63 }
 0x328   : > { %v3073_v14 = vadd.f32 %v3072_v43, %v2946_v21 }
 0x329   : > { %v2814_v56 = vadd.f32 %v2813_v12, %v5626_v42  ;;  %v2952_v42 = vmul.f32 %v5662_v7, %v5662_v7 }
 0x32a   : > { %v3074_v51 = vadd.f32 %v3073_v14, %v2947_v26 }
 0x32b   : > { %v2815_v61 = vadd.f32 %v2814_v56, %v5635_v53 }
 0x32c   : > { %v3075_v36 = vadd.f32 %v3074_v51, %v2948_v27 }
 0x32d   : > { %v2816_v57 = vadd.f32 %v2815_v61, %v6042_v37 }
 0x32e   : > { %v3076_v18 = vadd.f32 %v3075_v36, %v2949_v34 }
 0x32f   : > { %v2817_v10 = vadd.f32 %v2816_v57, %v5653_v63 }
 0x330   : > { %v3077_v38 = vadd.f32 %v3076_v18, %v2950_v20 }
 0x331   : > { %v2818_v29 = vadd.f32 %v2817_v10, %v5662_v7 }
 0x332   : > { %v3078_v28 = vadd.f32 %v3077_v38, %v2951_v39 }
 0x333   : > { %v2819_v53 = vrot.slane %v2818_v29, 4 }
 0x334   : > { %v3079_v11 = vadd.f32 %v3078_v28, %v2952_v42 }
 0x335   : > { %v2820_v48 = vadd.f32 %v2819_v53, %v2818_v29 }
 0x336   : > { %v3080_v2 = vrot.slane %v3079_v11, 4 }
 0x337   : > { %v2821_v58 = vrot.slane %v2820_v48, 2 }
 0x338   : > { %v3081_v60 = vadd.f32 %v3080_v2, %v3079_v11 }
 0x339   : > { %v2822_v25 = vadd.f32 %v2821_v58, %v2820_v48 }
 0x33a   : > { %v3082_v22 = vrot.slane %v3081_v60, 2 }
 0x33b   : > { %v2823_v35 = vrot.slane %v2822_v25, 1 }
 0x33c   : > { %v3083_v63 = vadd.f32 %v3082_v22, %v3081_v60 }
 0x33d   : > { %v2824_v23 = vadd.f32 %v2823_v35, %v2822_v25 }
 0x33e   : > { %v3084_v40 = vrot.slane %v3083_v63, 1 }
 0x340   : > { %v3085_v49 = vadd.f32 %v3084_v40, %v3083_v63 }
 0x342   : > { %v3090_v7 = vsel %vm3089_vm1, %v3085_v49, 0.0 }
 0x343   : > { %v3091_v32 = vsel %vm3088_vm2, %v2824_v23, %v3090_v7 }
 0x344   : > { %3092 = vst [vmem:[%s269_s28] sm:$0xff] %v3091_v32 }
 0x345 PF: > { %s6043_s15 = sld [smem:[#allocation33_spill]]  ;;  %s3120_s6 = sshll.u32 %s269_s28, 4  ;;  %s3121_s6 = int_to_ptr.vmem [resolvable:$true] %s3120_s6 }
 0x346   : > { %s3102_s23 = scalar_lea.sflag [#allocation5], %s267_s10  ;;  %s4116_s0 = scalar_lea.vmem %s3121_s6, 128 }
 0x347   : > { %p4117_p10 = scmp.ne.s32.totalorder %s3121_s6, %s4116_s0  ;;  %p6045_p9 = scmp.ne.s32.totalorder %s6004_s29, 0 }
 0x348   : > { %s4274_s24 = smov [#allocation8]  }
 0x349   : > { %p4118_p3 = pnand %p4117_p10, %p6045_p9  ;;  %s4120_s3 = sshll.u32 %s4274_s24, 4  ;;  %s4121_s3 = int_to_ptr.vmem [resolvable:$false] %s4120_s3 }
 0x34a   : > { %s4122_s21 = scalar_lea.vmem %s4121_s3, 256  ;;  %p4123_p11 = scmp.lt.s32.totalorder %s3121_s6, %s4121_s3 }
 0x34b   : > { %s6044_s27 = smov %s6043_s15  ;;  %s5868_s2 = scalar_lea.hbm %s6043_s15, %s4557_s11 }
 0x34c   : > { %p4119_p6 = pneg %p4118_p3  ;;  %p4124_p12 = scmp.lt.s32.totalorder %s4122_s21, %s4116_s0 }
 0x34e   : > { %p4125_p0 = por %p4124_p12, %p4123_p11 }
 0x350   : > { %p4126_p8 = pnand %p4125_p0, %p4119_p6 }
 0x352   : > { %4129 = shalt.err (!%p4126_p8)
}
 0x353   : > { %s4130_s10 = scalar_lea.hbm %s5868_s2, 128  ;;  %s4134_s28 = scalar_lea.hbm %s6044_s27, 256 }
 0x354   : > { %p4131_p7 = scmp.ne.s32.totalorder %s5868_s2, %s4130_s10  ;;  %p4135_p4 = scmp.lt.u32.totalorder %s5868_s2, %s6044_s27 }
 0x355   : > { %p4136_p2 = scmp.lt.u32.totalorder %s4134_s28, %s4130_s10  ;;  %p4138_p10 = scmp.lt.u32.totalorder %s4130_s10, %s5868_s2 }
 0x356   : > { %p4132_p1 = pnand %p4131_p7, %p6045_p9 }
 0x357   : > { %p4137_p13 = por %p4136_p2, %p4135_p4 }
 0x358   : > { %p4133_p5 = pneg %p4132_p1 }
 0x359   : > { %p4139_p3 = por %p4138_p10, %p4137_p13 }
 0x35b   : > { %p4140_p6 = pnand %p4139_p3, %p4133_p5 }
 0x35d   : > { %4143 = shalt.err (!%p4140_p6)
}
 0x35e   : > { %3853 = dma.vmem_to_hbm [thread:$0]  (%p6045_p9), %s3121_s6, 128, %s5868_s2, %s3102_s23  }
 0x35f PF: > { %p3867_p11 = scmp.ge.s32.totalorder %s4266_s25, 2  ;;  %s3143_s18 = sand.u32 1, %s4214_s12  }
 0x360   : > { %p6046_p12 = scmp.ne.s32.totalorder %s6005_s30, 0  ;;  %s3144_s4 = scalar_lea.sflag [#allocation5], %s3143_s18 }
 0x362   : > { %p3863_p0 = pnand %p3867_p11, %p6046_p12 }
 0x364   : > { %4209 = dma.done.wait (!%p3863_p0), %s3144_s4, 128  }
 0x365   : > { %4211 = vsyncadd (!%p3863_p0), %s3144_s4, 4294967168  ;;  %s23_s25 = sadd.s32 1, %s4266_s25   ;;  %s6048_s21 = sld [smem:[#allocation13_spill]] }
 0x366   : > { %p5896_p8 = scmp.ge.s32.totalorder %s23_s25, 8   ;;  %s6049_s22 = sld [smem:[#allocation14_spill]] }
 0x367   : > { %s6050_s23 = sld [smem:[#allocation15_spill]]  ;;  %s6051_s24 = sld [smem:[#allocation16_spill]] }
 0x368   : > { %s6053_s12 = smov %s4218_s13  ;;  %s6054_s13 = smov %s4222_s14 }
 0x369   : > { %s6055_s14 = smov %s4396_s8  ;;  %s6056_s15 = smov %s4230_s16 }
 0x36a   : > { %s6057_s16 = smov %s4234_s17  ;;  %s6058_s17 = smov %s4462_s5 }
 0x36b   : > { %s6059_s18 = smov %s4242_s19  ;;  %s6060_s19 = smov %s4246_s20 }
 0x36c   : > { %s6061_s20 = smov %s4399_s9  ;;  %22 = sbr.rel (!%p5896_p8) target bundleno = 16 (0x10), region = 106 }
 0x373   :  { %3149 = vsyncpa [#allocation4], 1 }
 0x374   :  { %3151 = vsyncpa [#allocation4 + $0x1], 1 }
 0x375   :  { %3152 = vsyncpa [#allocation7], 1 }
 0x376   :  { %3154 = vsyncpa [#allocation7 + $0x1], 1 }
 0x377   :  { %3155 = vsyncpa [#allocation5], 1 }
 0x378   :  { %3157 = vsyncpa [#allocation5 + $0x1], 1 }

</bundles_post_ra>
